<compile_context>
chip_gen: v7x
topology: tpu7x:2x2x1
jax: 0.10.0
libtpu: 0.0.40
codegen_flags: <defaults>
</compile_context>

<pallas_src>
import functools
import math

import jax
import jax.numpy as jnp
from jax import lax
from jax.experimental import pallas as pl
from jax.experimental.pallas import tpu as pltpu

H = 32        # hidden_size      (module default 500)
V = 64        # vocab / out size (module default 7826)
T = 8         # encoder sequence length
N_LAYERS = 2
MAX_LENGTH = 5
SOS_TOKEN = 1

_VMEM = pl.BlockSpec(memory_space=pltpu.MemorySpace.VMEM)


# ----------------------------------------------------------------------------
# shared GRU cell math (PyTorch gate ordering: r, z, n)
# ----------------------------------------------------------------------------
def _gru_gates(gi_t, gh, h, hdim):
    r = jax.nn.sigmoid(gi_t[:, :hdim] + gh[:, :hdim])
    z = jax.nn.sigmoid(gi_t[:, hdim:2 * hdim] + gh[:, hdim:2 * hdim])
    n = jnp.tanh(gi_t[:, 2 * hdim:] + r * gh[:, 2 * hdim:])
    return (1.0 - z) * n + z * h


# ----------------------------------------------------------------------------
# Fused encoder: bidirectional 2-layer GRU over the whole sequence (1 kernel)
# ----------------------------------------------------------------------------
def encoder_kernel(x_ref,
                   wih0f_ref, whh0f_ref, bih0f_ref, bhh0f_ref,
                   wih0b_ref, whh0b_ref, bih0b_ref, bhh0b_ref,
                   wih1fa_ref, wih1fb_ref, whh1f_ref, bih1f_ref, bhh1f_ref,
                   wih1ba_ref, wih1bb_ref, whh1b_ref, bih1b_ref, bhh1b_ref,
                   enc_out_ref, dec_h_ref,
                   f0_scr, b0_scr,
                   *, hdim, seq_len):
    x = x_ref[...]                                        # (T, H) embedded seq

    def run(gi, whh, bhh, emit, reverse):
        # gi: (T, 3H) precomputed input projection (hoisted out of the loop)
        h = jnp.zeros((1, hdim), jnp.float32)
        order = range(seq_len - 1, -1, -1) if reverse else range(seq_len)
        # TODO(synk): for long seq_len switch to lax.fori_loop(..., unroll=2..4).
        for t in order:
            gh = jnp.dot(h, whh, preferred_element_type=jnp.float32) + bhh
            h = _gru_gates(gi[t:t + 1, :], gh, h, hdim)
            emit(t, h)
        return h

    # ---- layer 0 (fwd + bwd), input projection batched over all timesteps ----
    gi0f = jnp.dot(x, wih0f_ref[...], preferred_element_type=jnp.float32) + bih0f_ref[...]
    gi0b = jnp.dot(x, wih0b_ref[...], preferred_element_type=jnp.float32) + bih0b_ref[...]

    def emit_f0(t, h):
        f0_scr[pl.ds(t, 1), :] = h

    def emit_b0(t, h):
        b0_scr[pl.ds(t, 1), :] = h

    hf0f = run(gi0f, whh0f_ref[...], bhh0f_ref[...], emit_f0, reverse=False)
    hf0b = run(gi0b, whh0b_ref[...], bhh0b_ref[...], emit_b0, reverse=True)

    f0 = f0_scr[...]                                      # (T, H)
    b0 = b0_scr[...]                                      # (T, H)

    # ---- layer 1 (fwd + bwd); concat([f0, b0]) @ Wih done as split matmuls ----
    gi1f = (jnp.dot(f0, wih1fa_ref[...], preferred_element_type=jnp.float32)
            + jnp.dot(b0, wih1fb_ref[...], preferred_element_type=jnp.float32)
            + bih1f_ref[...])
    gi1b = (jnp.dot(f0, wih1ba_ref[...], preferred_element_type=jnp.float32)
            + jnp.dot(b0, wih1bb_ref[...], preferred_element_type=jnp.float32)
            + bih1b_ref[...])

    def emit_f1(t, h):
        enc_out_ref[pl.ds(t, 1), :] = h

    def emit_b1(t, h):  # outputs[:, :H] + outputs[:, H:]  (sum of directions)
        enc_out_ref[pl.ds(t, 1), :] = enc_out_ref[pl.ds(t, 1), :] + h

    run(gi1f, whh1f_ref[...], bhh1f_ref[...], emit_f1, reverse=False)
    run(gi1b, whh1b_ref[...], bhh1b_ref[...], emit_b1, reverse=True)

    # decoder_hidden = encoder_hidden[:n_layers] == [layer0_fwd_final, layer0_bwd_final]
    dec_h_ref[pl.ds(0, 1), :] = hf0f
    dec_h_ref[pl.ds(1, 1), :] = hf0b


def run_encoder(emb_seq, params):
    kernel = functools.partial(encoder_kernel, hdim=H, seq_len=T)
    enc_out, dec_hidden = pl.pallas_call(
        kernel,
        out_shape=(jax.ShapeDtypeStruct((T, H), jnp.float32),
                   jax.ShapeDtypeStruct((N_LAYERS, H), jnp.float32)),
        in_specs=[_VMEM] * 19,
        out_specs=(_VMEM, _VMEM),
        scratch_shapes=[pltpu.VMEM((T, H), jnp.float32),
                        pltpu.VMEM((T, H), jnp.float32)],
    )(emb_seq,
      params["enc_l0_f"]["wih_t"], params["enc_l0_f"]["whh_t"],
      params["enc_l0_f"]["bih"], params["enc_l0_f"]["bhh"],
      params["enc_l0_b"]["wih_t"], params["enc_l0_b"]["whh_t"],
      params["enc_l0_b"]["bih"], params["enc_l0_b"]["bhh"],
      params["enc_l1_f"]["wih_a_t"], params["enc_l1_f"]["wih_b_t"],
      params["enc_l1_f"]["whh_t"], params["enc_l1_f"]["bih"], params["enc_l1_f"]["bhh"],
      params["enc_l1_b"]["wih_a_t"], params["enc_l1_b"]["wih_b_t"],
      params["enc_l1_b"]["whh_t"], params["enc_l1_b"]["bih"], params["enc_l1_b"]["bhh"])
    return enc_out, dec_hidden


# ----------------------------------------------------------------------------
# Fused greedy decode: all max_length attention-decoder steps in ONE kernel
# ----------------------------------------------------------------------------
def decode_kernel(emb_ref, enc_ref, h_init_ref,
                  wih0_ref, whh0_ref, bih0_ref, bhh0_ref,
                  wih1_ref, whh1_ref, bih1_ref, bhh1_ref,
                  wc_ref, bc_ref, wo_ref, bo_ref,
                  tok_ref, score_ref,
                  *, hdim, vocab, max_len):
    # all weights loaded into vregs/VMEM once, reused for every decode step
    emb = emb_ref[...]                                    # (V, H)
    enc = enc_ref[...]                                    # (T, H)
    wih0, whh0 = wih0_ref[...], whh0_ref[...]
    bih0, bhh0 = bih0_ref[...], bhh0_ref[...]
    wih1, whh1 = wih1_ref[...], whh1_ref[...]
    bih1, bhh1 = bih1_ref[...], bhh1_ref[...]
    wc, bc = wc_ref[...], bc_ref[...]
    wo, bo = wo_ref[...], bo_ref[...]

    lane_iota = lax.broadcasted_iota(jnp.int32, (1, vocab), 1)
    step_iota = lax.broadcasted_iota(jnp.int32, (max_len, 1), 0)

    def cell(x, h, wih, whh, bih, bhh):
        gi = jnp.dot(x, wih, preferred_element_type=jnp.float32) + bih
        gh = jnp.dot(h, whh, preferred_element_type=jnp.float32) + bhh
        return _gru_gates(gi, gh, h, hdim)

    def body(step, carry):
        h0, h1, x, toks, scores = carry
        # TODO(synk): embedding / inter-layer dropout are identity (eval mode).
        # 2-layer unidirectional GRU, one time step
        h0n = cell(x, h0, wih0, whh0, bih0, bhh0)
        h1n = cell(h0n, h1, wih1, whh1, bih1, bhh1)
        rnn_out = h1n                                     # (1, H)

        # dot attention over encoder outputs + softmax (reciprocal on EUP)
        att = lax.dot_general(rnn_out, enc,
                              dimension_numbers=(((1,), (1,)), ((), ())),
                              preferred_element_type=jnp.float32)   # (1, T)
        att_m = jnp.max(att, axis=1, keepdims=True)
        att_e = jnp.exp(att - att_m)
        attn = att_e * pl.reciprocal(jnp.sum(att_e, axis=1, keepdims=True),
                                     approx=True)                   # (1, T)
        context = jnp.dot(attn, enc, preferred_element_type=jnp.float32)  # (1, H)

        # concat([rnn_out, context]) @ Wc_t + bc  (weight split, no concat op)
        concat_out = jnp.tanh(
            jnp.dot(rnn_out, wc[:hdim, :], preferred_element_type=jnp.float32)
            + jnp.dot(context, wc[hdim:, :], preferred_element_type=jnp.float32)
            + bc)                                                    # (1, H)

        # output projection; argmax on logits == argmax of softmax, and
        # max(softmax) == 1 / sum(exp(logits - max))  -> never build probs.
        logits = jnp.dot(concat_out, wo, preferred_element_type=jnp.float32) + bo
        lmax = jnp.max(logits, axis=1, keepdims=True)                # (1, 1)
        tok = jnp.min(jnp.where(logits == lmax, lane_iota, vocab),
                      axis=1, keepdims=True)                         # (1, 1) int32
        z_sum = jnp.sum(jnp.exp(logits - lmax), axis=1, keepdims=True)
        score = pl.reciprocal(z_sum, approx=True)                    # (1, 1)

        sel = step_iota == step
        toks = jnp.where(sel, tok, toks)
        scores = jnp.where(sel, score, scores)

        # next-token embedding in-kernel as a one-hot matmul (exact row select,
        # stays in vector registers; avoids vector->scalar extraction).
        onehot = (lane_iota == tok).astype(jnp.float32)              # (1, V)
        x_next = jnp.dot(onehot, emb, preferred_element_type=jnp.float32)  # (1, H)
        return h0n, h1n, x_next, toks, scores

    h0 = h_init_ref[pl.ds(0, 1), :]
    h1 = h_init_ref[pl.ds(1, 1), :]
    x0 = emb_ref[pl.ds(SOS_TOKEN, 1), :]                  # SOS embedding (static row)
    toks0 = jnp.zeros((max_len, 1), jnp.int32)
    scores0 = jnp.zeros((max_len, 1), jnp.float32)

    _, _, _, toks, scores = lax.fori_loop(0, max_len, body,
                                          (h0, h1, x0, toks0, scores0))

    # outputs written once at the end (single output DMA for the whole decode)
    tok_ref[...] = toks
    score_ref[...] = scores


def run_decoder(enc_out, dec_hidden, params, max_length):
    kernel = functools.partial(decode_kernel, hdim=H, vocab=V, max_len=max_length)
    toks, scores = pl.pallas_call(
        kernel,
        out_shape=(jax.ShapeDtypeStruct((max_length, 1), jnp.int32),
                   jax.ShapeDtypeStruct((max_length, 1), jnp.float32)),
        in_specs=[_VMEM] * 15,
        out_specs=(_VMEM, _VMEM),
    )(params["emb"], enc_out, dec_hidden,
      params["dec_l0"]["wih_t"], params["dec_l0"]["whh_t"],
      params["dec_l0"]["bih"], params["dec_l0"]["bhh"],
      params["dec_l1"]["wih_t"], params["dec_l1"]["whh_t"],
      params["dec_l1"]["bih"], params["dec_l1"]["bhh"],
      params["wc_t"], params["bc"], params["wo_t"], params["bo"])
    return toks[:, 0], scores[:, 0]


# ----------------------------------------------------------------------------
# full GreedyDecoder forward
# ----------------------------------------------------------------------------
@functools.partial(jax.jit, static_argnums=(2,))
def greedy_decode(input_seq, input_length, max_length, params):
    del input_length  # batch=1, full-length sequence: pack/pad is a no-op
    emb_seq = params["emb"][input_seq]                    # (T, H) one-time gather
    enc_out, dec_hidden = run_encoder(emb_seq, params)
    return run_decoder(enc_out, dec_hidden, params, max_length)


# ----------------------------------------------------------------------------
# deterministic parameter init (shapes follow the nn.Module __init__)
# ----------------------------------------------------------------------------
def _init_gru_dir(key, din, hdim):
    k1, k2, k3, k4 = jax.random.split(key, 4)
    s = 1.0 / math.sqrt(hdim)
    wih = jax.random.uniform(k1, (3 * hdim, din), jnp.float32, -s, s)
    whh = jax.random.uniform(k2, (3 * hdim, hdim), jnp.float32, -s, s)
    bih = jax.random.uniform(k3, (3 * hdim,), jnp.float32, -s, s)
    bhh = jax.random.uniform(k4, (3 * hdim,), jnp.float32, -s, s)
    p = dict(wih_t=wih.T, whh_t=whh.T,
             bih=bih.reshape(1, -1), bhh=bhh.reshape(1, -1))
    if din == 2 * hdim:  # encoder layer-1: pre-split input projection (fwd/bwd halves)
        p["wih_a_t"] = p["wih_t"][:hdim]
        p["wih_b_t"] = p["wih_t"][hdim:]
    return p


def init_params(key):
    keys = jax.random.split(key, 12)
    s = 1.0 / math.sqrt(H)
    return {
        "emb": jax.random.normal(keys[0], (V, H), jnp.float32),
        # encoder: bidirectional 2-layer GRU
        "enc_l0_f": _init_gru_dir(keys[1], H, H),
        "enc_l0_b": _init_gru_dir(keys[2], H, H),
        "enc_l1_f": _init_gru_dir(keys[3], 2 * H, H),
        "enc_l1_b": _init_gru_dir(keys[4], 2 * H, H),
        # decoder: unidirectional 2-layer GRU
        "dec_l0": _init_gru_dir(keys[5], H, H),
        "dec_l1": _init_gru_dir(keys[6], H, H),
        # concat linear (H, 2H) and output linear (V, H), pre-transposed
        "wc_t": jax.random.uniform(keys[7], (2 * H, H), jnp.float32, -s, s),
        "bc": jax.random.uniform(keys[8], (1, H), jnp.float32, -s, s),
        "wo_t": jax.random.uniform(keys[9], (H, V), jnp.float32, -s, s),
        "bo": jax.random.uniform(keys[10], (1, V), jnp.float32, -s, s),
    }


if __name__ == "__main__":
    key = jax.random.PRNGKey(0)
    pkey, dkey = jax.random.split(key)
    params = init_params(pkey)

    input_seq = jax.random.randint(dkey, (T,), 2, V, dtype=jnp.int32)  # (T,), batch=1
    input_length = jnp.array([T], jnp.int32)

    all_tokens, all_scores = greedy_decode(input_seq, input_length,
                                           MAX_LENGTH, params)
    jax.block_until_ready((all_tokens, all_scores))
    assert all_tokens.shape == (MAX_LENGTH,) and all_tokens.dtype == jnp.int32
    assert all_scores.shape == (MAX_LENGTH,) and all_scores.dtype == jnp.float32
    print("KERNEL_OK")
</pallas_src>

<mosaic_0001>
module attributes {stable_mosaic.version = 11 : i64} {
  func.func @encoder_kernel(%arg0: memref<8x32xf32, #tpu.memory_space<vmem>>, %arg1: memref<32x96xf32, #tpu.memory_space<vmem>>, %arg2: memref<32x96xf32, #tpu.memory_space<vmem>>, %arg3: memref<1x96xf32, #tpu.memory_space<vmem>>, %arg4: memref<1x96xf32, #tpu.memory_space<vmem>>, %arg5: memref<32x96xf32, #tpu.memory_space<vmem>>, %arg6: memref<32x96xf32, #tpu.memory_space<vmem>>, %arg7: memref<1x96xf32, #tpu.memory_space<vmem>>, %arg8: memref<1x96xf32, #tpu.memory_space<vmem>>, %arg9: memref<32x96xf32, #tpu.memory_space<vmem>>, %arg10: memref<32x96xf32, #tpu.memory_space<vmem>>, %arg11: memref<32x96xf32, #tpu.memory_space<vmem>>, %arg12: memref<1x96xf32, #tpu.memory_space<vmem>>, %arg13: memref<1x96xf32, #tpu.memory_space<vmem>>, %arg14: memref<32x96xf32, #tpu.memory_space<vmem>>, %arg15: memref<32x96xf32, #tpu.memory_space<vmem>>, %arg16: memref<32x96xf32, #tpu.memory_space<vmem>>, %arg17: memref<1x96xf32, #tpu.memory_space<vmem>>, %arg18: memref<1x96xf32, #tpu.memory_space<vmem>>, %arg19: memref<8x32xf32, #tpu.memory_space<vmem>>, %arg20: memref<2x32xf32, #tpu.memory_space<vmem>>, %arg21: memref<8x32xf32, #tpu.memory_space<vmem>>, %arg22: memref<8x32xf32, #tpu.memory_space<vmem>>) attributes {dimension_semantics = [], scalar_prefetch = 0 : i64, scratch_operands = 2 : i64, tpu.core_type = #tpu.core_type<tc>} {
    %c0 = arith.constant 0 : index
    %c0_0 = arith.constant 0 : index
    %0 = vector.load %arg0[%c0, %c0_0] : memref<8x32xf32, #tpu.memory_space<vmem>>, vector<8x32xf32>
    %c0_1 = arith.constant 0 : index
    %c0_2 = arith.constant 0 : index
    %1 = vector.load %arg1[%c0_1, %c0_2] : memref<32x96xf32, #tpu.memory_space<vmem>>, vector<32x96xf32>
    %cst = arith.constant dense<0.000000e+00> : vector<8x96xf32>
    %2 = tpu.matmul %0, %1, %cst {dimension_numbers = #tpu.dot_dimension_numbers<[1], [0], [0], [1], [0, 0, 1, 1], [], []>} : vector<8x32xf32>, vector<32x96xf32>, vector<8x96xf32> -> vector<8x96xf32>
    %c0_3 = arith.constant 0 : index
    %c0_4 = arith.constant 0 : index
    %3 = vector.load %arg3[%c0_3, %c0_4] : memref<1x96xf32, #tpu.memory_space<vmem>>, vector<1x96xf32>
    %4 = vector.broadcast %3 : vector<1x96xf32> to vector<8x96xf32>
    %5 = arith.addf %2, %4 : vector<8x96xf32>
    %c0_5 = arith.constant 0 : index
    %c0_6 = arith.constant 0 : index
    %6 = vector.load %arg5[%c0_5, %c0_6] : memref<32x96xf32, #tpu.memory_space<vmem>>, vector<32x96xf32>
    %cst_7 = arith.constant dense<0.000000e+00> : vector<8x96xf32>
    %7 = tpu.matmul %0, %6, %cst_7 {dimension_numbers = #tpu.dot_dimension_numbers<[1], [0], [0], [1], [0, 0, 1, 1], [], []>} : vector<8x32xf32>, vector<32x96xf32>, vector<8x96xf32> -> vector<8x96xf32>
    %c0_8 = arith.constant 0 : index
    %c0_9 = arith.constant 0 : index
    %8 = vector.load %arg7[%c0_8, %c0_9] : memref<1x96xf32, #tpu.memory_space<vmem>>, vector<1x96xf32>
    %9 = vector.broadcast %8 : vector<1x96xf32> to vector<8x96xf32>
    %10 = arith.addf %7, %9 : vector<8x96xf32>
    %c0_10 = arith.constant 0 : index
    %c0_11 = arith.constant 0 : index
    %11 = vector.load %arg2[%c0_10, %c0_11] : memref<32x96xf32, #tpu.memory_space<vmem>>, vector<32x96xf32>
    %c0_12 = arith.constant 0 : index
    %c0_13 = arith.constant 0 : index
    %12 = vector.load %arg4[%c0_12, %c0_13] : memref<1x96xf32, #tpu.memory_space<vmem>>, vector<1x96xf32>
    %cst_14 = arith.constant 0.000000e+00 : f32
    %13 = vector.broadcast %cst_14 : f32 to vector<1x32xf32>
    %cst_15 = arith.constant dense<0.000000e+00> : vector<1x96xf32>
    %14 = tpu.matmul %13, %11, %cst_15 {dimension_numbers = #tpu.dot_dimension_numbers<[1], [0], [0], [1], [0, 0, 1, 1], [], []>} : vector<1x32xf32>, vector<32x96xf32>, vector<1x96xf32> -> vector<1x96xf32>
    %15 = arith.addf %14, %12 : vector<1x96xf32>
    %16 = vector.extract_strided_slice %5 {offsets = [0, 0], sizes = [1, 96], strides = [1, 1]} : vector<8x96xf32> to vector<1x96xf32>
    %17 = vector.extract_strided_slice %16 {offsets = [0, 0], sizes = [1, 32], strides = [1, 1]} : vector<1x96xf32> to vector<1x32xf32>
    %18 = vector.extract_strided_slice %15 {offsets = [0, 0], sizes = [1, 32], strides = [1, 1]} : vector<1x96xf32> to vector<1x32xf32>
    %19 = arith.addf %17, %18 : vector<1x32xf32>
    %20 = arith.negf %19 : vector<1x32xf32>
    %21 = math.exp %20 : vector<1x32xf32>
    %cst_16 = arith.constant 1.000000e+00 : f32
    %22 = vector.broadcast %cst_16 : f32 to vector<1x32xf32>
    %23 = arith.addf %22, %21 : vector<1x32xf32>
    %24 = arith.divf %22, %23 : vector<1x32xf32>
    %25 = vector.extract_strided_slice %16 {offsets = [0, 32], sizes = [1, 32], strides = [1, 1]} : vector<1x96xf32> to vector<1x32xf32>
    %26 = vector.extract_strided_slice %15 {offsets = [0, 32], sizes = [1, 32], strides = [1, 1]} : vector<1x96xf32> to vector<1x32xf32>
    %27 = arith.addf %25, %26 : vector<1x32xf32>
    %28 = arith.negf %27 : vector<1x32xf32>
    %29 = math.exp %28 : vector<1x32xf32>
    %cst_17 = arith.constant 1.000000e+00 : f32
    %30 = vector.broadcast %cst_17 : f32 to vector<1x32xf32>
    %31 = arith.addf %30, %29 : vector<1x32xf32>
    %32 = arith.divf %30, %31 : vector<1x32xf32>
    %33 = vector.extract_strided_slice %16 {offsets = [0, 64], sizes = [1, 32], strides = [1, 1]} : vector<1x96xf32> to vector<1x32xf32>
    %34 = vector.extract_strided_slice %15 {offsets = [0, 64], sizes = [1, 32], strides = [1, 1]} : vector<1x96xf32> to vector<1x32xf32>
    %35 = arith.mulf %24, %34 : vector<1x32xf32>
    %36 = arith.addf %33, %35 : vector<1x32xf32>
    %37 = math.tanh %36 : vector<1x32xf32>
    %cst_18 = arith.constant 1.000000e+00 : f32
    %38 = vector.broadcast %cst_18 : f32 to vector<1x32xf32>
    %39 = arith.subf %38, %32 : vector<1x32xf32>
    %40 = arith.mulf %39, %37 : vector<1x32xf32>
    %41 = arith.mulf %32, %13 : vector<1x32xf32>
    %42 = arith.addf %40, %41 : vector<1x32xf32>
    %c0_19 = arith.constant 0 : index
    %c0_20 = arith.constant 0 : index
    %43 = vector.load %arg21[%c0_19, %c0_20] : memref<8x32xf32, #tpu.memory_space<vmem>>, vector<1x32xf32>
    tpu.vector_store %arg21[%c0_19, %c0_20], %42 {strides = array<i32>} : memref<8x32xf32, #tpu.memory_space<vmem>>, vector<1x32xf32>,
    %cst_21 = arith.constant dense<0.000000e+00> : vector<1x96xf32>
    %44 = tpu.matmul %42, %11, %cst_21 {dimension_numbers = #tpu.dot_dimension_numbers<[1], [0], [0], [1], [0, 0, 1, 1], [], []>} : vector<1x32xf32>, vector<32x96xf32>, vector<1x96xf32> -> vector<1x96xf32>
    %45 = arith.addf %44, %12 : vector<1x96xf32>
    %46 = vector.extract_strided_slice %5 {offsets = [1, 0], sizes = [1, 96], strides = [1, 1]} : vector<8x96xf32> to vector<1x96xf32>
    %47 = vector.extract_strided_slice %46 {offsets = [0, 0], sizes = [1, 32], strides = [1, 1]} : vector<1x96xf32> to vector<1x32xf32>
    %48 = vector.extract_strided_slice %45 {offsets = [0, 0], sizes = [1, 32], strides = [1, 1]} : vector<1x96xf32> to vector<1x32xf32>
    %49 = arith.addf %47, %48 : vector<1x32xf32>
    %50 = arith.negf %49 : vector<1x32xf32>
    %51 = math.exp %50 : vector<1x32xf32>
    %cst_22 = arith.constant 1.000000e+00 : f32
    %52 = vector.broadcast %cst_22 : f32 to vector<1x32xf32>
    %53 = arith.addf %52, %51 : vector<1x32xf32>
    %54 = arith.divf %52, %53 : vector<1x32xf32>
    %55 = vector.extract_strided_slice %46 {offsets = [0, 32], sizes = [1, 32], strides = [1, 1]} : vector<1x96xf32> to vector<1x32xf32>
    %56 = vector.extract_strided_slice %45 {offsets = [0, 32], sizes = [1, 32], strides = [1, 1]} : vector<1x96xf32> to vector<1x32xf32>
    %57 = arith.addf %55, %56 : vector<1x32xf32>
    %58 = arith.negf %57 : vector<1x32xf32>
    %59 = math.exp %58 : vector<1x32xf32>
    %cst_23 = arith.constant 1.000000e+00 : f32
    %60 = vector.broadcast %cst_23 : f32 to vector<1x32xf32>
    %61 = arith.addf %60, %59 : vector<1x32xf32>
    %62 = arith.divf %60, %61 : vector<1x32xf32>
    %63 = vector.extract_strided_slice %46 {offsets = [0, 64], sizes = [1, 32], strides = [1, 1]} : vector<1x96xf32> to vector<1x32xf32>
    %64 = vector.extract_strided_slice %45 {offsets = [0, 64], sizes = [1, 32], strides = [1, 1]} : vector<1x96xf32> to vector<1x32xf32>
    %65 = arith.mulf %54, %64 : vector<1x32xf32>
    %66 = arith.addf %63, %65 : vector<1x32xf32>
    %67 = math.tanh %66 : vector<1x32xf32>
    %cst_24 = arith.constant 1.000000e+00 : f32
    %68 = vector.broadcast %cst_24 : f32 to vector<1x32xf32>
    %69 = arith.subf %68, %62 : vector<1x32xf32>
    %70 = arith.mulf %69, %67 : vector<1x32xf32>
    %71 = arith.mulf %62, %42 : vector<1x32xf32>
    %72 = arith.addf %70, %71 : vector<1x32xf32>
    %c1 = arith.constant 1 : index
    %c0_25 = arith.constant 0 : index
    %73 = vector.load %arg21[%c1, %c0_25] : memref<8x32xf32, #tpu.memory_space<vmem>>, vector<1x32xf32>
    tpu.vector_store %arg21[%c1, %c0_25], %72 {strides = array<i32>} : memref<8x32xf32, #tpu.memory_space<vmem>>, vector<1x32xf32>,
    %cst_26 = arith.constant dense<0.000000e+00> : vector<1x96xf32>
    %74 = tpu.matmul %72, %11, %cst_26 {dimension_numbers = #tpu.dot_dimension_numbers<[1], [0], [0], [1], [0, 0, 1, 1], [], []>} : vector<1x32xf32>, vector<32x96xf32>, vector<1x96xf32> -> vector<1x96xf32>
    %75 = arith.addf %74, %12 : vector<1x96xf32>
    %76 = vector.extract_strided_slice %5 {offsets = [2, 0], sizes = [1, 96], strides = [1, 1]} : vector<8x96xf32> to vector<1x96xf32>
    %77 = vector.extract_strided_slice %76 {offsets = [0, 0], sizes = [1, 32], strides = [1, 1]} : vector<1x96xf32> to vector<1x32xf32>
    %78 = vector.extract_strided_slice %75 {offsets = [0, 0], sizes = [1, 32], strides = [1, 1]} : vector<1x96xf32> to vector<1x32xf32>
    %79 = arith.addf %77, %78 : vector<1x32xf32>
    %80 = arith.negf %79 : vector<1x32xf32>
    %81 = math.exp %80 : vector<1x32xf32>
    %cst_27 = arith.constant 1.000000e+00 : f32
    %82 = vector.broadcast %cst_27 : f32 to vector<1x32xf32>
    %83 = arith.addf %82, %81 : vector<1x32xf32>
    %84 = arith.divf %82, %83 : vector<1x32xf32>
    %85 = vector.extract_strided_slice %76 {offsets = [0, 32], sizes = [1, 32], strides = [1, 1]} : vector<1x96xf32> to vector<1x32xf32>
    %86 = vector.extract_strided_slice %75 {offsets = [0, 32], sizes = [1, 32], strides = [1, 1]} : vector<1x96xf32> to vector<1x32xf32>
    %87 = arith.addf %85, %86 : vector<1x32xf32>
    %88 = arith.negf %87 : vector<1x32xf32>
    %89 = math.exp %88 : vector<1x32xf32>
    %cst_28 = arith.constant 1.000000e+00 : f32
    %90 = vector.broadcast %cst_28 : f32 to vector<1x32xf32>
    %91 = arith.addf %90, %89 : vector<1x32xf32>
    %92 = arith.divf %90, %91 : vector<1x32xf32>
    %93 = vector.extract_strided_slice %76 {offsets = [0, 64], sizes = [1, 32], strides = [1, 1]} : vector<1x96xf32> to vector<1x32xf32>
    %94 = vector.extract_strided_slice %75 {offsets = [0, 64], sizes = [1, 32], strides = [1, 1]} : vector<1x96xf32> to vector<1x32xf32>
    %95 = arith.mulf %84, %94 : vector<1x32xf32>
    %96 = arith.addf %93, %95 : vector<1x32xf32>
    %97 = math.tanh %96 : vector<1x32xf32>
    %cst_29 = arith.constant 1.000000e+00 : f32
    %98 = vector.broadcast %cst_29 : f32 to vector<1x32xf32>
    %99 = arith.subf %98, %92 : vector<1x32xf32>
    %100 = arith.mulf %99, %97 : vector<1x32xf32>
    %101 = arith.mulf %92, %72 : vector<1x32xf32>
    %102 = arith.addf %100, %101 : vector<1x32xf32>
    %c2 = arith.constant 2 : index
    %c0_30 = arith.constant 0 : index
    %103 = vector.load %arg21[%c2, %c0_30] : memref<8x32xf32, #tpu.memory_space<vmem>>, vector<1x32xf32>
    tpu.vector_store %arg21[%c2, %c0_30], %102 {strides = array<i32>} : memref<8x32xf32, #tpu.memory_space<vmem>>, vector<1x32xf32>,
    %cst_31 = arith.constant dense<0.000000e+00> : vector<1x96xf32>
    %104 = tpu.matmul %102, %11, %cst_31 {dimension_numbers = #tpu.dot_dimension_numbers<[1], [0], [0], [1], [0, 0, 1, 1], [], []>} : vector<1x32xf32>, vector<32x96xf32>, vector<1x96xf32> -> vector<1x96xf32>
    %105 = arith.addf %104, %12 : vector<1x96xf32>
    %106 = vector.extract_strided_slice %5 {offsets = [3, 0], sizes = [1, 96], strides = [1, 1]} : vector<8x96xf32> to vector<1x96xf32>
    %107 = vector.extract_strided_slice %106 {offsets = [0, 0], sizes = [1, 32], strides = [1, 1]} : vector<1x96xf32> to vector<1x32xf32>
    %108 = vector.extract_strided_slice %105 {offsets = [0, 0], sizes = [1, 32], strides = [1, 1]} : vector<1x96xf32> to vector<1x32xf32>
    %109 = arith.addf %107, %108 : vector<1x32xf32>
    %110 = arith.negf %109 : vector<1x32xf32>
    %111 = math.exp %110 : vector<1x32xf32>
    %cst_32 = arith.constant 1.000000e+00 : f32
    %112 = vector.broadcast %cst_32 : f32 to vector<1x32xf32>
    %113 = arith.addf %112, %111 : vector<1x32xf32>
    %114 = arith.divf %112, %113 : vector<1x32xf32>
    %115 = vector.extract_strided_slice %106 {offsets = [0, 32], sizes = [1, 32], strides = [1, 1]} : vector<1x96xf32> to vector<1x32xf32>
    %116 = vector.extract_strided_slice %105 {offsets = [0, 32], sizes = [1, 32], strides = [1, 1]} : vector<1x96xf32> to vector<1x32xf32>
    %117 = arith.addf %115, %116 : vector<1x32xf32>
    %118 = arith.negf %117 : vector<1x32xf32>
    %119 = math.exp %118 : vector<1x32xf32>
    %cst_33 = arith.constant 1.000000e+00 : f32
    %120 = vector.broadcast %cst_33 : f32 to vector<1x32xf32>
    %121 = arith.addf %120, %119 : vector<1x32xf32>
    %122 = arith.divf %120, %121 : vector<1x32xf32>
    %123 = vector.extract_strided_slice %106 {offsets = [0, 64], sizes = [1, 32], strides = [1, 1]} : vector<1x96xf32> to vector<1x32xf32>
    %124 = vector.extract_strided_slice %105 {offsets = [0, 64], sizes = [1, 32], strides = [1, 1]} : vector<1x96xf32> to vector<1x32xf32>
    %125 = arith.mulf %114, %124 : vector<1x32xf32>
    %126 = arith.addf %123, %125 : vector<1x32xf32>
    %127 = math.tanh %126 : vector<1x32xf32>
    %cst_34 = arith.constant 1.000000e+00 : f32
    %128 = vector.broadcast %cst_34 : f32 to vector<1x32xf32>
    %129 = arith.subf %128, %122 : vector<1x32xf32>
    %130 = arith.mulf %129, %127 : vector<1x32xf32>
    %131 = arith.mulf %122, %102 : vector<1x32xf32>
    %132 = arith.addf %130, %131 : vector<1x32xf32>
    %c3 = arith.constant 3 : index
    %c0_35 = arith.constant 0 : index
    %133 = vector.load %arg21[%c3, %c0_35] : memref<8x32xf32, #tpu.memory_space<vmem>>, vector<1x32xf32>
    tpu.vector_store %arg21[%c3, %c0_35], %132 {strides = array<i32>} : memref<8x32xf32, #tpu.memory_space<vmem>>, vector<1x32xf32>,
    %cst_36 = arith.constant dense<0.000000e+00> : vector<1x96xf32>
    %134 = tpu.matmul %132, %11, %cst_36 {dimension_numbers = #tpu.dot_dimension_numbers<[1], [0], [0], [1], [0, 0, 1, 1], [], []>} : vector<1x32xf32>, vector<32x96xf32>, vector<1x96xf32> -> vector<1x96xf32>
    %135 = arith.addf %134, %12 : vector<1x96xf32>
    %136 = vector.extract_strided_slice %5 {offsets = [4, 0], sizes = [1, 96], strides = [1, 1]} : vector<8x96xf32> to vector<1x96xf32>
    %137 = vector.extract_strided_slice %136 {offsets = [0, 0], sizes = [1, 32], strides = [1, 1]} : vector<1x96xf32> to vector<1x32xf32>
    %138 = vector.extract_strided_slice %135 {offsets = [0, 0], sizes = [1, 32], strides = [1, 1]} : vector<1x96xf32> to vector<1x32xf32>
    %139 = arith.addf %137, %138 : vector<1x32xf32>
    %140 = arith.negf %139 : vector<1x32xf32>
    %141 = math.exp %140 : vector<1x32xf32>
    %cst_37 = arith.constant 1.000000e+00 : f32
    %142 = vector.broadcast %cst_37 : f32 to vector<1x32xf32>
    %143 = arith.addf %142, %141 : vector<1x32xf32>
    %144 = arith.divf %142, %143 : vector<1x32xf32>
    %145 = vector.extract_strided_slice %136 {offsets = [0, 32], sizes = [1, 32], strides = [1, 1]} : vector<1x96xf32> to vector<1x32xf32>
    %146 = vector.extract_strided_slice %135 {offsets = [0, 32], sizes = [1, 32], strides = [1, 1]} : vector<1x96xf32> to vector<1x32xf32>
    %147 = arith.addf %145, %146 : vector<1x32xf32>
    %148 = arith.negf %147 : vector<1x32xf32>
    %149 = math.exp %148 : vector<1x32xf32>
    %cst_38 = arith.constant 1.000000e+00 : f32
    %150 = vector.broadcast %cst_38 : f32 to vector<1x32xf32>
    %151 = arith.addf %150, %149 : vector<1x32xf32>
    %152 = arith.divf %150, %151 : vector<1x32xf32>
    %153 = vector.extract_strided_slice %136 {offsets = [0, 64], sizes = [1, 32], strides = [1, 1]} : vector<1x96xf32> to vector<1x32xf32>
    %154 = vector.extract_strided_slice %135 {offsets = [0, 64], sizes = [1, 32], strides = [1, 1]} : vector<1x96xf32> to vector<1x32xf32>
    %155 = arith.mulf %144, %154 : vector<1x32xf32>
    %156 = arith.addf %153, %155 : vector<1x32xf32>
    %157 = math.tanh %156 : vector<1x32xf32>
    %cst_39 = arith.constant 1.000000e+00 : f32
    %158 = vector.broadcast %cst_39 : f32 to vector<1x32xf32>
    %159 = arith.subf %158, %152 : vector<1x32xf32>
    %160 = arith.mulf %159, %157 : vector<1x32xf32>
    %161 = arith.mulf %152, %132 : vector<1x32xf32>
    %162 = arith.addf %160, %161 : vector<1x32xf32>
    %c4 = arith.constant 4 : index
    %c0_40 = arith.constant 0 : index
    %163 = vector.load %arg21[%c4, %c0_40] : memref<8x32xf32, #tpu.memory_space<vmem>>, vector<1x32xf32>
    tpu.vector_store %arg21[%c4, %c0_40], %162 {strides = array<i32>} : memref<8x32xf32, #tpu.memory_space<vmem>>, vector<1x32xf32>,
    %cst_41 = arith.constant dense<0.000000e+00> : vector<1x96xf32>
    %164 = tpu.matmul %162, %11, %cst_41 {dimension_numbers = #tpu.dot_dimension_numbers<[1], [0], [0], [1], [0, 0, 1, 1], [], []>} : vector<1x32xf32>, vector<32x96xf32>, vector<1x96xf32> -> vector<1x96xf32>
    %165 = arith.addf %164, %12 : vector<1x96xf32>
    %166 = vector.extract_strided_slice %5 {offsets = [5, 0], sizes = [1, 96], strides = [1, 1]} : vector<8x96xf32> to vector<1x96xf32>
    %167 = vector.extract_strided_slice %166 {offsets = [0, 0], sizes = [1, 32], strides = [1, 1]} : vector<1x96xf32> to vector<1x32xf32>
    %168 = vector.extract_strided_slice %165 {offsets = [0, 0], sizes = [1, 32], strides = [1, 1]} : vector<1x96xf32> to vector<1x32xf32>
    %169 = arith.addf %167, %168 : vector<1x32xf32>
    %170 = arith.negf %169 : vector<1x32xf32>
    %171 = math.exp %170 : vector<1x32xf32>
    %cst_42 = arith.constant 1.000000e+00 : f32
    %172 = vector.broadcast %cst_42 : f32 to vector<1x32xf32>
    %173 = arith.addf %172, %171 : vector<1x32xf32>
    %174 = arith.divf %172, %173 : vector<1x32xf32>
    %175 = vector.extract_strided_slice %166 {offsets = [0, 32], sizes = [1, 32], strides = [1, 1]} : vector<1x96xf32> to vector<1x32xf32>
    %176 = vector.extract_strided_slice %165 {offsets = [0, 32], sizes = [1, 32], strides = [1, 1]} : vector<1x96xf32> to vector<1x32xf32>
    %177 = arith.addf %175, %176 : vector<1x32xf32>
    %178 = arith.negf %177 : vector<1x32xf32>
    %179 = math.exp %178 : vector<1x32xf32>
    %cst_43 = arith.constant 1.000000e+00 : f32
    %180 = vector.broadcast %cst_43 : f32 to vector<1x32xf32>
    %181 = arith.addf %180, %179 : vector<1x32xf32>
    %182 = arith.divf %180, %181 : vector<1x32xf32>
    %183 = vector.extract_strided_slice %166 {offsets = [0, 64], sizes = [1, 32], strides = [1, 1]} : vector<1x96xf32> to vector<1x32xf32>
    %184 = vector.extract_strided_slice %165 {offsets = [0, 64], sizes = [1, 32], strides = [1, 1]} : vector<1x96xf32> to vector<1x32xf32>
    %185 = arith.mulf %174, %184 : vector<1x32xf32>
    %186 = arith.addf %183, %185 : vector<1x32xf32>
    %187 = math.tanh %186 : vector<1x32xf32>
    %cst_44 = arith.constant 1.000000e+00 : f32
    %188 = vector.broadcast %cst_44 : f32 to vector<1x32xf32>
    %189 = arith.subf %188, %182 : vector<1x32xf32>
    %190 = arith.mulf %189, %187 : vector<1x32xf32>
    %191 = arith.mulf %182, %162 : vector<1x32xf32>
    %192 = arith.addf %190, %191 : vector<1x32xf32>
    %c5 = arith.constant 5 : index
    %c0_45 = arith.constant 0 : index
    %193 = vector.load %arg21[%c5, %c0_45] : memref<8x32xf32, #tpu.memory_space<vmem>>, vector<1x32xf32>
    tpu.vector_store %arg21[%c5, %c0_45], %192 {strides = array<i32>} : memref<8x32xf32, #tpu.memory_space<vmem>>, vector<1x32xf32>,
    %cst_46 = arith.constant dense<0.000000e+00> : vector<1x96xf32>
    %194 = tpu.matmul %192, %11, %cst_46 {dimension_numbers = #tpu.dot_dimension_numbers<[1], [0], [0], [1], [0, 0, 1, 1], [], []>} : vector<1x32xf32>, vector<32x96xf32>, vector<1x96xf32> -> vector<1x96xf32>
    %195 = arith.addf %194, %12 : vector<1x96xf32>
    %196 = vector.extract_strided_slice %5 {offsets = [6, 0], sizes = [1, 96], strides = [1, 1]} : vector<8x96xf32> to vector<1x96xf32>
    %197 = vector.extract_strided_slice %196 {offsets = [0, 0], sizes = [1, 32], strides = [1, 1]} : vector<1x96xf32> to vector<1x32xf32>
    %198 = vector.extract_strided_slice %195 {offsets = [0, 0], sizes = [1, 32], strides = [1, 1]} : vector<1x96xf32> to vector<1x32xf32>
    %199 = arith.addf %197, %198 : vector<1x32xf32>
    %200 = arith.negf %199 : vector<1x32xf32>
    %201 = math.exp %200 : vector<1x32xf32>
    %cst_47 = arith.constant 1.000000e+00 : f32
    %202 = vector.broadcast %cst_47 : f32 to vector<1x32xf32>
    %203 = arith.addf %202, %201 : vector<1x32xf32>
    %204 = arith.divf %202, %203 : vector<1x32xf32>
    %205 = vector.extract_strided_slice %196 {offsets = [0, 32], sizes = [1, 32], strides = [1, 1]} : vector<1x96xf32> to vector<1x32xf32>
    %206 = vector.extract_strided_slice %195 {offsets = [0, 32], sizes = [1, 32], strides = [1, 1]} : vector<1x96xf32> to vector<1x32xf32>
    %207 = arith.addf %205, %206 : vector<1x32xf32>
    %208 = arith.negf %207 : vector<1x32xf32>
    %209 = math.exp %208 : vector<1x32xf32>
    %cst_48 = arith.constant 1.000000e+00 : f32
    %210 = vector.broadcast %cst_48 : f32 to vector<1x32xf32>
    %211 = arith.addf %210, %209 : vector<1x32xf32>
    %212 = arith.divf %210, %211 : vector<1x32xf32>
    %213 = vector.extract_strided_slice %196 {offsets = [0, 64], sizes = [1, 32], strides = [1, 1]} : vector<1x96xf32> to vector<1x32xf32>
    %214 = vector.extract_strided_slice %195 {offsets = [0, 64], sizes = [1, 32], strides = [1, 1]} : vector<1x96xf32> to vector<1x32xf32>
    %215 = arith.mulf %204, %214 : vector<1x32xf32>
    %216 = arith.addf %213, %215 : vector<1x32xf32>
    %217 = math.tanh %216 : vector<1x32xf32>
    %cst_49 = arith.constant 1.000000e+00 : f32
    %218 = vector.broadcast %cst_49 : f32 to vector<1x32xf32>
    %219 = arith.subf %218, %212 : vector<1x32xf32>
    %220 = arith.mulf %219, %217 : vector<1x32xf32>
    %221 = arith.mulf %212, %192 : vector<1x32xf32>
    %222 = arith.addf %220, %221 : vector<1x32xf32>
    %c6 = arith.constant 6 : index
    %c0_50 = arith.constant 0 : index
    %223 = vector.load %arg21[%c6, %c0_50] : memref<8x32xf32, #tpu.memory_space<vmem>>, vector<1x32xf32>
    tpu.vector_store %arg21[%c6, %c0_50], %222 {strides = array<i32>} : memref<8x32xf32, #tpu.memory_space<vmem>>, vector<1x32xf32>,
    %cst_51 = arith.constant dense<0.000000e+00> : vector<1x96xf32>
    %224 = tpu.matmul %222, %11, %cst_51 {dimension_numbers = #tpu.dot_dimension_numbers<[1], [0], [0], [1], [0, 0, 1, 1], [], []>} : vector<1x32xf32>, vector<32x96xf32>, vector<1x96xf32> -> vector<1x96xf32>
    %225 = arith.addf %224, %12 : vector<1x96xf32>
    %226 = vector.extract_strided_slice %5 {offsets = [7, 0], sizes = [1, 96], strides = [1, 1]} : vector<8x96xf32> to vector<1x96xf32>
    %227 = vector.extract_strided_slice %226 {offsets = [0, 0], sizes = [1, 32], strides = [1, 1]} : vector<1x96xf32> to vector<1x32xf32>
    %228 = vector.extract_strided_slice %225 {offsets = [0, 0], sizes = [1, 32], strides = [1, 1]} : vector<1x96xf32> to vector<1x32xf32>
    %229 = arith.addf %227, %228 : vector<1x32xf32>
    %230 = arith.negf %229 : vector<1x32xf32>
    %231 = math.exp %230 : vector<1x32xf32>
    %cst_52 = arith.constant 1.000000e+00 : f32
    %232 = vector.broadcast %cst_52 : f32 to vector<1x32xf32>
    %233 = arith.addf %232, %231 : vector<1x32xf32>
    %234 = arith.divf %232, %233 : vector<1x32xf32>
    %235 = vector.extract_strided_slice %226 {offsets = [0, 32], sizes = [1, 32], strides = [1, 1]} : vector<1x96xf32> to vector<1x32xf32>
    %236 = vector.extract_strided_slice %225 {offsets = [0, 32], sizes = [1, 32], strides = [1, 1]} : vector<1x96xf32> to vector<1x32xf32>
    %237 = arith.addf %235, %236 : vector<1x32xf32>
    %238 = arith.negf %237 : vector<1x32xf32>
    %239 = math.exp %238 : vector<1x32xf32>
    %cst_53 = arith.constant 1.000000e+00 : f32
    %240 = vector.broadcast %cst_53 : f32 to vector<1x32xf32>
    %241 = arith.addf %240, %239 : vector<1x32xf32>
    %242 = arith.divf %240, %241 : vector<1x32xf32>
    %243 = vector.extract_strided_slice %226 {offsets = [0, 64], sizes = [1, 32], strides = [1, 1]} : vector<1x96xf32> to vector<1x32xf32>
    %244 = vector.extract_strided_slice %225 {offsets = [0, 64], sizes = [1, 32], strides = [1, 1]} : vector<1x96xf32> to vector<1x32xf32>
    %245 = arith.mulf %234, %244 : vector<1x32xf32>
    %246 = arith.addf %243, %245 : vector<1x32xf32>
    %247 = math.tanh %246 : vector<1x32xf32>
    %cst_54 = arith.constant 1.000000e+00 : f32
    %248 = vector.broadcast %cst_54 : f32 to vector<1x32xf32>
    %249 = arith.subf %248, %242 : vector<1x32xf32>
    %250 = arith.mulf %249, %247 : vector<1x32xf32>
    %251 = arith.mulf %242, %222 : vector<1x32xf32>
    %252 = arith.addf %250, %251 : vector<1x32xf32>
    %c7 = arith.constant 7 : index
    %c0_55 = arith.constant 0 : index
    %253 = vector.load %arg21[%c7, %c0_55] : memref<8x32xf32, #tpu.memory_space<vmem>>, vector<1x32xf32>
    tpu.vector_store %arg21[%c7, %c0_55], %252 {strides = array<i32>} : memref<8x32xf32, #tpu.memory_space<vmem>>, vector<1x32xf32>,
    %c0_56 = arith.constant 0 : index
    %c0_57 = arith.constant 0 : index
    %254 = vector.load %arg6[%c0_56, %c0_57] : memref<32x96xf32, #tpu.memory_space<vmem>>, vector<32x96xf32>
    %c0_58 = arith.constant 0 : index
    %c0_59 = arith.constant 0 : index
    %255 = vector.load %arg8[%c0_58, %c0_59] : memref<1x96xf32, #tpu.memory_space<vmem>>, vector<1x96xf32>
    %cst_60 = arith.constant 0.000000e+00 : f32
    %256 = vector.broadcast %cst_60 : f32 to vector<1x32xf32>
    %cst_61 = arith.constant dense<0.000000e+00> : vector<1x96xf32>
    %257 = tpu.matmul %256, %254, %cst_61 {dimension_numbers = #tpu.dot_dimension_numbers<[1], [0], [0], [1], [0, 0, 1, 1], [], []>} : vector<1x32xf32>, vector<32x96xf32>, vector<1x96xf32> -> vector<1x96xf32>
    %258 = arith.addf %257, %255 : vector<1x96xf32>
    %259 = vector.extract_strided_slice %10 {offsets = [7, 0], sizes = [1, 96], strides = [1, 1]} : vector<8x96xf32> to vector<1x96xf32>
    %260 = vector.extract_strided_slice %259 {offsets = [0, 0], sizes = [1, 32], strides = [1, 1]} : vector<1x96xf32> to vector<1x32xf32>
    %261 = vector.extract_strided_slice %258 {offsets = [0, 0], sizes = [1, 32], strides = [1, 1]} : vector<1x96xf32> to vector<1x32xf32>
    %262 = arith.addf %260, %261 : vector<1x32xf32>
    %263 = arith.negf %262 : vector<1x32xf32>
    %264 = math.exp %263 : vector<1x32xf32>
    %cst_62 = arith.constant 1.000000e+00 : f32
    %265 = vector.broadcast %cst_62 : f32 to vector<1x32xf32>
    %266 = arith.addf %265, %264 : vector<1x32xf32>
    %267 = arith.divf %265, %266 : vector<1x32xf32>
    %268 = vector.extract_strided_slice %259 {offsets = [0, 32], sizes = [1, 32], strides = [1, 1]} : vector<1x96xf32> to vector<1x32xf32>
    %269 = vector.extract_strided_slice %258 {offsets = [0, 32], sizes = [1, 32], strides = [1, 1]} : vector<1x96xf32> to vector<1x32xf32>
    %270 = arith.addf %268, %269 : vector<1x32xf32>
    %271 = arith.negf %270 : vector<1x32xf32>
    %272 = math.exp %271 : vector<1x32xf32>
    %cst_63 = arith.constant 1.000000e+00 : f32
    %273 = vector.broadcast %cst_63 : f32 to vector<1x32xf32>
    %274 = arith.addf %273, %272 : vector<1x32xf32>
    %275 = arith.divf %273, %274 : vector<1x32xf32>
    %276 = vector.extract_strided_slice %259 {offsets = [0, 64], sizes = [1, 32], strides = [1, 1]} : vector<1x96xf32> to vector<1x32xf32>
    %277 = vector.extract_strided_slice %258 {offsets = [0, 64], sizes = [1, 32], strides = [1, 1]} : vector<1x96xf32> to vector<1x32xf32>
    %278 = arith.mulf %267, %277 : vector<1x32xf32>
    %279 = arith.addf %276, %278 : vector<1x32xf32>
    %280 = math.tanh %279 : vector<1x32xf32>
    %cst_64 = arith.constant 1.000000e+00 : f32
    %281 = vector.broadcast %cst_64 : f32 to vector<1x32xf32>
    %282 = arith.subf %281, %275 : vector<1x32xf32>
    %283 = arith.mulf %282, %280 : vector<1x32xf32>
    %284 = arith.mulf %275, %256 : vector<1x32xf32>
    %285 = arith.addf %283, %284 : vector<1x32xf32>
    %c7_65 = arith.constant 7 : index
    %c0_66 = arith.constant 0 : index
    %286 = vector.load %arg22[%c7_65, %c0_66] : memref<8x32xf32, #tpu.memory_space<vmem>>, vector<1x32xf32>
    tpu.vector_store %arg22[%c7_65, %c0_66], %285 {strides = array<i32>} : memref<8x32xf32, #tpu.memory_space<vmem>>, vector<1x32xf32>,
    %cst_67 = arith.constant dense<0.000000e+00> : vector<1x96xf32>
    %287 = tpu.matmul %285, %254, %cst_67 {dimension_numbers = #tpu.dot_dimension_numbers<[1], [0], [0], [1], [0, 0, 1, 1], [], []>} : vector<1x32xf32>, vector<32x96xf32>, vector<1x96xf32> -> vector<1x96xf32>
    %288 = arith.addf %287, %255 : vector<1x96xf32>
    %289 = vector.extract_strided_slice %10 {offsets = [6, 0], sizes = [1, 96], strides = [1, 1]} : vector<8x96xf32> to vector<1x96xf32>
    %290 = vector.extract_strided_slice %289 {offsets = [0, 0], sizes = [1, 32], strides = [1, 1]} : vector<1x96xf32> to vector<1x32xf32>
    %291 = vector.extract_strided_slice %288 {offsets = [0, 0], sizes = [1, 32], strides = [1, 1]} : vector<1x96xf32> to vector<1x32xf32>
    %292 = arith.addf %290, %291 : vector<1x32xf32>
    %293 = arith.negf %292 : vector<1x32xf32>
    %294 = math.exp %293 : vector<1x32xf32>
    %cst_68 = arith.constant 1.000000e+00 : f32
    %295 = vector.broadcast %cst_68 : f32 to vector<1x32xf32>
    %296 = arith.addf %295, %294 : vector<1x32xf32>
    %297 = arith.divf %295, %296 : vector<1x32xf32>
    %298 = vector.extract_strided_slice %289 {offsets = [0, 32], sizes = [1, 32], strides = [1, 1]} : vector<1x96xf32> to vector<1x32xf32>
    %299 = vector.extract_strided_slice %288 {offsets = [0, 32], sizes = [1, 32], strides = [1, 1]} : vector<1x96xf32> to vector<1x32xf32>
    %300 = arith.addf %298, %299 : vector<1x32xf32>
    %301 = arith.negf %300 : vector<1x32xf32>
    %302 = math.exp %301 : vector<1x32xf32>
    %cst_69 = arith.constant 1.000000e+00 : f32
    %303 = vector.broadcast %cst_69 : f32 to vector<1x32xf32>
    %304 = arith.addf %303, %302 : vector<1x32xf32>
    %305 = arith.divf %303, %304 : vector<1x32xf32>
    %306 = vector.extract_strided_slice %289 {offsets = [0, 64], sizes = [1, 32], strides = [1, 1]} : vector<1x96xf32> to vector<1x32xf32>
    %307 = vector.extract_strided_slice %288 {offsets = [0, 64], sizes = [1, 32], strides = [1, 1]} : vector<1x96xf32> to vector<1x32xf32>
    %308 = arith.mulf %297, %307 : vector<1x32xf32>
    %309 = arith.addf %306, %308 : vector<1x32xf32>
    %310 = math.tanh %309 : vector<1x32xf32>
    %cst_70 = arith.constant 1.000000e+00 : f32
    %311 = vector.broadcast %cst_70 : f32 to vector<1x32xf32>
    %312 = arith.subf %311, %305 : vector<1x32xf32>
    %313 = arith.mulf %312, %310 : vector<1x32xf32>
    %314 = arith.mulf %305, %285 : vector<1x32xf32>
    %315 = arith.addf %313, %314 : vector<1x32xf32>
    %c6_71 = arith.constant 6 : index
    %c0_72 = arith.constant 0 : index
    %316 = vector.load %arg22[%c6_71, %c0_72] : memref<8x32xf32, #tpu.memory_space<vmem>>, vector<1x32xf32>
    tpu.vector_store %arg22[%c6_71, %c0_72], %315 {strides = array<i32>} : memref<8x32xf32, #tpu.memory_space<vmem>>, vector<1x32xf32>,
    %cst_73 = arith.constant dense<0.000000e+00> : vector<1x96xf32>
    %317 = tpu.matmul %315, %254, %cst_73 {dimension_numbers = #tpu.dot_dimension_numbers<[1], [0], [0], [1], [0, 0, 1, 1], [], []>} : vector<1x32xf32>, vector<32x96xf32>, vector<1x96xf32> -> vector<1x96xf32>
    %318 = arith.addf %317, %255 : vector<1x96xf32>
    %319 = vector.extract_strided_slice %10 {offsets = [5, 0], sizes = [1, 96], strides = [1, 1]} : vector<8x96xf32> to vector<1x96xf32>
    %320 = vector.extract_strided_slice %319 {offsets = [0, 0], sizes = [1, 32], strides = [1, 1]} : vector<1x96xf32> to vector<1x32xf32>
    %321 = vector.extract_strided_slice %318 {offsets = [0, 0], sizes = [1, 32], strides = [1, 1]} : vector<1x96xf32> to vector<1x32xf32>
    %322 = arith.addf %320, %321 : vector<1x32xf32>
    %323 = arith.negf %322 : vector<1x32xf32>
    %324 = math.exp %323 : vector<1x32xf32>
    %cst_74 = arith.constant 1.000000e+00 : f32
    %325 = vector.broadcast %cst_74 : f32 to vector<1x32xf32>
    %326 = arith.addf %325, %324 : vector<1x32xf32>
    %327 = arith.divf %325, %326 : vector<1x32xf32>
    %328 = vector.extract_strided_slice %319 {offsets = [0, 32], sizes = [1, 32], strides = [1, 1]} : vector<1x96xf32> to vector<1x32xf32>
    %329 = vector.extract_strided_slice %318 {offsets = [0, 32], sizes = [1, 32], strides = [1, 1]} : vector<1x96xf32> to vector<1x32xf32>
    %330 = arith.addf %328, %329 : vector<1x32xf32>
    %331 = arith.negf %330 : vector<1x32xf32>
    %332 = math.exp %331 : vector<1x32xf32>
    %cst_75 = arith.constant 1.000000e+00 : f32
    %333 = vector.broadcast %cst_75 : f32 to vector<1x32xf32>
    %334 = arith.addf %333, %332 : vector<1x32xf32>
    %335 = arith.divf %333, %334 : vector<1x32xf32>
    %336 = vector.extract_strided_slice %319 {offsets = [0, 64], sizes = [1, 32], strides = [1, 1]} : vector<1x96xf32> to vector<1x32xf32>
    %337 = vector.extract_strided_slice %318 {offsets = [0, 64], sizes = [1, 32], strides = [1, 1]} : vector<1x96xf32> to vector<1x32xf32>
    %338 = arith.mulf %327, %337 : vector<1x32xf32>
    %339 = arith.addf %336, %338 : vector<1x32xf32>
    %340 = math.tanh %339 : vector<1x32xf32>
    %cst_76 = arith.constant 1.000000e+00 : f32
    %341 = vector.broadcast %cst_76 : f32 to vector<1x32xf32>
    %342 = arith.subf %341, %335 : vector<1x32xf32>
    %343 = arith.mulf %342, %340 : vector<1x32xf32>
    %344 = arith.mulf %335, %315 : vector<1x32xf32>
    %345 = arith.addf %343, %344 : vector<1x32xf32>
    %c5_77 = arith.constant 5 : index
    %c0_78 = arith.constant 0 : index
    %346 = vector.load %arg22[%c5_77, %c0_78] : memref<8x32xf32, #tpu.memory_space<vmem>>, vector<1x32xf32>
    tpu.vector_store %arg22[%c5_77, %c0_78], %345 {strides = array<i32>} : memref<8x32xf32, #tpu.memory_space<vmem>>, vector<1x32xf32>,
    %cst_79 = arith.constant dense<0.000000e+00> : vector<1x96xf32>
    %347 = tpu.matmul %345, %254, %cst_79 {dimension_numbers = #tpu.dot_dimension_numbers<[1], [0], [0], [1], [0, 0, 1, 1], [], []>} : vector<1x32xf32>, vector<32x96xf32>, vector<1x96xf32> -> vector<1x96xf32>
    %348 = arith.addf %347, %255 : vector<1x96xf32>
    %349 = vector.extract_strided_slice %10 {offsets = [4, 0], sizes = [1, 96], strides = [1, 1]} : vector<8x96xf32> to vector<1x96xf32>
    %350 = vector.extract_strided_slice %349 {offsets = [0, 0], sizes = [1, 32], strides = [1, 1]} : vector<1x96xf32> to vector<1x32xf32>
    %351 = vector.extract_strided_slice %348 {offsets = [0, 0], sizes = [1, 32], strides = [1, 1]} : vector<1x96xf32> to vector<1x32xf32>
    %352 = arith.addf %350, %351 : vector<1x32xf32>
    %353 = arith.negf %352 : vector<1x32xf32>
    %354 = math.exp %353 : vector<1x32xf32>
    %cst_80 = arith.constant 1.000000e+00 : f32
    %355 = vector.broadcast %cst_80 : f32 to vector<1x32xf32>
    %356 = arith.addf %355, %354 : vector<1x32xf32>
    %357 = arith.divf %355, %356 : vector<1x32xf32>
    %358 = vector.extract_strided_slice %349 {offsets = [0, 32], sizes = [1, 32], strides = [1, 1]} : vector<1x96xf32> to vector<1x32xf32>
    %359 = vector.extract_strided_slice %348 {offsets = [0, 32], sizes = [1, 32], strides = [1, 1]} : vector<1x96xf32> to vector<1x32xf32>
    %360 = arith.addf %358, %359 : vector<1x32xf32>
    %361 = arith.negf %360 : vector<1x32xf32>
    %362 = math.exp %361 : vector<1x32xf32>
    %cst_81 = arith.constant 1.000000e+00 : f32
    %363 = vector.broadcast %cst_81 : f32 to vector<1x32xf32>
    %364 = arith.addf %363, %362 : vector<1x32xf32>
    %365 = arith.divf %363, %364 : vector<1x32xf32>
    %366 = vector.extract_strided_slice %349 {offsets = [0, 64], sizes = [1, 32], strides = [1, 1]} : vector<1x96xf32> to vector<1x32xf32>
    %367 = vector.extract_strided_slice %348 {offsets = [0, 64], sizes = [1, 32], strides = [1, 1]} : vector<1x96xf32> to vector<1x32xf32>
    %368 = arith.mulf %357, %367 : vector<1x32xf32>
    %369 = arith.addf %366, %368 : vector<1x32xf32>
    %370 = math.tanh %369 : vector<1x32xf32>
    %cst_82 = arith.constant 1.000000e+00 : f32
    %371 = vector.broadcast %cst_82 : f32 to vector<1x32xf32>
    %372 = arith.subf %371, %365 : vector<1x32xf32>
    %373 = arith.mulf %372, %370 : vector<1x32xf32>
    %374 = arith.mulf %365, %345 : vector<1x32xf32>
    %375 = arith.addf %373, %374 : vector<1x32xf32>
    %c4_83 = arith.constant 4 : index
    %c0_84 = arith.constant 0 : index
    %376 = vector.load %arg22[%c4_83, %c0_84] : memref<8x32xf32, #tpu.memory_space<vmem>>, vector<1x32xf32>
    tpu.vector_store %arg22[%c4_83, %c0_84], %375 {strides = array<i32>} : memref<8x32xf32, #tpu.memory_space<vmem>>, vector<1x32xf32>,
    %cst_85 = arith.constant dense<0.000000e+00> : vector<1x96xf32>
    %377 = tpu.matmul %375, %254, %cst_85 {dimension_numbers = #tpu.dot_dimension_numbers<[1], [0], [0], [1], [0, 0, 1, 1], [], []>} : vector<1x32xf32>, vector<32x96xf32>, vector<1x96xf32> -> vector<1x96xf32>
    %378 = arith.addf %377, %255 : vector<1x96xf32>
    %379 = vector.extract_strided_slice %10 {offsets = [3, 0], sizes = [1, 96], strides = [1, 1]} : vector<8x96xf32> to vector<1x96xf32>
    %380 = vector.extract_strided_slice %379 {offsets = [0, 0], sizes = [1, 32], strides = [1, 1]} : vector<1x96xf32> to vector<1x32xf32>
    %381 = vector.extract_strided_slice %378 {offsets = [0, 0], sizes = [1, 32], strides = [1, 1]} : vector<1x96xf32> to vector<1x32xf32>
    %382 = arith.addf %380, %381 : vector<1x32xf32>
    %383 = arith.negf %382 : vector<1x32xf32>
    %384 = math.exp %383 : vector<1x32xf32>
    %cst_86 = arith.constant 1.000000e+00 : f32
    %385 = vector.broadcast %cst_86 : f32 to vector<1x32xf32>
    %386 = arith.addf %385, %384 : vector<1x32xf32>
    %387 = arith.divf %385, %386 : vector<1x32xf32>
    %388 = vector.extract_strided_slice %379 {offsets = [0, 32], sizes = [1, 32], strides = [1, 1]} : vector<1x96xf32> to vector<1x32xf32>
    %389 = vector.extract_strided_slice %378 {offsets = [0, 32], sizes = [1, 32], strides = [1, 1]} : vector<1x96xf32> to vector<1x32xf32>
    %390 = arith.addf %388, %389 : vector<1x32xf32>
    %391 = arith.negf %390 : vector<1x32xf32>
    %392 = math.exp %391 : vector<1x32xf32>
    %cst_87 = arith.constant 1.000000e+00 : f32
    %393 = vector.broadcast %cst_87 : f32 to vector<1x32xf32>
    %394 = arith.addf %393, %392 : vector<1x32xf32>
    %395 = arith.divf %393, %394 : vector<1x32xf32>
    %396 = vector.extract_strided_slice %379 {offsets = [0, 64], sizes = [1, 32], strides = [1, 1]} : vector<1x96xf32> to vector<1x32xf32>
    %397 = vector.extract_strided_slice %378 {offsets = [0, 64], sizes = [1, 32], strides = [1, 1]} : vector<1x96xf32> to vector<1x32xf32>
    %398 = arith.mulf %387, %397 : vector<1x32xf32>
    %399 = arith.addf %396, %398 : vector<1x32xf32>
    %400 = math.tanh %399 : vector<1x32xf32>
    %cst_88 = arith.constant 1.000000e+00 : f32
    %401 = vector.broadcast %cst_88 : f32 to vector<1x32xf32>
    %402 = arith.subf %401, %395 : vector<1x32xf32>
    %403 = arith.mulf %402, %400 : vector<1x32xf32>
    %404 = arith.mulf %395, %375 : vector<1x32xf32>
    %405 = arith.addf %403, %404 : vector<1x32xf32>
    %c3_89 = arith.constant 3 : index
    %c0_90 = arith.constant 0 : index
    %406 = vector.load %arg22[%c3_89, %c0_90] : memref<8x32xf32, #tpu.memory_space<vmem>>, vector<1x32xf32>
    tpu.vector_store %arg22[%c3_89, %c0_90], %405 {strides = array<i32>} : memref<8x32xf32, #tpu.memory_space<vmem>>, vector<1x32xf32>,
    %cst_91 = arith.constant dense<0.000000e+00> : vector<1x96xf32>
    %407 = tpu.matmul %405, %254, %cst_91 {dimension_numbers = #tpu.dot_dimension_numbers<[1], [0], [0], [1], [0, 0, 1, 1], [], []>} : vector<1x32xf32>, vector<32x96xf32>, vector<1x96xf32> -> vector<1x96xf32>
    %408 = arith.addf %407, %255 : vector<1x96xf32>
    %409 = vector.extract_strided_slice %10 {offsets = [2, 0], sizes = [1, 96], strides = [1, 1]} : vector<8x96xf32> to vector<1x96xf32>
    %410 = vector.extract_strided_slice %409 {offsets = [0, 0], sizes = [1, 32], strides = [1, 1]} : vector<1x96xf32> to vector<1x32xf32>
    %411 = vector.extract_strided_slice %408 {offsets = [0, 0], sizes = [1, 32], strides = [1, 1]} : vector<1x96xf32> to vector<1x32xf32>
    %412 = arith.addf %410, %411 : vector<1x32xf32>
    %413 = arith.negf %412 : vector<1x32xf32>
    %414 = math.exp %413 : vector<1x32xf32>
    %cst_92 = arith.constant 1.000000e+00 : f32
    %415 = vector.broadcast %cst_92 : f32 to vector<1x32xf32>
    %416 = arith.addf %415, %414 : vector<1x32xf32>
    %417 = arith.divf %415, %416 : vector<1x32xf32>
    %418 = vector.extract_strided_slice %409 {offsets = [0, 32], sizes = [1, 32], strides = [1, 1]} : vector<1x96xf32> to vector<1x32xf32>
    %419 = vector.extract_strided_slice %408 {offsets = [0, 32], sizes = [1, 32], strides = [1, 1]} : vector<1x96xf32> to vector<1x32xf32>
    %420 = arith.addf %418, %419 : vector<1x32xf32>
    %421 = arith.negf %420 : vector<1x32xf32>
    %422 = math.exp %421 : vector<1x32xf32>
    %cst_93 = arith.constant 1.000000e+00 : f32
    %423 = vector.broadcast %cst_93 : f32 to vector<1x32xf32>
    %424 = arith.addf %423, %422 : vector<1x32xf32>
    %425 = arith.divf %423, %424 : vector<1x32xf32>
    %426 = vector.extract_strided_slice %409 {offsets = [0, 64], sizes = [1, 32], strides = [1, 1]} : vector<1x96xf32> to vector<1x32xf32>
    %427 = vector.extract_strided_slice %408 {offsets = [0, 64], sizes = [1, 32], strides = [1, 1]} : vector<1x96xf32> to vector<1x32xf32>
    %428 = arith.mulf %417, %427 : vector<1x32xf32>
    %429 = arith.addf %426, %428 : vector<1x32xf32>
    %430 = math.tanh %429 : vector<1x32xf32>
    %cst_94 = arith.constant 1.000000e+00 : f32
    %431 = vector.broadcast %cst_94 : f32 to vector<1x32xf32>
    %432 = arith.subf %431, %425 : vector<1x32xf32>
    %433 = arith.mulf %432, %430 : vector<1x32xf32>
    %434 = arith.mulf %425, %405 : vector<1x32xf32>
    %435 = arith.addf %433, %434 : vector<1x32xf32>
    %c2_95 = arith.constant 2 : index
    %c0_96 = arith.constant 0 : index
    %436 = vector.load %arg22[%c2_95, %c0_96] : memref<8x32xf32, #tpu.memory_space<vmem>>, vector<1x32xf32>
    tpu.vector_store %arg22[%c2_95, %c0_96], %435 {strides = array<i32>} : memref<8x32xf32, #tpu.memory_space<vmem>>, vector<1x32xf32>,
    %cst_97 = arith.constant dense<0.000000e+00> : vector<1x96xf32>
    %437 = tpu.matmul %435, %254, %cst_97 {dimension_numbers = #tpu.dot_dimension_numbers<[1], [0], [0], [1], [0, 0, 1, 1], [], []>} : vector<1x32xf32>, vector<32x96xf32>, vector<1x96xf32> -> vector<1x96xf32>
    %438 = arith.addf %437, %255 : vector<1x96xf32>
    %439 = vector.extract_strided_slice %10 {offsets = [1, 0], sizes = [1, 96], strides = [1, 1]} : vector<8x96xf32> to vector<1x96xf32>
    %440 = vector.extract_strided_slice %439 {offsets = [0, 0], sizes = [1, 32], strides = [1, 1]} : vector<1x96xf32> to vector<1x32xf32>
    %441 = vector.extract_strided_slice %438 {offsets = [0, 0], sizes = [1, 32], strides = [1, 1]} : vector<1x96xf32> to vector<1x32xf32>
    %442 = arith.addf %440, %441 : vector<1x32xf32>
    %443 = arith.negf %442 : vector<1x32xf32>
    %444 = math.exp %443 : vector<1x32xf32>
    %cst_98 = arith.constant 1.000000e+00 : f32
    %445 = vector.broadcast %cst_98 : f32 to vector<1x32xf32>
    %446 = arith.addf %445, %444 : vector<1x32xf32>
    %447 = arith.divf %445, %446 : vector<1x32xf32>
    %448 = vector.extract_strided_slice %439 {offsets = [0, 32], sizes = [1, 32], strides = [1, 1]} : vector<1x96xf32> to vector<1x32xf32>
    %449 = vector.extract_strided_slice %438 {offsets = [0, 32], sizes = [1, 32], strides = [1, 1]} : vector<1x96xf32> to vector<1x32xf32>
    %450 = arith.addf %448, %449 : vector<1x32xf32>
    %451 = arith.negf %450 : vector<1x32xf32>
    %452 = math.exp %451 : vector<1x32xf32>
    %cst_99 = arith.constant 1.000000e+00 : f32
    %453 = vector.broadcast %cst_99 : f32 to vector<1x32xf32>
    %454 = arith.addf %453, %452 : vector<1x32xf32>
    %455 = arith.divf %453, %454 : vector<1x32xf32>
    %456 = vector.extract_strided_slice %439 {offsets = [0, 64], sizes = [1, 32], strides = [1, 1]} : vector<1x96xf32> to vector<1x32xf32>
    %457 = vector.extract_strided_slice %438 {offsets = [0, 64], sizes = [1, 32], strides = [1, 1]} : vector<1x96xf32> to vector<1x32xf32>
    %458 = arith.mulf %447, %457 : vector<1x32xf32>
    %459 = arith.addf %456, %458 : vector<1x32xf32>
    %460 = math.tanh %459 : vector<1x32xf32>
    %cst_100 = arith.constant 1.000000e+00 : f32
    %461 = vector.broadcast %cst_100 : f32 to vector<1x32xf32>
    %462 = arith.subf %461, %455 : vector<1x32xf32>
    %463 = arith.mulf %462, %460 : vector<1x32xf32>
    %464 = arith.mulf %455, %435 : vector<1x32xf32>
    %465 = arith.addf %463, %464 : vector<1x32xf32>
    %c1_101 = arith.constant 1 : index
    %c0_102 = arith.constant 0 : index
    %466 = vector.load %arg22[%c1_101, %c0_102] : memref<8x32xf32, #tpu.memory_space<vmem>>, vector<1x32xf32>
    tpu.vector_store %arg22[%c1_101, %c0_102], %465 {strides = array<i32>} : memref<8x32xf32, #tpu.memory_space<vmem>>, vector<1x32xf32>,
    %cst_103 = arith.constant dense<0.000000e+00> : vector<1x96xf32>
    %467 = tpu.matmul %465, %254, %cst_103 {dimension_numbers = #tpu.dot_dimension_numbers<[1], [0], [0], [1], [0, 0, 1, 1], [], []>} : vector<1x32xf32>, vector<32x96xf32>, vector<1x96xf32> -> vector<1x96xf32>
    %468 = arith.addf %467, %255 : vector<1x96xf32>
    %469 = vector.extract_strided_slice %10 {offsets = [0, 0], sizes = [1, 96], strides = [1, 1]} : vector<8x96xf32> to vector<1x96xf32>
    %470 = vector.extract_strided_slice %469 {offsets = [0, 0], sizes = [1, 32], strides = [1, 1]} : vector<1x96xf32> to vector<1x32xf32>
    %471 = vector.extract_strided_slice %468 {offsets = [0, 0], sizes = [1, 32], strides = [1, 1]} : vector<1x96xf32> to vector<1x32xf32>
    %472 = arith.addf %470, %471 : vector<1x32xf32>
    %473 = arith.negf %472 : vector<1x32xf32>
    %474 = math.exp %473 : vector<1x32xf32>
    %cst_104 = arith.constant 1.000000e+00 : f32
    %475 = vector.broadcast %cst_104 : f32 to vector<1x32xf32>
    %476 = arith.addf %475, %474 : vector<1x32xf32>
    %477 = arith.divf %475, %476 : vector<1x32xf32>
    %478 = vector.extract_strided_slice %469 {offsets = [0, 32], sizes = [1, 32], strides = [1, 1]} : vector<1x96xf32> to vector<1x32xf32>
    %479 = vector.extract_strided_slice %468 {offsets = [0, 32], sizes = [1, 32], strides = [1, 1]} : vector<1x96xf32> to vector<1x32xf32>
    %480 = arith.addf %478, %479 : vector<1x32xf32>
    %481 = arith.negf %480 : vector<1x32xf32>
    %482 = math.exp %481 : vector<1x32xf32>
    %cst_105 = arith.constant 1.000000e+00 : f32
    %483 = vector.broadcast %cst_105 : f32 to vector<1x32xf32>
    %484 = arith.addf %483, %482 : vector<1x32xf32>
    %485 = arith.divf %483, %484 : vector<1x32xf32>
    %486 = vector.extract_strided_slice %469 {offsets = [0, 64], sizes = [1, 32], strides = [1, 1]} : vector<1x96xf32> to vector<1x32xf32>
    %487 = vector.extract_strided_slice %468 {offsets = [0, 64], sizes = [1, 32], strides = [1, 1]} : vector<1x96xf32> to vector<1x32xf32>
    %488 = arith.mulf %477, %487 : vector<1x32xf32>
    %489 = arith.addf %486, %488 : vector<1x32xf32>
    %490 = math.tanh %489 : vector<1x32xf32>
    %cst_106 = arith.constant 1.000000e+00 : f32
    %491 = vector.broadcast %cst_106 : f32 to vector<1x32xf32>
    %492 = arith.subf %491, %485 : vector<1x32xf32>
    %493 = arith.mulf %492, %490 : vector<1x32xf32>
    %494 = arith.mulf %485, %465 : vector<1x32xf32>
    %495 = arith.addf %493, %494 : vector<1x32xf32>
    %c0_107 = arith.constant 0 : index
    %c0_108 = arith.constant 0 : index
    %496 = vector.load %arg22[%c0_107, %c0_108] : memref<8x32xf32, #tpu.memory_space<vmem>>, vector<1x32xf32>
    tpu.vector_store %arg22[%c0_107, %c0_108], %495 {strides = array<i32>} : memref<8x32xf32, #tpu.memory_space<vmem>>, vector<1x32xf32>,
    %c0_109 = arith.constant 0 : index
    %c0_110 = arith.constant 0 : index
    %497 = vector.load %arg21[%c0_109, %c0_110] : memref<8x32xf32, #tpu.memory_space<vmem>>, vector<8x32xf32>
    %c0_111 = arith.constant 0 : index
    %c0_112 = arith.constant 0 : index
    %498 = vector.load %arg22[%c0_111, %c0_112] : memref<8x32xf32, #tpu.memory_space<vmem>>, vector<8x32xf32>
    %c0_113 = arith.constant 0 : index
    %c0_114 = arith.constant 0 : index
    %499 = vector.load %arg9[%c0_113, %c0_114] : memref<32x96xf32, #tpu.memory_space<vmem>>, vector<32x96xf32>
    %cst_115 = arith.constant dense<0.000000e+00> : vector<8x96xf32>
    %500 = tpu.matmul %497, %499, %cst_115 {dimension_numbers = #tpu.dot_dimension_numbers<[1], [0], [0], [1], [0, 0, 1, 1], [], []>} : vector<8x32xf32>, vector<32x96xf32>, vector<8x96xf32> -> vector<8x96xf32>
    %c0_116 = arith.constant 0 : index
    %c0_117 = arith.constant 0 : index
    %501 = vector.load %arg10[%c0_116, %c0_117] : memref<32x96xf32, #tpu.memory_space<vmem>>, vector<32x96xf32>
    %cst_118 = arith.constant dense<0.000000e+00> : vector<8x96xf32>
    %502 = tpu.matmul %498, %501, %cst_118 {dimension_numbers = #tpu.dot_dimension_numbers<[1], [0], [0], [1], [0, 0, 1, 1], [], []>} : vector<8x32xf32>, vector<32x96xf32>, vector<8x96xf32> -> vector<8x96xf32>
    %503 = arith.addf %500, %502 : vector<8x96xf32>
    %c0_119 = arith.constant 0 : index
    %c0_120 = arith.constant 0 : index
    %504 = vector.load %arg12[%c0_119, %c0_120] : memref<1x96xf32, #tpu.memory_space<vmem>>, vector<1x96xf32>
    %505 = vector.broadcast %504 : vector<1x96xf32> to vector<8x96xf32>
    %506 = arith.addf %503, %505 : vector<8x96xf32>
    %c0_121 = arith.constant 0 : index
    %c0_122 = arith.constant 0 : index
    %507 = vector.load %arg14[%c0_121, %c0_122] : memref<32x96xf32, #tpu.memory_space<vmem>>, vector<32x96xf32>
    %cst_123 = arith.constant dense<0.000000e+00> : vector<8x96xf32>
    %508 = tpu.matmul %497, %507, %cst_123 {dimension_numbers = #tpu.dot_dimension_numbers<[1], [0], [0], [1], [0, 0, 1, 1], [], []>} : vector<8x32xf32>, vector<32x96xf32>, vector<8x96xf32> -> vector<8x96xf32>
    %c0_124 = arith.constant 0 : index
    %c0_125 = arith.constant 0 : index
    %509 = vector.load %arg15[%c0_124, %c0_125] : memref<32x96xf32, #tpu.memory_space<vmem>>, vector<32x96xf32>
    %cst_126 = arith.constant dense<0.000000e+00> : vector<8x96xf32>
    %510 = tpu.matmul %498, %509, %cst_126 {dimension_numbers = #tpu.dot_dimension_numbers<[1], [0], [0], [1], [0, 0, 1, 1], [], []>} : vector<8x32xf32>, vector<32x96xf32>, vector<8x96xf32> -> vector<8x96xf32>
    %511 = arith.addf %508, %510 : vector<8x96xf32>
    %c0_127 = arith.constant 0 : index
    %c0_128 = arith.constant 0 : index
    %512 = vector.load %arg17[%c0_127, %c0_128] : memref<1x96xf32, #tpu.memory_space<vmem>>, vector<1x96xf32>
    %513 = vector.broadcast %512 : vector<1x96xf32> to vector<8x96xf32>
    %514 = arith.addf %511, %513 : vector<8x96xf32>
    %c0_129 = arith.constant 0 : index
    %c0_130 = arith.constant 0 : index
    %515 = vector.load %arg11[%c0_129, %c0_130] : memref<32x96xf32, #tpu.memory_space<vmem>>, vector<32x96xf32>
    %c0_131 = arith.constant 0 : index
    %c0_132 = arith.constant 0 : index
    %516 = vector.load %arg13[%c0_131, %c0_132] : memref<1x96xf32, #tpu.memory_space<vmem>>, vector<1x96xf32>
    %cst_133 = arith.constant 0.000000e+00 : f32
    %517 = vector.broadcast %cst_133 : f32 to vector<1x32xf32>
    %cst_134 = arith.constant dense<0.000000e+00> : vector<1x96xf32>
    %518 = tpu.matmul %517, %515, %cst_134 {dimension_numbers = #tpu.dot_dimension_numbers<[1], [0], [0], [1], [0, 0, 1, 1], [], []>} : vector<1x32xf32>, vector<32x96xf32>, vector<1x96xf32> -> vector<1x96xf32>
    %519 = arith.addf %518, %516 : vector<1x96xf32>
    %520 = vector.extract_strided_slice %506 {offsets = [0, 0], sizes = [1, 96], strides = [1, 1]} : vector<8x96xf32> to vector<1x96xf32>
    %521 = vector.extract_strided_slice %520 {offsets = [0, 0], sizes = [1, 32], strides = [1, 1]} : vector<1x96xf32> to vector<1x32xf32>
    %522 = vector.extract_strided_slice %519 {offsets = [0, 0], sizes = [1, 32], strides = [1, 1]} : vector<1x96xf32> to vector<1x32xf32>
    %523 = arith.addf %521, %522 : vector<1x32xf32>
    %524 = arith.negf %523 : vector<1x32xf32>
    %525 = math.exp %524 : vector<1x32xf32>
    %cst_135 = arith.constant 1.000000e+00 : f32
    %526 = vector.broadcast %cst_135 : f32 to vector<1x32xf32>
    %527 = arith.addf %526, %525 : vector<1x32xf32>
    %528 = arith.divf %526, %527 : vector<1x32xf32>
    %529 = vector.extract_strided_slice %520 {offsets = [0, 32], sizes = [1, 32], strides = [1, 1]} : vector<1x96xf32> to vector<1x32xf32>
    %530 = vector.extract_strided_slice %519 {offsets = [0, 32], sizes = [1, 32], strides = [1, 1]} : vector<1x96xf32> to vector<1x32xf32>
    %531 = arith.addf %529, %530 : vector<1x32xf32>
    %532 = arith.negf %531 : vector<1x32xf32>
    %533 = math.exp %532 : vector<1x32xf32>
    %cst_136 = arith.constant 1.000000e+00 : f32
    %534 = vector.broadcast %cst_136 : f32 to vector<1x32xf32>
    %535 = arith.addf %534, %533 : vector<1x32xf32>
    %536 = arith.divf %534, %535 : vector<1x32xf32>
    %537 = vector.extract_strided_slice %520 {offsets = [0, 64], sizes = [1, 32], strides = [1, 1]} : vector<1x96xf32> to vector<1x32xf32>
    %538 = vector.extract_strided_slice %519 {offsets = [0, 64], sizes = [1, 32], strides = [1, 1]} : vector<1x96xf32> to vector<1x32xf32>
    %539 = arith.mulf %528, %538 : vector<1x32xf32>
    %540 = arith.addf %537, %539 : vector<1x32xf32>
    %541 = math.tanh %540 : vector<1x32xf32>
    %cst_137 = arith.constant 1.000000e+00 : f32
    %542 = vector.broadcast %cst_137 : f32 to vector<1x32xf32>
    %543 = arith.subf %542, %536 : vector<1x32xf32>
    %544 = arith.mulf %543, %541 : vector<1x32xf32>
    %545 = arith.mulf %536, %517 : vector<1x32xf32>
    %546 = arith.addf %544, %545 : vector<1x32xf32>
    %c0_138 = arith.constant 0 : index
    %c0_139 = arith.constant 0 : index
    %547 = vector.load %arg19[%c0_138, %c0_139] : memref<8x32xf32, #tpu.memory_space<vmem>>, vector<1x32xf32>
    tpu.vector_store %arg19[%c0_138, %c0_139], %546 {strides = array<i32>} : memref<8x32xf32, #tpu.memory_space<vmem>>, vector<1x32xf32>,
    %cst_140 = arith.constant dense<0.000000e+00> : vector<1x96xf32>
    %548 = tpu.matmul %546, %515, %cst_140 {dimension_numbers = #tpu.dot_dimension_numbers<[1], [0], [0], [1], [0, 0, 1, 1], [], []>} : vector<1x32xf32>, vector<32x96xf32>, vector<1x96xf32> -> vector<1x96xf32>
    %549 = arith.addf %548, %516 : vector<1x96xf32>
    %550 = vector.extract_strided_slice %506 {offsets = [1, 0], sizes = [1, 96], strides = [1, 1]} : vector<8x96xf32> to vector<1x96xf32>
    %551 = vector.extract_strided_slice %550 {offsets = [0, 0], sizes = [1, 32], strides = [1, 1]} : vector<1x96xf32> to vector<1x32xf32>
    %552 = vector.extract_strided_slice %549 {offsets = [0, 0], sizes = [1, 32], strides = [1, 1]} : vector<1x96xf32> to vector<1x32xf32>
    %553 = arith.addf %551, %552 : vector<1x32xf32>
    %554 = arith.negf %553 : vector<1x32xf32>
    %555 = math.exp %554 : vector<1x32xf32>
    %cst_141 = arith.constant 1.000000e+00 : f32
    %556 = vector.broadcast %cst_141 : f32 to vector<1x32xf32>
    %557 = arith.addf %556, %555 : vector<1x32xf32>
    %558 = arith.divf %556, %557 : vector<1x32xf32>
    %559 = vector.extract_strided_slice %550 {offsets = [0, 32], sizes = [1, 32], strides = [1, 1]} : vector<1x96xf32> to vector<1x32xf32>
    %560 = vector.extract_strided_slice %549 {offsets = [0, 32], sizes = [1, 32], strides = [1, 1]} : vector<1x96xf32> to vector<1x32xf32>
    %561 = arith.addf %559, %560 : vector<1x32xf32>
    %562 = arith.negf %561 : vector<1x32xf32>
    %563 = math.exp %562 : vector<1x32xf32>
    %cst_142 = arith.constant 1.000000e+00 : f32
    %564 = vector.broadcast %cst_142 : f32 to vector<1x32xf32>
    %565 = arith.addf %564, %563 : vector<1x32xf32>
    %566 = arith.divf %564, %565 : vector<1x32xf32>
    %567 = vector.extract_strided_slice %550 {offsets = [0, 64], sizes = [1, 32], strides = [1, 1]} : vector<1x96xf32> to vector<1x32xf32>
    %568 = vector.extract_strided_slice %549 {offsets = [0, 64], sizes = [1, 32], strides = [1, 1]} : vector<1x96xf32> to vector<1x32xf32>
    %569 = arith.mulf %558, %568 : vector<1x32xf32>
    %570 = arith.addf %567, %569 : vector<1x32xf32>
    %571 = math.tanh %570 : vector<1x32xf32>
    %cst_143 = arith.constant 1.000000e+00 : f32
    %572 = vector.broadcast %cst_143 : f32 to vector<1x32xf32>
    %573 = arith.subf %572, %566 : vector<1x32xf32>
    %574 = arith.mulf %573, %571 : vector<1x32xf32>
    %575 = arith.mulf %566, %546 : vector<1x32xf32>
    %576 = arith.addf %574, %575 : vector<1x32xf32>
    %c1_144 = arith.constant 1 : index
    %c0_145 = arith.constant 0 : index
    %577 = vector.load %arg19[%c1_144, %c0_145] : memref<8x32xf32, #tpu.memory_space<vmem>>, vector<1x32xf32>
    tpu.vector_store %arg19[%c1_144, %c0_145], %576 {strides = array<i32>} : memref<8x32xf32, #tpu.memory_space<vmem>>, vector<1x32xf32>,
    %cst_146 = arith.constant dense<0.000000e+00> : vector<1x96xf32>
    %578 = tpu.matmul %576, %515, %cst_146 {dimension_numbers = #tpu.dot_dimension_numbers<[1], [0], [0], [1], [0, 0, 1, 1], [], []>} : vector<1x32xf32>, vector<32x96xf32>, vector<1x96xf32> -> vector<1x96xf32>
    %579 = arith.addf %578, %516 : vector<1x96xf32>
    %580 = vector.extract_strided_slice %506 {offsets = [2, 0], sizes = [1, 96], strides = [1, 1]} : vector<8x96xf32> to vector<1x96xf32>
    %581 = vector.extract_strided_slice %580 {offsets = [0, 0], sizes = [1, 32], strides = [1, 1]} : vector<1x96xf32> to vector<1x32xf32>
    %582 = vector.extract_strided_slice %579 {offsets = [0, 0], sizes = [1, 32], strides = [1, 1]} : vector<1x96xf32> to vector<1x32xf32>
    %583 = arith.addf %581, %582 : vector<1x32xf32>
    %584 = arith.negf %583 : vector<1x32xf32>
    %585 = math.exp %584 : vector<1x32xf32>
    %cst_147 = arith.constant 1.000000e+00 : f32
    %586 = vector.broadcast %cst_147 : f32 to vector<1x32xf32>
    %587 = arith.addf %586, %585 : vector<1x32xf32>
    %588 = arith.divf %586, %587 : vector<1x32xf32>
    %589 = vector.extract_strided_slice %580 {offsets = [0, 32], sizes = [1, 32], strides = [1, 1]} : vector<1x96xf32> to vector<1x32xf32>
    %590 = vector.extract_strided_slice %579 {offsets = [0, 32], sizes = [1, 32], strides = [1, 1]} : vector<1x96xf32> to vector<1x32xf32>
    %591 = arith.addf %589, %590 : vector<1x32xf32>
    %592 = arith.negf %591 : vector<1x32xf32>
    %593 = math.exp %592 : vector<1x32xf32>
    %cst_148 = arith.constant 1.000000e+00 : f32
    %594 = vector.broadcast %cst_148 : f32 to vector<1x32xf32>
    %595 = arith.addf %594, %593 : vector<1x32xf32>
    %596 = arith.divf %594, %595 : vector<1x32xf32>
    %597 = vector.extract_strided_slice %580 {offsets = [0, 64], sizes = [1, 32], strides = [1, 1]} : vector<1x96xf32> to vector<1x32xf32>
    %598 = vector.extract_strided_slice %579 {offsets = [0, 64], sizes = [1, 32], strides = [1, 1]} : vector<1x96xf32> to vector<1x32xf32>
    %599 = arith.mulf %588, %598 : vector<1x32xf32>
    %600 = arith.addf %597, %599 : vector<1x32xf32>
    %601 = math.tanh %600 : vector<1x32xf32>
    %cst_149 = arith.constant 1.000000e+00 : f32
    %602 = vector.broadcast %cst_149 : f32 to vector<1x32xf32>
    %603 = arith.subf %602, %596 : vector<1x32xf32>
    %604 = arith.mulf %603, %601 : vector<1x32xf32>
    %605 = arith.mulf %596, %576 : vector<1x32xf32>
    %606 = arith.addf %604, %605 : vector<1x32xf32>
    %c2_150 = arith.constant 2 : index
    %c0_151 = arith.constant 0 : index
    %607 = vector.load %arg19[%c2_150, %c0_151] : memref<8x32xf32, #tpu.memory_space<vmem>>, vector<1x32xf32>
    tpu.vector_store %arg19[%c2_150, %c0_151], %606 {strides = array<i32>} : memref<8x32xf32, #tpu.memory_space<vmem>>, vector<1x32xf32>,
    %cst_152 = arith.constant dense<0.000000e+00> : vector<1x96xf32>
    %608 = tpu.matmul %606, %515, %cst_152 {dimension_numbers = #tpu.dot_dimension_numbers<[1], [0], [0], [1], [0, 0, 1, 1], [], []>} : vector<1x32xf32>, vector<32x96xf32>, vector<1x96xf32> -> vector<1x96xf32>
    %609 = arith.addf %608, %516 : vector<1x96xf32>
    %610 = vector.extract_strided_slice %506 {offsets = [3, 0], sizes = [1, 96], strides = [1, 1]} : vector<8x96xf32> to vector<1x96xf32>
    %611 = vector.extract_strided_slice %610 {offsets = [0, 0], sizes = [1, 32], strides = [1, 1]} : vector<1x96xf32> to vector<1x32xf32>
    %612 = vector.extract_strided_slice %609 {offsets = [0, 0], sizes = [1, 32], strides = [1, 1]} : vector<1x96xf32> to vector<1x32xf32>
    %613 = arith.addf %611, %612 : vector<1x32xf32>
    %614 = arith.negf %613 : vector<1x32xf32>
    %615 = math.exp %614 : vector<1x32xf32>
    %cst_153 = arith.constant 1.000000e+00 : f32
    %616 = vector.broadcast %cst_153 : f32 to vector<1x32xf32>
    %617 = arith.addf %616, %615 : vector<1x32xf32>
    %618 = arith.divf %616, %617 : vector<1x32xf32>
    %619 = vector.extract_strided_slice %610 {offsets = [0, 32], sizes = [1, 32], strides = [1, 1]} : vector<1x96xf32> to vector<1x32xf32>
    %620 = vector.extract_strided_slice %609 {offsets = [0, 32], sizes = [1, 32], strides = [1, 1]} : vector<1x96xf32> to vector<1x32xf32>
    %621 = arith.addf %619, %620 : vector<1x32xf32>
    %622 = arith.negf %621 : vector<1x32xf32>
    %623 = math.exp %622 : vector<1x32xf32>
    %cst_154 = arith.constant 1.000000e+00 : f32
    %624 = vector.broadcast %cst_154 : f32 to vector<1x32xf32>
    %625 = arith.addf %624, %623 : vector<1x32xf32>
    %626 = arith.divf %624, %625 : vector<1x32xf32>
    %627 = vector.extract_strided_slice %610 {offsets = [0, 64], sizes = [1, 32], strides = [1, 1]} : vector<1x96xf32> to vector<1x32xf32>
    %628 = vector.extract_strided_slice %609 {offsets = [0, 64], sizes = [1, 32], strides = [1, 1]} : vector<1x96xf32> to vector<1x32xf32>
    %629 = arith.mulf %618, %628 : vector<1x32xf32>
    %630 = arith.addf %627, %629 : vector<1x32xf32>
    %631 = math.tanh %630 : vector<1x32xf32>
    %cst_155 = arith.constant 1.000000e+00 : f32
    %632 = vector.broadcast %cst_155 : f32 to vector<1x32xf32>
    %633 = arith.subf %632, %626 : vector<1x32xf32>
    %634 = arith.mulf %633, %631 : vector<1x32xf32>
    %635 = arith.mulf %626, %606 : vector<1x32xf32>
    %636 = arith.addf %634, %635 : vector<1x32xf32>
    %c3_156 = arith.constant 3 : index
    %c0_157 = arith.constant 0 : index
    %637 = vector.load %arg19[%c3_156, %c0_157] : memref<8x32xf32, #tpu.memory_space<vmem>>, vector<1x32xf32>
    tpu.vector_store %arg19[%c3_156, %c0_157], %636 {strides = array<i32>} : memref<8x32xf32, #tpu.memory_space<vmem>>, vector<1x32xf32>,
    %cst_158 = arith.constant dense<0.000000e+00> : vector<1x96xf32>
    %638 = tpu.matmul %636, %515, %cst_158 {dimension_numbers = #tpu.dot_dimension_numbers<[1], [0], [0], [1], [0, 0, 1, 1], [], []>} : vector<1x32xf32>, vector<32x96xf32>, vector<1x96xf32> -> vector<1x96xf32>
    %639 = arith.addf %638, %516 : vector<1x96xf32>
    %640 = vector.extract_strided_slice %506 {offsets = [4, 0], sizes = [1, 96], strides = [1, 1]} : vector<8x96xf32> to vector<1x96xf32>
    %641 = vector.extract_strided_slice %640 {offsets = [0, 0], sizes = [1, 32], strides = [1, 1]} : vector<1x96xf32> to vector<1x32xf32>
    %642 = vector.extract_strided_slice %639 {offsets = [0, 0], sizes = [1, 32], strides = [1, 1]} : vector<1x96xf32> to vector<1x32xf32>
    %643 = arith.addf %641, %642 : vector<1x32xf32>
    %644 = arith.negf %643 : vector<1x32xf32>
    %645 = math.exp %644 : vector<1x32xf32>
    %cst_159 = arith.constant 1.000000e+00 : f32
    %646 = vector.broadcast %cst_159 : f32 to vector<1x32xf32>
    %647 = arith.addf %646, %645 : vector<1x32xf32>
    %648 = arith.divf %646, %647 : vector<1x32xf32>
    %649 = vector.extract_strided_slice %640 {offsets = [0, 32], sizes = [1, 32], strides = [1, 1]} : vector<1x96xf32> to vector<1x32xf32>
    %650 = vector.extract_strided_slice %639 {offsets = [0, 32], sizes = [1, 32], strides = [1, 1]} : vector<1x96xf32> to vector<1x32xf32>
    %651 = arith.addf %649, %650 : vector<1x32xf32>
    %652 = arith.negf %651 : vector<1x32xf32>
    %653 = math.exp %652 : vector<1x32xf32>
    %cst_160 = arith.constant 1.000000e+00 : f32
    %654 = vector.broadcast %cst_160 : f32 to vector<1x32xf32>
    %655 = arith.addf %654, %653 : vector<1x32xf32>
    %656 = arith.divf %654, %655 : vector<1x32xf32>
    %657 = vector.extract_strided_slice %640 {offsets = [0, 64], sizes = [1, 32], strides = [1, 1]} : vector<1x96xf32> to vector<1x32xf32>
    %658 = vector.extract_strided_slice %639 {offsets = [0, 64], sizes = [1, 32], strides = [1, 1]} : vector<1x96xf32> to vector<1x32xf32>
    %659 = arith.mulf %648, %658 : vector<1x32xf32>
    %660 = arith.addf %657, %659 : vector<1x32xf32>
    %661 = math.tanh %660 : vector<1x32xf32>
    %cst_161 = arith.constant 1.000000e+00 : f32
    %662 = vector.broadcast %cst_161 : f32 to vector<1x32xf32>
    %663 = arith.subf %662, %656 : vector<1x32xf32>
    %664 = arith.mulf %663, %661 : vector<1x32xf32>
    %665 = arith.mulf %656, %636 : vector<1x32xf32>
    %666 = arith.addf %664, %665 : vector<1x32xf32>
    %c4_162 = arith.constant 4 : index
    %c0_163 = arith.constant 0 : index
    %667 = vector.load %arg19[%c4_162, %c0_163] : memref<8x32xf32, #tpu.memory_space<vmem>>, vector<1x32xf32>
    tpu.vector_store %arg19[%c4_162, %c0_163], %666 {strides = array<i32>} : memref<8x32xf32, #tpu.memory_space<vmem>>, vector<1x32xf32>,
    %cst_164 = arith.constant dense<0.000000e+00> : vector<1x96xf32>
    %668 = tpu.matmul %666, %515, %cst_164 {dimension_numbers = #tpu.dot_dimension_numbers<[1], [0], [0], [1], [0, 0, 1, 1], [], []>} : vector<1x32xf32>, vector<32x96xf32>, vector<1x96xf32> -> vector<1x96xf32>
    %669 = arith.addf %668, %516 : vector<1x96xf32>
    %670 = vector.extract_strided_slice %506 {offsets = [5, 0], sizes = [1, 96], strides = [1, 1]} : vector<8x96xf32> to vector<1x96xf32>
    %671 = vector.extract_strided_slice %670 {offsets = [0, 0], sizes = [1, 32], strides = [1, 1]} : vector<1x96xf32> to vector<1x32xf32>
    %672 = vector.extract_strided_slice %669 {offsets = [0, 0], sizes = [1, 32], strides = [1, 1]} : vector<1x96xf32> to vector<1x32xf32>
    %673 = arith.addf %671, %672 : vector<1x32xf32>
    %674 = arith.negf %673 : vector<1x32xf32>
    %675 = math.exp %674 : vector<1x32xf32>
    %cst_165 = arith.constant 1.000000e+00 : f32
    %676 = vector.broadcast %cst_165 : f32 to vector<1x32xf32>
    %677 = arith.addf %676, %675 : vector<1x32xf32>
    %678 = arith.divf %676, %677 : vector<1x32xf32>
    %679 = vector.extract_strided_slice %670 {offsets = [0, 32], sizes = [1, 32], strides = [1, 1]} : vector<1x96xf32> to vector<1x32xf32>
    %680 = vector.extract_strided_slice %669 {offsets = [0, 32], sizes = [1, 32], strides = [1, 1]} : vector<1x96xf32> to vector<1x32xf32>
    %681 = arith.addf %679, %680 : vector<1x32xf32>
    %682 = arith.negf %681 : vector<1x32xf32>
    %683 = math.exp %682 : vector<1x32xf32>
    %cst_166 = arith.constant 1.000000e+00 : f32
    %684 = vector.broadcast %cst_166 : f32 to vector<1x32xf32>
    %685 = arith.addf %684, %683 : vector<1x32xf32>
    %686 = arith.divf %684, %685 : vector<1x32xf32>
    %687 = vector.extract_strided_slice %670 {offsets = [0, 64], sizes = [1, 32], strides = [1, 1]} : vector<1x96xf32> to vector<1x32xf32>
    %688 = vector.extract_strided_slice %669 {offsets = [0, 64], sizes = [1, 32], strides = [1, 1]} : vector<1x96xf32> to vector<1x32xf32>
    %689 = arith.mulf %678, %688 : vector<1x32xf32>
    %690 = arith.addf %687, %689 : vector<1x32xf32>
    %691 = math.tanh %690 : vector<1x32xf32>
    %cst_167 = arith.constant 1.000000e+00 : f32
    %692 = vector.broadcast %cst_167 : f32 to vector<1x32xf32>
    %693 = arith.subf %692, %686 : vector<1x32xf32>
    %694 = arith.mulf %693, %691 : vector<1x32xf32>
    %695 = arith.mulf %686, %666 : vector<1x32xf32>
    %696 = arith.addf %694, %695 : vector<1x32xf32>
    %c5_168 = arith.constant 5 : index
    %c0_169 = arith.constant 0 : index
    %697 = vector.load %arg19[%c5_168, %c0_169] : memref<8x32xf32, #tpu.memory_space<vmem>>, vector<1x32xf32>
    tpu.vector_store %arg19[%c5_168, %c0_169], %696 {strides = array<i32>} : memref<8x32xf32, #tpu.memory_space<vmem>>, vector<1x32xf32>,
    %cst_170 = arith.constant dense<0.000000e+00> : vector<1x96xf32>
    %698 = tpu.matmul %696, %515, %cst_170 {dimension_numbers = #tpu.dot_dimension_numbers<[1], [0], [0], [1], [0, 0, 1, 1], [], []>} : vector<1x32xf32>, vector<32x96xf32>, vector<1x96xf32> -> vector<1x96xf32>
    %699 = arith.addf %698, %516 : vector<1x96xf32>
    %700 = vector.extract_strided_slice %506 {offsets = [6, 0], sizes = [1, 96], strides = [1, 1]} : vector<8x96xf32> to vector<1x96xf32>
    %701 = vector.extract_strided_slice %700 {offsets = [0, 0], sizes = [1, 32], strides = [1, 1]} : vector<1x96xf32> to vector<1x32xf32>
    %702 = vector.extract_strided_slice %699 {offsets = [0, 0], sizes = [1, 32], strides = [1, 1]} : vector<1x96xf32> to vector<1x32xf32>
    %703 = arith.addf %701, %702 : vector<1x32xf32>
    %704 = arith.negf %703 : vector<1x32xf32>
    %705 = math.exp %704 : vector<1x32xf32>
    %cst_171 = arith.constant 1.000000e+00 : f32
    %706 = vector.broadcast %cst_171 : f32 to vector<1x32xf32>
    %707 = arith.addf %706, %705 : vector<1x32xf32>
    %708 = arith.divf %706, %707 : vector<1x32xf32>
    %709 = vector.extract_strided_slice %700 {offsets = [0, 32], sizes = [1, 32], strides = [1, 1]} : vector<1x96xf32> to vector<1x32xf32>
    %710 = vector.extract_strided_slice %699 {offsets = [0, 32], sizes = [1, 32], strides = [1, 1]} : vector<1x96xf32> to vector<1x32xf32>
    %711 = arith.addf %709, %710 : vector<1x32xf32>
    %712 = arith.negf %711 : vector<1x32xf32>
    %713 = math.exp %712 : vector<1x32xf32>
    %cst_172 = arith.constant 1.000000e+00 : f32
    %714 = vector.broadcast %cst_172 : f32 to vector<1x32xf32>
    %715 = arith.addf %714, %713 : vector<1x32xf32>
    %716 = arith.divf %714, %715 : vector<1x32xf32>
    %717 = vector.extract_strided_slice %700 {offsets = [0, 64], sizes = [1, 32], strides = [1, 1]} : vector<1x96xf32> to vector<1x32xf32>
    %718 = vector.extract_strided_slice %699 {offsets = [0, 64], sizes = [1, 32], strides = [1, 1]} : vector<1x96xf32> to vector<1x32xf32>
    %719 = arith.mulf %708, %718 : vector<1x32xf32>
    %720 = arith.addf %717, %719 : vector<1x32xf32>
    %721 = math.tanh %720 : vector<1x32xf32>
    %cst_173 = arith.constant 1.000000e+00 : f32
    %722 = vector.broadcast %cst_173 : f32 to vector<1x32xf32>
    %723 = arith.subf %722, %716 : vector<1x32xf32>
    %724 = arith.mulf %723, %721 : vector<1x32xf32>
    %725 = arith.mulf %716, %696 : vector<1x32xf32>
    %726 = arith.addf %724, %725 : vector<1x32xf32>
    %c6_174 = arith.constant 6 : index
    %c0_175 = arith.constant 0 : index
    %727 = vector.load %arg19[%c6_174, %c0_175] : memref<8x32xf32, #tpu.memory_space<vmem>>, vector<1x32xf32>
    tpu.vector_store %arg19[%c6_174, %c0_175], %726 {strides = array<i32>} : memref<8x32xf32, #tpu.memory_space<vmem>>, vector<1x32xf32>,
    %cst_176 = arith.constant dense<0.000000e+00> : vector<1x96xf32>
    %728 = tpu.matmul %726, %515, %cst_176 {dimension_numbers = #tpu.dot_dimension_numbers<[1], [0], [0], [1], [0, 0, 1, 1], [], []>} : vector<1x32xf32>, vector<32x96xf32>, vector<1x96xf32> -> vector<1x96xf32>
    %729 = arith.addf %728, %516 : vector<1x96xf32>
    %730 = vector.extract_strided_slice %506 {offsets = [7, 0], sizes = [1, 96], strides = [1, 1]} : vector<8x96xf32> to vector<1x96xf32>
    %731 = vector.extract_strided_slice %730 {offsets = [0, 0], sizes = [1, 32], strides = [1, 1]} : vector<1x96xf32> to vector<1x32xf32>
    %732 = vector.extract_strided_slice %729 {offsets = [0, 0], sizes = [1, 32], strides = [1, 1]} : vector<1x96xf32> to vector<1x32xf32>
    %733 = arith.addf %731, %732 : vector<1x32xf32>
    %734 = arith.negf %733 : vector<1x32xf32>
    %735 = math.exp %734 : vector<1x32xf32>
    %cst_177 = arith.constant 1.000000e+00 : f32
    %736 = vector.broadcast %cst_177 : f32 to vector<1x32xf32>
    %737 = arith.addf %736, %735 : vector<1x32xf32>
    %738 = arith.divf %736, %737 : vector<1x32xf32>
    %739 = vector.extract_strided_slice %730 {offsets = [0, 32], sizes = [1, 32], strides = [1, 1]} : vector<1x96xf32> to vector<1x32xf32>
    %740 = vector.extract_strided_slice %729 {offsets = [0, 32], sizes = [1, 32], strides = [1, 1]} : vector<1x96xf32> to vector<1x32xf32>
    %741 = arith.addf %739, %740 : vector<1x32xf32>
    %742 = arith.negf %741 : vector<1x32xf32>
    %743 = math.exp %742 : vector<1x32xf32>
    %cst_178 = arith.constant 1.000000e+00 : f32
    %744 = vector.broadcast %cst_178 : f32 to vector<1x32xf32>
    %745 = arith.addf %744, %743 : vector<1x32xf32>
    %746 = arith.divf %744, %745 : vector<1x32xf32>
    %747 = vector.extract_strided_slice %730 {offsets = [0, 64], sizes = [1, 32], strides = [1, 1]} : vector<1x96xf32> to vector<1x32xf32>
    %748 = vector.extract_strided_slice %729 {offsets = [0, 64], sizes = [1, 32], strides = [1, 1]} : vector<1x96xf32> to vector<1x32xf32>
    %749 = arith.mulf %738, %748 : vector<1x32xf32>
    %750 = arith.addf %747, %749 : vector<1x32xf32>
    %751 = math.tanh %750 : vector<1x32xf32>
    %cst_179 = arith.constant 1.000000e+00 : f32
    %752 = vector.broadcast %cst_179 : f32 to vector<1x32xf32>
    %753 = arith.subf %752, %746 : vector<1x32xf32>
    %754 = arith.mulf %753, %751 : vector<1x32xf32>
    %755 = arith.mulf %746, %726 : vector<1x32xf32>
    %756 = arith.addf %754, %755 : vector<1x32xf32>
    %c7_180 = arith.constant 7 : index
    %c0_181 = arith.constant 0 : index
    %757 = vector.load %arg19[%c7_180, %c0_181] : memref<8x32xf32, #tpu.memory_space<vmem>>, vector<1x32xf32>
    tpu.vector_store %arg19[%c7_180, %c0_181], %756 {strides = array<i32>} : memref<8x32xf32, #tpu.memory_space<vmem>>, vector<1x32xf32>,
    %c0_182 = arith.constant 0 : index
    %c0_183 = arith.constant 0 : index
    %758 = vector.load %arg16[%c0_182, %c0_183] : memref<32x96xf32, #tpu.memory_space<vmem>>, vector<32x96xf32>
    %c0_184 = arith.constant 0 : index
    %c0_185 = arith.constant 0 : index
    %759 = vector.load %arg18[%c0_184, %c0_185] : memref<1x96xf32, #tpu.memory_space<vmem>>, vector<1x96xf32>
    %cst_186 = arith.constant 0.000000e+00 : f32
    %760 = vector.broadcast %cst_186 : f32 to vector<1x32xf32>
    %cst_187 = arith.constant dense<0.000000e+00> : vector<1x96xf32>
    %761 = tpu.matmul %760, %758, %cst_187 {dimension_numbers = #tpu.dot_dimension_numbers<[1], [0], [0], [1], [0, 0, 1, 1], [], []>} : vector<1x32xf32>, vector<32x96xf32>, vector<1x96xf32> -> vector<1x96xf32>
    %762 = arith.addf %761, %759 : vector<1x96xf32>
    %763 = vector.extract_strided_slice %514 {offsets = [7, 0], sizes = [1, 96], strides = [1, 1]} : vector<8x96xf32> to vector<1x96xf32>
    %764 = vector.extract_strided_slice %763 {offsets = [0, 0], sizes = [1, 32], strides = [1, 1]} : vector<1x96xf32> to vector<1x32xf32>
    %765 = vector.extract_strided_slice %762 {offsets = [0, 0], sizes = [1, 32], strides = [1, 1]} : vector<1x96xf32> to vector<1x32xf32>
    %766 = arith.addf %764, %765 : vector<1x32xf32>
    %767 = arith.negf %766 : vector<1x32xf32>
    %768 = math.exp %767 : vector<1x32xf32>
    %cst_188 = arith.constant 1.000000e+00 : f32
    %769 = vector.broadcast %cst_188 : f32 to vector<1x32xf32>
    %770 = arith.addf %769, %768 : vector<1x32xf32>
    %771 = arith.divf %769, %770 : vector<1x32xf32>
    %772 = vector.extract_strided_slice %763 {offsets = [0, 32], sizes = [1, 32], strides = [1, 1]} : vector<1x96xf32> to vector<1x32xf32>
    %773 = vector.extract_strided_slice %762 {offsets = [0, 32], sizes = [1, 32], strides = [1, 1]} : vector<1x96xf32> to vector<1x32xf32>
    %774 = arith.addf %772, %773 : vector<1x32xf32>
    %775 = arith.negf %774 : vector<1x32xf32>
    %776 = math.exp %775 : vector<1x32xf32>
    %cst_189 = arith.constant 1.000000e+00 : f32
    %777 = vector.broadcast %cst_189 : f32 to vector<1x32xf32>
    %778 = arith.addf %777, %776 : vector<1x32xf32>
    %779 = arith.divf %777, %778 : vector<1x32xf32>
    %780 = vector.extract_strided_slice %763 {offsets = [0, 64], sizes = [1, 32], strides = [1, 1]} : vector<1x96xf32> to vector<1x32xf32>
    %781 = vector.extract_strided_slice %762 {offsets = [0, 64], sizes = [1, 32], strides = [1, 1]} : vector<1x96xf32> to vector<1x32xf32>
    %782 = arith.mulf %771, %781 : vector<1x32xf32>
    %783 = arith.addf %780, %782 : vector<1x32xf32>
    %784 = math.tanh %783 : vector<1x32xf32>
    %cst_190 = arith.constant 1.000000e+00 : f32
    %785 = vector.broadcast %cst_190 : f32 to vector<1x32xf32>
    %786 = arith.subf %785, %779 : vector<1x32xf32>
    %787 = arith.mulf %786, %784 : vector<1x32xf32>
    %788 = arith.mulf %779, %760 : vector<1x32xf32>
    %789 = arith.addf %787, %788 : vector<1x32xf32>
    %c7_191 = arith.constant 7 : index
    %c0_192 = arith.constant 0 : index
    %790 = vector.load %arg19[%c7_191, %c0_192] : memref<8x32xf32, #tpu.memory_space<vmem>>, vector<1x32xf32>
    %791 = arith.addf %790, %789 : vector<1x32xf32>
    %c7_193 = arith.constant 7 : index
    %c0_194 = arith.constant 0 : index
    %792 = vector.load %arg19[%c7_193, %c0_194] : memref<8x32xf32, #tpu.memory_space<vmem>>, vector<1x32xf32>
    tpu.vector_store %arg19[%c7_193, %c0_194], %791 {strides = array<i32>} : memref<8x32xf32, #tpu.memory_space<vmem>>, vector<1x32xf32>,
    %cst_195 = arith.constant dense<0.000000e+00> : vector<1x96xf32>
    %793 = tpu.matmul %789, %758, %cst_195 {dimension_numbers = #tpu.dot_dimension_numbers<[1], [0], [0], [1], [0, 0, 1, 1], [], []>} : vector<1x32xf32>, vector<32x96xf32>, vector<1x96xf32> -> vector<1x96xf32>
    %794 = arith.addf %793, %759 : vector<1x96xf32>
    %795 = vector.extract_strided_slice %514 {offsets = [6, 0], sizes = [1, 96], strides = [1, 1]} : vector<8x96xf32> to vector<1x96xf32>
    %796 = vector.extract_strided_slice %795 {offsets = [0, 0], sizes = [1, 32], strides = [1, 1]} : vector<1x96xf32> to vector<1x32xf32>
    %797 = vector.extract_strided_slice %794 {offsets = [0, 0], sizes = [1, 32], strides = [1, 1]} : vector<1x96xf32> to vector<1x32xf32>
    %798 = arith.addf %796, %797 : vector<1x32xf32>
    %799 = arith.negf %798 : vector<1x32xf32>
    %800 = math.exp %799 : vector<1x32xf32>
    %cst_196 = arith.constant 1.000000e+00 : f32
    %801 = vector.broadcast %cst_196 : f32 to vector<1x32xf32>
    %802 = arith.addf %801, %800 : vector<1x32xf32>
    %803 = arith.divf %801, %802 : vector<1x32xf32>
    %804 = vector.extract_strided_slice %795 {offsets = [0, 32], sizes = [1, 32], strides = [1, 1]} : vector<1x96xf32> to vector<1x32xf32>
    %805 = vector.extract_strided_slice %794 {offsets = [0, 32], sizes = [1, 32], strides = [1, 1]} : vector<1x96xf32> to vector<1x32xf32>
    %806 = arith.addf %804, %805 : vector<1x32xf32>
    %807 = arith.negf %806 : vector<1x32xf32>
    %808 = math.exp %807 : vector<1x32xf32>
    %cst_197 = arith.constant 1.000000e+00 : f32
    %809 = vector.broadcast %cst_197 : f32 to vector<1x32xf32>
    %810 = arith.addf %809, %808 : vector<1x32xf32>
    %811 = arith.divf %809, %810 : vector<1x32xf32>
    %812 = vector.extract_strided_slice %795 {offsets = [0, 64], sizes = [1, 32], strides = [1, 1]} : vector<1x96xf32> to vector<1x32xf32>
    %813 = vector.extract_strided_slice %794 {offsets = [0, 64], sizes = [1, 32], strides = [1, 1]} : vector<1x96xf32> to vector<1x32xf32>
    %814 = arith.mulf %803, %813 : vector<1x32xf32>
    %815 = arith.addf %812, %814 : vector<1x32xf32>
    %816 = math.tanh %815 : vector<1x32xf32>
    %cst_198 = arith.constant 1.000000e+00 : f32
    %817 = vector.broadcast %cst_198 : f32 to vector<1x32xf32>
    %818 = arith.subf %817, %811 : vector<1x32xf32>
    %819 = arith.mulf %818, %816 : vector<1x32xf32>
    %820 = arith.mulf %811, %789 : vector<1x32xf32>
    %821 = arith.addf %819, %820 : vector<1x32xf32>
    %c6_199 = arith.constant 6 : index
    %c0_200 = arith.constant 0 : index
    %822 = vector.load %arg19[%c6_199, %c0_200] : memref<8x32xf32, #tpu.memory_space<vmem>>, vector<1x32xf32>
    %823 = arith.addf %822, %821 : vector<1x32xf32>
    %c6_201 = arith.constant 6 : index
    %c0_202 = arith.constant 0 : index
    %824 = vector.load %arg19[%c6_201, %c0_202] : memref<8x32xf32, #tpu.memory_space<vmem>>, vector<1x32xf32>
    tpu.vector_store %arg19[%c6_201, %c0_202], %823 {strides = array<i32>} : memref<8x32xf32, #tpu.memory_space<vmem>>, vector<1x32xf32>,
    %cst_203 = arith.constant dense<0.000000e+00> : vector<1x96xf32>
    %825 = tpu.matmul %821, %758, %cst_203 {dimension_numbers = #tpu.dot_dimension_numbers<[1], [0], [0], [1], [0, 0, 1, 1], [], []>} : vector<1x32xf32>, vector<32x96xf32>, vector<1x96xf32> -> vector<1x96xf32>
    %826 = arith.addf %825, %759 : vector<1x96xf32>
    %827 = vector.extract_strided_slice %514 {offsets = [5, 0], sizes = [1, 96], strides = [1, 1]} : vector<8x96xf32> to vector<1x96xf32>
    %828 = vector.extract_strided_slice %827 {offsets = [0, 0], sizes = [1, 32], strides = [1, 1]} : vector<1x96xf32> to vector<1x32xf32>
    %829 = vector.extract_strided_slice %826 {offsets = [0, 0], sizes = [1, 32], strides = [1, 1]} : vector<1x96xf32> to vector<1x32xf32>
    %830 = arith.addf %828, %829 : vector<1x32xf32>
    %831 = arith.negf %830 : vector<1x32xf32>
    %832 = math.exp %831 : vector<1x32xf32>
    %cst_204 = arith.constant 1.000000e+00 : f32
    %833 = vector.broadcast %cst_204 : f32 to vector<1x32xf32>
    %834 = arith.addf %833, %832 : vector<1x32xf32>
    %835 = arith.divf %833, %834 : vector<1x32xf32>
    %836 = vector.extract_strided_slice %827 {offsets = [0, 32], sizes = [1, 32], strides = [1, 1]} : vector<1x96xf32> to vector<1x32xf32>
    %837 = vector.extract_strided_slice %826 {offsets = [0, 32], sizes = [1, 32], strides = [1, 1]} : vector<1x96xf32> to vector<1x32xf32>
    %838 = arith.addf %836, %837 : vector<1x32xf32>
    %839 = arith.negf %838 : vector<1x32xf32>
    %840 = math.exp %839 : vector<1x32xf32>
    %cst_205 = arith.constant 1.000000e+00 : f32
    %841 = vector.broadcast %cst_205 : f32 to vector<1x32xf32>
    %842 = arith.addf %841, %840 : vector<1x32xf32>
    %843 = arith.divf %841, %842 : vector<1x32xf32>
    %844 = vector.extract_strided_slice %827 {offsets = [0, 64], sizes = [1, 32], strides = [1, 1]} : vector<1x96xf32> to vector<1x32xf32>
    %845 = vector.extract_strided_slice %826 {offsets = [0, 64], sizes = [1, 32], strides = [1, 1]} : vector<1x96xf32> to vector<1x32xf32>
    %846 = arith.mulf %835, %845 : vector<1x32xf32>
    %847 = arith.addf %844, %846 : vector<1x32xf32>
    %848 = math.tanh %847 : vector<1x32xf32>
    %cst_206 = arith.constant 1.000000e+00 : f32
    %849 = vector.broadcast %cst_206 : f32 to vector<1x32xf32>
    %850 = arith.subf %849, %843 : vector<1x32xf32>
    %851 = arith.mulf %850, %848 : vector<1x32xf32>
    %852 = arith.mulf %843, %821 : vector<1x32xf32>
    %853 = arith.addf %851, %852 : vector<1x32xf32>
    %c5_207 = arith.constant 5 : index
    %c0_208 = arith.constant 0 : index
    %854 = vector.load %arg19[%c5_207, %c0_208] : memref<8x32xf32, #tpu.memory_space<vmem>>, vector<1x32xf32>
    %855 = arith.addf %854, %853 : vector<1x32xf32>
    %c5_209 = arith.constant 5 : index
    %c0_210 = arith.constant 0 : index
    %856 = vector.load %arg19[%c5_209, %c0_210] : memref<8x32xf32, #tpu.memory_space<vmem>>, vector<1x32xf32>
    tpu.vector_store %arg19[%c5_209, %c0_210], %855 {strides = array<i32>} : memref<8x32xf32, #tpu.memory_space<vmem>>, vector<1x32xf32>,
    %cst_211 = arith.constant dense<0.000000e+00> : vector<1x96xf32>
    %857 = tpu.matmul %853, %758, %cst_211 {dimension_numbers = #tpu.dot_dimension_numbers<[1], [0], [0], [1], [0, 0, 1, 1], [], []>} : vector<1x32xf32>, vector<32x96xf32>, vector<1x96xf32> -> vector<1x96xf32>
    %858 = arith.addf %857, %759 : vector<1x96xf32>
    %859 = vector.extract_strided_slice %514 {offsets = [4, 0], sizes = [1, 96], strides = [1, 1]} : vector<8x96xf32> to vector<1x96xf32>
    %860 = vector.extract_strided_slice %859 {offsets = [0, 0], sizes = [1, 32], strides = [1, 1]} : vector<1x96xf32> to vector<1x32xf32>
    %861 = vector.extract_strided_slice %858 {offsets = [0, 0], sizes = [1, 32], strides = [1, 1]} : vector<1x96xf32> to vector<1x32xf32>
    %862 = arith.addf %860, %861 : vector<1x32xf32>
    %863 = arith.negf %862 : vector<1x32xf32>
    %864 = math.exp %863 : vector<1x32xf32>
    %cst_212 = arith.constant 1.000000e+00 : f32
    %865 = vector.broadcast %cst_212 : f32 to vector<1x32xf32>
    %866 = arith.addf %865, %864 : vector<1x32xf32>
    %867 = arith.divf %865, %866 : vector<1x32xf32>
    %868 = vector.extract_strided_slice %859 {offsets = [0, 32], sizes = [1, 32], strides = [1, 1]} : vector<1x96xf32> to vector<1x32xf32>
    %869 = vector.extract_strided_slice %858 {offsets = [0, 32], sizes = [1, 32], strides = [1, 1]} : vector<1x96xf32> to vector<1x32xf32>
    %870 = arith.addf %868, %869 : vector<1x32xf32>
    %871 = arith.negf %870 : vector<1x32xf32>
    %872 = math.exp %871 : vector<1x32xf32>
    %cst_213 = arith.constant 1.000000e+00 : f32
    %873 = vector.broadcast %cst_213 : f32 to vector<1x32xf32>
    %874 = arith.addf %873, %872 : vector<1x32xf32>
    %875 = arith.divf %873, %874 : vector<1x32xf32>
    %876 = vector.extract_strided_slice %859 {offsets = [0, 64], sizes = [1, 32], strides = [1, 1]} : vector<1x96xf32> to vector<1x32xf32>
    %877 = vector.extract_strided_slice %858 {offsets = [0, 64], sizes = [1, 32], strides = [1, 1]} : vector<1x96xf32> to vector<1x32xf32>
    %878 = arith.mulf %867, %877 : vector<1x32xf32>
    %879 = arith.addf %876, %878 : vector<1x32xf32>
    %880 = math.tanh %879 : vector<1x32xf32>
    %cst_214 = arith.constant 1.000000e+00 : f32
    %881 = vector.broadcast %cst_214 : f32 to vector<1x32xf32>
    %882 = arith.subf %881, %875 : vector<1x32xf32>
    %883 = arith.mulf %882, %880 : vector<1x32xf32>
    %884 = arith.mulf %875, %853 : vector<1x32xf32>
    %885 = arith.addf %883, %884 : vector<1x32xf32>
    %c4_215 = arith.constant 4 : index
    %c0_216 = arith.constant 0 : index
    %886 = vector.load %arg19[%c4_215, %c0_216] : memref<8x32xf32, #tpu.memory_space<vmem>>, vector<1x32xf32>
    %887 = arith.addf %886, %885 : vector<1x32xf32>
    %c4_217 = arith.constant 4 : index
    %c0_218 = arith.constant 0 : index
    %888 = vector.load %arg19[%c4_217, %c0_218] : memref<8x32xf32, #tpu.memory_space<vmem>>, vector<1x32xf32>
    tpu.vector_store %arg19[%c4_217, %c0_218], %887 {strides = array<i32>} : memref<8x32xf32, #tpu.memory_space<vmem>>, vector<1x32xf32>,
    %cst_219 = arith.constant dense<0.000000e+00> : vector<1x96xf32>
    %889 = tpu.matmul %885, %758, %cst_219 {dimension_numbers = #tpu.dot_dimension_numbers<[1], [0], [0], [1], [0, 0, 1, 1], [], []>} : vector<1x32xf32>, vector<32x96xf32>, vector<1x96xf32> -> vector<1x96xf32>
    %890 = arith.addf %889, %759 : vector<1x96xf32>
    %891 = vector.extract_strided_slice %514 {offsets = [3, 0], sizes = [1, 96], strides = [1, 1]} : vector<8x96xf32> to vector<1x96xf32>
    %892 = vector.extract_strided_slice %891 {offsets = [0, 0], sizes = [1, 32], strides = [1, 1]} : vector<1x96xf32> to vector<1x32xf32>
    %893 = vector.extract_strided_slice %890 {offsets = [0, 0], sizes = [1, 32], strides = [1, 1]} : vector<1x96xf32> to vector<1x32xf32>
    %894 = arith.addf %892, %893 : vector<1x32xf32>
    %895 = arith.negf %894 : vector<1x32xf32>
    %896 = math.exp %895 : vector<1x32xf32>
    %cst_220 = arith.constant 1.000000e+00 : f32
    %897 = vector.broadcast %cst_220 : f32 to vector<1x32xf32>
    %898 = arith.addf %897, %896 : vector<1x32xf32>
    %899 = arith.divf %897, %898 : vector<1x32xf32>
    %900 = vector.extract_strided_slice %891 {offsets = [0, 32], sizes = [1, 32], strides = [1, 1]} : vector<1x96xf32> to vector<1x32xf32>
    %901 = vector.extract_strided_slice %890 {offsets = [0, 32], sizes = [1, 32], strides = [1, 1]} : vector<1x96xf32> to vector<1x32xf32>
    %902 = arith.addf %900, %901 : vector<1x32xf32>
    %903 = arith.negf %902 : vector<1x32xf32>
    %904 = math.exp %903 : vector<1x32xf32>
    %cst_221 = arith.constant 1.000000e+00 : f32
    %905 = vector.broadcast %cst_221 : f32 to vector<1x32xf32>
    %906 = arith.addf %905, %904 : vector<1x32xf32>
    %907 = arith.divf %905, %906 : vector<1x32xf32>
    %908 = vector.extract_strided_slice %891 {offsets = [0, 64], sizes = [1, 32], strides = [1, 1]} : vector<1x96xf32> to vector<1x32xf32>
    %909 = vector.extract_strided_slice %890 {offsets = [0, 64], sizes = [1, 32], strides = [1, 1]} : vector<1x96xf32> to vector<1x32xf32>
    %910 = arith.mulf %899, %909 : vector<1x32xf32>
    %911 = arith.addf %908, %910 : vector<1x32xf32>
    %912 = math.tanh %911 : vector<1x32xf32>
    %cst_222 = arith.constant 1.000000e+00 : f32
    %913 = vector.broadcast %cst_222 : f32 to vector<1x32xf32>
    %914 = arith.subf %913, %907 : vector<1x32xf32>
    %915 = arith.mulf %914, %912 : vector<1x32xf32>
    %916 = arith.mulf %907, %885 : vector<1x32xf32>
    %917 = arith.addf %915, %916 : vector<1x32xf32>
    %c3_223 = arith.constant 3 : index
    %c0_224 = arith.constant 0 : index
    %918 = vector.load %arg19[%c3_223, %c0_224] : memref<8x32xf32, #tpu.memory_space<vmem>>, vector<1x32xf32>
    %919 = arith.addf %918, %917 : vector<1x32xf32>
    %c3_225 = arith.constant 3 : index
    %c0_226 = arith.constant 0 : index
    %920 = vector.load %arg19[%c3_225, %c0_226] : memref<8x32xf32, #tpu.memory_space<vmem>>, vector<1x32xf32>
    tpu.vector_store %arg19[%c3_225, %c0_226], %919 {strides = array<i32>} : memref<8x32xf32, #tpu.memory_space<vmem>>, vector<1x32xf32>,
    %cst_227 = arith.constant dense<0.000000e+00> : vector<1x96xf32>
    %921 = tpu.matmul %917, %758, %cst_227 {dimension_numbers = #tpu.dot_dimension_numbers<[1], [0], [0], [1], [0, 0, 1, 1], [], []>} : vector<1x32xf32>, vector<32x96xf32>, vector<1x96xf32> -> vector<1x96xf32>
    %922 = arith.addf %921, %759 : vector<1x96xf32>
    %923 = vector.extract_strided_slice %514 {offsets = [2, 0], sizes = [1, 96], strides = [1, 1]} : vector<8x96xf32> to vector<1x96xf32>
    %924 = vector.extract_strided_slice %923 {offsets = [0, 0], sizes = [1, 32], strides = [1, 1]} : vector<1x96xf32> to vector<1x32xf32>
    %925 = vector.extract_strided_slice %922 {offsets = [0, 0], sizes = [1, 32], strides = [1, 1]} : vector<1x96xf32> to vector<1x32xf32>
    %926 = arith.addf %924, %925 : vector<1x32xf32>
    %927 = arith.negf %926 : vector<1x32xf32>
    %928 = math.exp %927 : vector<1x32xf32>
    %cst_228 = arith.constant 1.000000e+00 : f32
    %929 = vector.broadcast %cst_228 : f32 to vector<1x32xf32>
    %930 = arith.addf %929, %928 : vector<1x32xf32>
    %931 = arith.divf %929, %930 : vector<1x32xf32>
    %932 = vector.extract_strided_slice %923 {offsets = [0, 32], sizes = [1, 32], strides = [1, 1]} : vector<1x96xf32> to vector<1x32xf32>
    %933 = vector.extract_strided_slice %922 {offsets = [0, 32], sizes = [1, 32], strides = [1, 1]} : vector<1x96xf32> to vector<1x32xf32>
    %934 = arith.addf %932, %933 : vector<1x32xf32>
    %935 = arith.negf %934 : vector<1x32xf32>
    %936 = math.exp %935 : vector<1x32xf32>
    %cst_229 = arith.constant 1.000000e+00 : f32
    %937 = vector.broadcast %cst_229 : f32 to vector<1x32xf32>
    %938 = arith.addf %937, %936 : vector<1x32xf32>
    %939 = arith.divf %937, %938 : vector<1x32xf32>
    %940 = vector.extract_strided_slice %923 {offsets = [0, 64], sizes = [1, 32], strides = [1, 1]} : vector<1x96xf32> to vector<1x32xf32>
    %941 = vector.extract_strided_slice %922 {offsets = [0, 64], sizes = [1, 32], strides = [1, 1]} : vector<1x96xf32> to vector<1x32xf32>
    %942 = arith.mulf %931, %941 : vector<1x32xf32>
    %943 = arith.addf %940, %942 : vector<1x32xf32>
    %944 = math.tanh %943 : vector<1x32xf32>
    %cst_230 = arith.constant 1.000000e+00 : f32
    %945 = vector.broadcast %cst_230 : f32 to vector<1x32xf32>
    %946 = arith.subf %945, %939 : vector<1x32xf32>
    %947 = arith.mulf %946, %944 : vector<1x32xf32>
    %948 = arith.mulf %939, %917 : vector<1x32xf32>
    %949 = arith.addf %947, %948 : vector<1x32xf32>
    %c2_231 = arith.constant 2 : index
    %c0_232 = arith.constant 0 : index
    %950 = vector.load %arg19[%c2_231, %c0_232] : memref<8x32xf32, #tpu.memory_space<vmem>>, vector<1x32xf32>
    %951 = arith.addf %950, %949 : vector<1x32xf32>
    %c2_233 = arith.constant 2 : index
    %c0_234 = arith.constant 0 : index
    %952 = vector.load %arg19[%c2_233, %c0_234] : memref<8x32xf32, #tpu.memory_space<vmem>>, vector<1x32xf32>
    tpu.vector_store %arg19[%c2_233, %c0_234], %951 {strides = array<i32>} : memref<8x32xf32, #tpu.memory_space<vmem>>, vector<1x32xf32>,
    %cst_235 = arith.constant dense<0.000000e+00> : vector<1x96xf32>
    %953 = tpu.matmul %949, %758, %cst_235 {dimension_numbers = #tpu.dot_dimension_numbers<[1], [0], [0], [1], [0, 0, 1, 1], [], []>} : vector<1x32xf32>, vector<32x96xf32>, vector<1x96xf32> -> vector<1x96xf32>
    %954 = arith.addf %953, %759 : vector<1x96xf32>
    %955 = vector.extract_strided_slice %514 {offsets = [1, 0], sizes = [1, 96], strides = [1, 1]} : vector<8x96xf32> to vector<1x96xf32>
    %956 = vector.extract_strided_slice %955 {offsets = [0, 0], sizes = [1, 32], strides = [1, 1]} : vector<1x96xf32> to vector<1x32xf32>
    %957 = vector.extract_strided_slice %954 {offsets = [0, 0], sizes = [1, 32], strides = [1, 1]} : vector<1x96xf32> to vector<1x32xf32>
    %958 = arith.addf %956, %957 : vector<1x32xf32>
    %959 = arith.negf %958 : vector<1x32xf32>
    %960 = math.exp %959 : vector<1x32xf32>
    %cst_236 = arith.constant 1.000000e+00 : f32
    %961 = vector.broadcast %cst_236 : f32 to vector<1x32xf32>
    %962 = arith.addf %961, %960 : vector<1x32xf32>
    %963 = arith.divf %961, %962 : vector<1x32xf32>
    %964 = vector.extract_strided_slice %955 {offsets = [0, 32], sizes = [1, 32], strides = [1, 1]} : vector<1x96xf32> to vector<1x32xf32>
    %965 = vector.extract_strided_slice %954 {offsets = [0, 32], sizes = [1, 32], strides = [1, 1]} : vector<1x96xf32> to vector<1x32xf32>
    %966 = arith.addf %964, %965 : vector<1x32xf32>
    %967 = arith.negf %966 : vector<1x32xf32>
    %968 = math.exp %967 : vector<1x32xf32>
    %cst_237 = arith.constant 1.000000e+00 : f32
    %969 = vector.broadcast %cst_237 : f32 to vector<1x32xf32>
    %970 = arith.addf %969, %968 : vector<1x32xf32>
    %971 = arith.divf %969, %970 : vector<1x32xf32>
    %972 = vector.extract_strided_slice %955 {offsets = [0, 64], sizes = [1, 32], strides = [1, 1]} : vector<1x96xf32> to vector<1x32xf32>
    %973 = vector.extract_strided_slice %954 {offsets = [0, 64], sizes = [1, 32], strides = [1, 1]} : vector<1x96xf32> to vector<1x32xf32>
    %974 = arith.mulf %963, %973 : vector<1x32xf32>
    %975 = arith.addf %972, %974 : vector<1x32xf32>
    %976 = math.tanh %975 : vector<1x32xf32>
    %cst_238 = arith.constant 1.000000e+00 : f32
    %977 = vector.broadcast %cst_238 : f32 to vector<1x32xf32>
    %978 = arith.subf %977, %971 : vector<1x32xf32>
    %979 = arith.mulf %978, %976 : vector<1x32xf32>
    %980 = arith.mulf %971, %949 : vector<1x32xf32>
    %981 = arith.addf %979, %980 : vector<1x32xf32>
    %c1_239 = arith.constant 1 : index
    %c0_240 = arith.constant 0 : index
    %982 = vector.load %arg19[%c1_239, %c0_240] : memref<8x32xf32, #tpu.memory_space<vmem>>, vector<1x32xf32>
    %983 = arith.addf %982, %981 : vector<1x32xf32>
    %c1_241 = arith.constant 1 : index
    %c0_242 = arith.constant 0 : index
    %984 = vector.load %arg19[%c1_241, %c0_242] : memref<8x32xf32, #tpu.memory_space<vmem>>, vector<1x32xf32>
    tpu.vector_store %arg19[%c1_241, %c0_242], %983 {strides = array<i32>} : memref<8x32xf32, #tpu.memory_space<vmem>>, vector<1x32xf32>,
    %cst_243 = arith.constant dense<0.000000e+00> : vector<1x96xf32>
    %985 = tpu.matmul %981, %758, %cst_243 {dimension_numbers = #tpu.dot_dimension_numbers<[1], [0], [0], [1], [0, 0, 1, 1], [], []>} : vector<1x32xf32>, vector<32x96xf32>, vector<1x96xf32> -> vector<1x96xf32>
    %986 = arith.addf %985, %759 : vector<1x96xf32>
    %987 = vector.extract_strided_slice %514 {offsets = [0, 0], sizes = [1, 96], strides = [1, 1]} : vector<8x96xf32> to vector<1x96xf32>
    %988 = vector.extract_strided_slice %987 {offsets = [0, 0], sizes = [1, 32], strides = [1, 1]} : vector<1x96xf32> to vector<1x32xf32>
    %989 = vector.extract_strided_slice %986 {offsets = [0, 0], sizes = [1, 32], strides = [1, 1]} : vector<1x96xf32> to vector<1x32xf32>
    %990 = arith.addf %988, %989 : vector<1x32xf32>
    %991 = arith.negf %990 : vector<1x32xf32>
    %992 = math.exp %991 : vector<1x32xf32>
    %cst_244 = arith.constant 1.000000e+00 : f32
    %993 = vector.broadcast %cst_244 : f32 to vector<1x32xf32>
    %994 = arith.addf %993, %992 : vector<1x32xf32>
    %995 = arith.divf %993, %994 : vector<1x32xf32>
    %996 = vector.extract_strided_slice %987 {offsets = [0, 32], sizes = [1, 32], strides = [1, 1]} : vector<1x96xf32> to vector<1x32xf32>
    %997 = vector.extract_strided_slice %986 {offsets = [0, 32], sizes = [1, 32], strides = [1, 1]} : vector<1x96xf32> to vector<1x32xf32>
    %998 = arith.addf %996, %997 : vector<1x32xf32>
    %999 = arith.negf %998 : vector<1x32xf32>
    %1000 = math.exp %999 : vector<1x32xf32>
    %cst_245 = arith.constant 1.000000e+00 : f32
    %1001 = vector.broadcast %cst_245 : f32 to vector<1x32xf32>
    %1002 = arith.addf %1001, %1000 : vector<1x32xf32>
    %1003 = arith.divf %1001, %1002 : vector<1x32xf32>
    %1004 = vector.extract_strided_slice %987 {offsets = [0, 64], sizes = [1, 32], strides = [1, 1]} : vector<1x96xf32> to vector<1x32xf32>
    %1005 = vector.extract_strided_slice %986 {offsets = [0, 64], sizes = [1, 32], strides = [1, 1]} : vector<1x96xf32> to vector<1x32xf32>
    %1006 = arith.mulf %995, %1005 : vector<1x32xf32>
    %1007 = arith.addf %1004, %1006 : vector<1x32xf32>
    %1008 = math.tanh %1007 : vector<1x32xf32>
    %cst_246 = arith.constant 1.000000e+00 : f32
    %1009 = vector.broadcast %cst_246 : f32 to vector<1x32xf32>
    %1010 = arith.subf %1009, %1003 : vector<1x32xf32>
    %1011 = arith.mulf %1010, %1008 : vector<1x32xf32>
    %1012 = arith.mulf %1003, %981 : vector<1x32xf32>
    %1013 = arith.addf %1011, %1012 : vector<1x32xf32>
    %c0_247 = arith.constant 0 : index
    %c0_248 = arith.constant 0 : index
    %1014 = vector.load %arg19[%c0_247, %c0_248] : memref<8x32xf32, #tpu.memory_space<vmem>>, vector<1x32xf32>
    %1015 = arith.addf %1014, %1013 : vector<1x32xf32>
    %c0_249 = arith.constant 0 : index
    %c0_250 = arith.constant 0 : index
    %1016 = vector.load %arg19[%c0_249, %c0_250] : memref<8x32xf32, #tpu.memory_space<vmem>>, vector<1x32xf32>
    tpu.vector_store %arg19[%c0_249, %c0_250], %1015 {strides = array<i32>} : memref<8x32xf32, #tpu.memory_space<vmem>>, vector<1x32xf32>,
    %c0_251 = arith.constant 0 : index
    %c0_252 = arith.constant 0 : index
    %1017 = vector.load %arg20[%c0_251, %c0_252] : memref<2x32xf32, #tpu.memory_space<vmem>>, vector<1x32xf32>
    tpu.vector_store %arg20[%c0_251, %c0_252], %252 {strides = array<i32>} : memref<2x32xf32, #tpu.memory_space<vmem>>, vector<1x32xf32>,
    %c1_253 = arith.constant 1 : index
    %c0_254 = arith.constant 0 : index
    %1018 = vector.load %arg20[%c1_253, %c0_254] : memref<2x32xf32, #tpu.memory_space<vmem>>, vector<1x32xf32>
    tpu.vector_store %arg20[%c1_253, %c0_254], %495 {strides = array<i32>} : memref<2x32xf32, #tpu.memory_space<vmem>>, vector<1x32xf32>,
    return
  }
}

module attributes {stable_mosaic.version = 11 : i64} {
  func.func @decode_kernel(%arg0: memref<64x32xf32, #tpu.memory_space<vmem>>, %arg1: memref<8x32xf32, #tpu.memory_space<vmem>>, %arg2: memref<2x32xf32, #tpu.memory_space<vmem>>, %arg3: memref<32x96xf32, #tpu.memory_space<vmem>>, %arg4: memref<32x96xf32, #tpu.memory_space<vmem>>, %arg5: memref<1x96xf32, #tpu.memory_space<vmem>>, %arg6: memref<1x96xf32, #tpu.memory_space<vmem>>, %arg7: memref<32x96xf32, #tpu.memory_space<vmem>>, %arg8: memref<32x96xf32, #tpu.memory_space<vmem>>, %arg9: memref<1x96xf32, #tpu.memory_space<vmem>>, %arg10: memref<1x96xf32, #tpu.memory_space<vmem>>, %arg11: memref<64x32xf32, #tpu.memory_space<vmem>>, %arg12: memref<1x32xf32, #tpu.memory_space<vmem>>, %arg13: memref<32x64xf32, #tpu.memory_space<vmem>>, %arg14: memref<1x64xf32, #tpu.memory_space<vmem>>, %arg15: memref<5x1xi32, #tpu.memory_space<vmem>>, %arg16: memref<5x1xf32, #tpu.memory_space<vmem>>) attributes {dimension_semantics = [], scalar_prefetch = 0 : i64, scratch_operands = 0 : i64, tpu.core_type = #tpu.core_type<tc>} {
    %c0 = arith.constant 0 : index
    %c0_0 = arith.constant 0 : index
    %0 = vector.load %arg0[%c0, %c0_0] : memref<64x32xf32, #tpu.memory_space<vmem>>, vector<64x32xf32>
    %c0_1 = arith.constant 0 : index
    %c0_2 = arith.constant 0 : index
    %1 = vector.load %arg1[%c0_1, %c0_2] : memref<8x32xf32, #tpu.memory_space<vmem>>, vector<8x32xf32>
    %c0_3 = arith.constant 0 : index
    %c0_4 = arith.constant 0 : index
    %2 = vector.load %arg3[%c0_3, %c0_4] : memref<32x96xf32, #tpu.memory_space<vmem>>, vector<32x96xf32>
    %c0_5 = arith.constant 0 : index
    %c0_6 = arith.constant 0 : index
    %3 = vector.load %arg4[%c0_5, %c0_6] : memref<32x96xf32, #tpu.memory_space<vmem>>, vector<32x96xf32>
    %c0_7 = arith.constant 0 : index
    %c0_8 = arith.constant 0 : index
    %4 = vector.load %arg5[%c0_7, %c0_8] : memref<1x96xf32, #tpu.memory_space<vmem>>, vector<1x96xf32>
    %c0_9 = arith.constant 0 : index
    %c0_10 = arith.constant 0 : index
    %5 = vector.load %arg6[%c0_9, %c0_10] : memref<1x96xf32, #tpu.memory_space<vmem>>, vector<1x96xf32>
    %c0_11 = arith.constant 0 : index
    %c0_12 = arith.constant 0 : index
    %6 = vector.load %arg7[%c0_11, %c0_12] : memref<32x96xf32, #tpu.memory_space<vmem>>, vector<32x96xf32>
    %c0_13 = arith.constant 0 : index
    %c0_14 = arith.constant 0 : index
    %7 = vector.load %arg8[%c0_13, %c0_14] : memref<32x96xf32, #tpu.memory_space<vmem>>, vector<32x96xf32>
    %c0_15 = arith.constant 0 : index
    %c0_16 = arith.constant 0 : index
    %8 = vector.load %arg9[%c0_15, %c0_16] : memref<1x96xf32, #tpu.memory_space<vmem>>, vector<1x96xf32>
    %c0_17 = arith.constant 0 : index
    %c0_18 = arith.constant 0 : index
    %9 = vector.load %arg10[%c0_17, %c0_18] : memref<1x96xf32, #tpu.memory_space<vmem>>, vector<1x96xf32>
    %c0_19 = arith.constant 0 : index
    %c0_20 = arith.constant 0 : index
    %10 = vector.load %arg11[%c0_19, %c0_20] : memref<64x32xf32, #tpu.memory_space<vmem>>, vector<64x32xf32>
    %c0_21 = arith.constant 0 : index
    %c0_22 = arith.constant 0 : index
    %11 = vector.load %arg12[%c0_21, %c0_22] : memref<1x32xf32, #tpu.memory_space<vmem>>, vector<1x32xf32>
    %c0_23 = arith.constant 0 : index
    %c0_24 = arith.constant 0 : index
    %12 = vector.load %arg13[%c0_23, %c0_24] : memref<32x64xf32, #tpu.memory_space<vmem>>, vector<32x64xf32>
    %c0_25 = arith.constant 0 : index
    %c0_26 = arith.constant 0 : index
    %13 = vector.load %arg14[%c0_25, %c0_26] : memref<1x64xf32, #tpu.memory_space<vmem>>, vector<1x64xf32>
    %14 = tpu.iota {dimensions = array<i32: 1>} : vector<1x64xi32>
    %15 = tpu.iota {dimensions = array<i32: 0>} : vector<5x1xi32>
    %c0_27 = arith.constant 0 : index
    %c0_28 = arith.constant 0 : index
    %16 = vector.load %arg2[%c0_27, %c0_28] : memref<2x32xf32, #tpu.memory_space<vmem>>, vector<1x32xf32>
    %c1 = arith.constant 1 : index
    %c0_29 = arith.constant 0 : index
    %17 = vector.load %arg2[%c1, %c0_29] : memref<2x32xf32, #tpu.memory_space<vmem>>, vector<1x32xf32>
    %c1_30 = arith.constant 1 : index
    %c0_31 = arith.constant 0 : index
    %18 = vector.load %arg0[%c1_30, %c0_31] : memref<64x32xf32, #tpu.memory_space<vmem>>, vector<1x32xf32>
    %c0_i32 = arith.constant 0 : i32
    %19 = vector.broadcast %c0_i32 : i32 to vector<5x1xi32>
    %cst = arith.constant 0.000000e+00 : f32
    %20 = vector.broadcast %cst : f32 to vector<5x1xf32>
    %c0_i32_32 = arith.constant 0 : i32
    %c5_i32 = arith.constant 5 : i32
    %21 = arith.addi %c0_i32_32, %c5_i32 : i32
    %c1_i32 = arith.constant 1 : i32
    %22:5 = scf.for %arg17 = %c0_i32_32 to %21 step %c1_i32 iter_args(%arg18 = %16, %arg19 = %17, %arg20 = %18, %arg21 = %19, %arg22 = %20) -> (vector<1x32xf32>, vector<1x32xf32>, vector<1x32xf32>, vector<5x1xi32>, vector<5x1xf32>)  : i32 {
      %cst_38 = arith.constant dense<0.000000e+00> : vector<1x96xf32>
      %25 = tpu.matmul %arg20, %2, %cst_38 {dimension_numbers = #tpu.dot_dimension_numbers<[1], [0], [0], [1], [0, 0, 1, 1], [], []>} : vector<1x32xf32>, vector<32x96xf32>, vector<1x96xf32> -> vector<1x96xf32>
      %26 = arith.addf %25, %4 : vector<1x96xf32>
      %cst_39 = arith.constant dense<0.000000e+00> : vector<1x96xf32>
      %27 = tpu.matmul %arg18, %3, %cst_39 {dimension_numbers = #tpu.dot_dimension_numbers<[1], [0], [0], [1], [0, 0, 1, 1], [], []>} : vector<1x32xf32>, vector<32x96xf32>, vector<1x96xf32> -> vector<1x96xf32>
      %28 = arith.addf %27, %5 : vector<1x96xf32>
      %29 = vector.extract_strided_slice %26 {offsets = [0, 0], sizes = [1, 32], strides = [1, 1]} : vector<1x96xf32> to vector<1x32xf32>
      %30 = vector.extract_strided_slice %28 {offsets = [0, 0], sizes = [1, 32], strides = [1, 1]} : vector<1x96xf32> to vector<1x32xf32>
      %31 = arith.addf %29, %30 : vector<1x32xf32>
      %32 = arith.negf %31 : vector<1x32xf32>
      %33 = math.exp %32 : vector<1x32xf32>
      %cst_40 = arith.constant 1.000000e+00 : f32
      %34 = vector.broadcast %cst_40 : f32 to vector<1x32xf32>
      %35 = arith.addf %34, %33 : vector<1x32xf32>
      %36 = arith.divf %34, %35 : vector<1x32xf32>
      %37 = vector.extract_strided_slice %26 {offsets = [0, 32], sizes = [1, 32], strides = [1, 1]} : vector<1x96xf32> to vector<1x32xf32>
      %38 = vector.extract_strided_slice %28 {offsets = [0, 32], sizes = [1, 32], strides = [1, 1]} : vector<1x96xf32> to vector<1x32xf32>
      %39 = arith.addf %37, %38 : vector<1x32xf32>
      %40 = arith.negf %39 : vector<1x32xf32>
      %41 = math.exp %40 : vector<1x32xf32>
      %cst_41 = arith.constant 1.000000e+00 : f32
      %42 = vector.broadcast %cst_41 : f32 to vector<1x32xf32>
      %43 = arith.addf %42, %41 : vector<1x32xf32>
      %44 = arith.divf %42, %43 : vector<1x32xf32>
      %45 = vector.extract_strided_slice %26 {offsets = [0, 64], sizes = [1, 32], strides = [1, 1]} : vector<1x96xf32> to vector<1x32xf32>
      %46 = vector.extract_strided_slice %28 {offsets = [0, 64], sizes = [1, 32], strides = [1, 1]} : vector<1x96xf32> to vector<1x32xf32>
      %47 = arith.mulf %36, %46 : vector<1x32xf32>
      %48 = arith.addf %45, %47 : vector<1x32xf32>
      %49 = math.tanh %48 : vector<1x32xf32>
      %cst_42 = arith.constant 1.000000e+00 : f32
      %50 = vector.broadcast %cst_42 : f32 to vector<1x32xf32>
      %51 = arith.subf %50, %44 : vector<1x32xf32>
      %52 = arith.mulf %51, %49 : vector<1x32xf32>
      %53 = arith.mulf %44, %arg18 : vector<1x32xf32>
      %54 = arith.addf %52, %53 : vector<1x32xf32>
      %cst_43 = arith.constant dense<0.000000e+00> : vector<1x96xf32>
      %55 = tpu.matmul %54, %6, %cst_43 {dimension_numbers = #tpu.dot_dimension_numbers<[1], [0], [0], [1], [0, 0, 1, 1], [], []>} : vector<1x32xf32>, vector<32x96xf32>, vector<1x96xf32> -> vector<1x96xf32>
      %56 = arith.addf %55, %8 : vector<1x96xf32>
      %cst_44 = arith.constant dense<0.000000e+00> : vector<1x96xf32>
      %57 = tpu.matmul %arg19, %7, %cst_44 {dimension_numbers = #tpu.dot_dimension_numbers<[1], [0], [0], [1], [0, 0, 1, 1], [], []>} : vector<1x32xf32>, vector<32x96xf32>, vector<1x96xf32> -> vector<1x96xf32>
      %58 = arith.addf %57, %9 : vector<1x96xf32>
      %59 = vector.extract_strided_slice %56 {offsets = [0, 0], sizes = [1, 32], strides = [1, 1]} : vector<1x96xf32> to vector<1x32xf32>
      %60 = vector.extract_strided_slice %58 {offsets = [0, 0], sizes = [1, 32], strides = [1, 1]} : vector<1x96xf32> to vector<1x32xf32>
      %61 = arith.addf %59, %60 : vector<1x32xf32>
      %62 = arith.negf %61 : vector<1x32xf32>
      %63 = math.exp %62 : vector<1x32xf32>
      %cst_45 = arith.constant 1.000000e+00 : f32
      %64 = vector.broadcast %cst_45 : f32 to vector<1x32xf32>
      %65 = arith.addf %64, %63 : vector<1x32xf32>
      %66 = arith.divf %64, %65 : vector<1x32xf32>
      %67 = vector.extract_strided_slice %56 {offsets = [0, 32], sizes = [1, 32], strides = [1, 1]} : vector<1x96xf32> to vector<1x32xf32>
      %68 = vector.extract_strided_slice %58 {offsets = [0, 32], sizes = [1, 32], strides = [1, 1]} : vector<1x96xf32> to vector<1x32xf32>
      %69 = arith.addf %67, %68 : vector<1x32xf32>
      %70 = arith.negf %69 : vector<1x32xf32>
      %71 = math.exp %70 : vector<1x32xf32>
      %cst_46 = arith.constant 1.000000e+00 : f32
      %72 = vector.broadcast %cst_46 : f32 to vector<1x32xf32>
      %73 = arith.addf %72, %71 : vector<1x32xf32>
      %74 = arith.divf %72, %73 : vector<1x32xf32>
      %75 = vector.extract_strided_slice %56 {offsets = [0, 64], sizes = [1, 32], strides = [1, 1]} : vector<1x96xf32> to vector<1x32xf32>
      %76 = vector.extract_strided_slice %58 {offsets = [0, 64], sizes = [1, 32], strides = [1, 1]} : vector<1x96xf32> to vector<1x32xf32>
      %77 = arith.mulf %66, %76 : vector<1x32xf32>
      %78 = arith.addf %75, %77 : vector<1x32xf32>
      %79 = math.tanh %78 : vector<1x32xf32>
      %cst_47 = arith.constant 1.000000e+00 : f32
      %80 = vector.broadcast %cst_47 : f32 to vector<1x32xf32>
      %81 = arith.subf %80, %74 : vector<1x32xf32>
      %82 = arith.mulf %81, %79 : vector<1x32xf32>
      %83 = arith.mulf %74, %arg19 : vector<1x32xf32>
      %84 = arith.addf %82, %83 : vector<1x32xf32>
      %cst_48 = arith.constant dense<0.000000e+00> : vector<1x8xf32>
      %85 = tpu.matmul %84, %1, %cst_48 {dimension_numbers = #tpu.dot_dimension_numbers<[1], [1], [0], [0], [0, 0, 1, 0], [], []>} : vector<1x32xf32>, vector<8x32xf32>, vector<1x8xf32> -> vector<1x8xf32>
      %cst_49 = arith.constant dense<0xFF800000> : vector<1xf32>
      %86 = vector.multi_reduction <maximumf>, %85, %cst_49 [1] : vector<1x8xf32> to vector<1xf32>
      %87 = vector.shape_cast %86 : vector<1xf32> to vector<1x1xf32>
      %88 = vector.broadcast %87 : vector<1x1xf32> to vector<1x8xf32>
      %89 = arith.subf %85, %88 : vector<1x8xf32>
      %90 = math.exp %89 : vector<1x8xf32>
      %cst_50 = arith.constant dense<0.000000e+00> : vector<1xf32>
      %91 = vector.multi_reduction <add>, %90, %cst_50 [1] : vector<1x8xf32> to vector<1xf32>
      %92 = vector.shape_cast %91 : vector<1xf32> to vector<1x1xf32>
      %93 = tpu.reciprocal %92 {approx = true} : vector<1x1xf32> -> vector<1x1xf32>
      %94 = vector.broadcast %93 : vector<1x1xf32> to vector<1x8xf32>
      %95 = arith.mulf %90, %94 : vector<1x8xf32>
      %cst_51 = arith.constant dense<0.000000e+00> : vector<1x32xf32>
      %96 = tpu.matmul %95, %1, %cst_51 {dimension_numbers = #tpu.dot_dimension_numbers<[1], [0], [0], [1], [0, 0, 1, 1], [], []>} : vector<1x8xf32>, vector<8x32xf32>, vector<1x32xf32> -> vector<1x32xf32>
      %97 = vector.extract_strided_slice %10 {offsets = [0, 0], sizes = [32, 32], strides = [1, 1]} : vector<64x32xf32> to vector<32x32xf32>
      %cst_52 = arith.constant dense<0.000000e+00> : vector<1x32xf32>
      %98 = tpu.matmul %84, %97, %cst_52 {dimension_numbers = #tpu.dot_dimension_numbers<[1], [0], [0], [1], [0, 0, 1, 1], [], []>} : vector<1x32xf32>, vector<32x32xf32>, vector<1x32xf32> -> vector<1x32xf32>
      %99 = vector.extract_strided_slice %10 {offsets = [32, 0], sizes = [32, 32], strides = [1, 1]} : vector<64x32xf32> to vector<32x32xf32>
      %cst_53 = arith.constant dense<0.000000e+00> : vector<1x32xf32>
      %100 = tpu.matmul %96, %99, %cst_53 {dimension_numbers = #tpu.dot_dimension_numbers<[1], [0], [0], [1], [0, 0, 1, 1], [], []>} : vector<1x32xf32>, vector<32x32xf32>, vector<1x32xf32> -> vector<1x32xf32>
      %101 = arith.addf %98, %100 : vector<1x32xf32>
      %102 = arith.addf %101, %11 : vector<1x32xf32>
      %103 = math.tanh %102 : vector<1x32xf32>
      %cst_54 = arith.constant dense<0.000000e+00> : vector<1x64xf32>
      %104 = tpu.matmul %103, %12, %cst_54 {dimension_numbers = #tpu.dot_dimension_numbers<[1], [0], [0], [1], [0, 0, 1, 1], [], []>} : vector<1x32xf32>, vector<32x64xf32>, vector<1x64xf32> -> vector<1x64xf32>
      %105 = arith.addf %104, %13 : vector<1x64xf32>
      %cst_55 = arith.constant dense<0xFF800000> : vector<1xf32>
      %106 = vector.multi_reduction <maximumf>, %105, %cst_55 [1] : vector<1x64xf32> to vector<1xf32>
      %107 = vector.shape_cast %106 : vector<1xf32> to vector<1x1xf32>
      %108 = vector.broadcast %107 : vector<1x1xf32> to vector<1x64xf32>
      %109 = arith.cmpf oeq, %105, %108 : vector<1x64xf32>
      %c64_i32 = arith.constant 64 : i32
      %110 = vector.broadcast %c64_i32 : i32 to vector<1x64xi32>
      %111 = arith.select %109, %14, %110 : vector<1x64xi1>, vector<1x64xi32>
      %cst_56 = arith.constant dense<2147483647> : vector<1xi32>
      %112 = vector.multi_reduction <minsi>, %111, %cst_56 [1] : vector<1x64xi32> to vector<1xi32>
      %113 = vector.shape_cast %112 : vector<1xi32> to vector<1x1xi32>
      %114 = vector.broadcast %107 : vector<1x1xf32> to vector<1x64xf32>
      %115 = arith.subf %105, %114 : vector<1x64xf32>
      %116 = math.exp %115 : vector<1x64xf32>
      %cst_57 = arith.constant dense<0.000000e+00> : vector<1xf32>
      %117 = vector.multi_reduction <add>, %116, %cst_57 [1] : vector<1x64xf32> to vector<1xf32>
      %118 = vector.shape_cast %117 : vector<1xf32> to vector<1x1xf32>
      %119 = tpu.reciprocal %118 {approx = true} : vector<1x1xf32> -> vector<1x1xf32>
      %120 = vector.broadcast %arg17 : i32 to vector<5x1xi32>
      %121 = arith.cmpi eq, %15, %120 : vector<5x1xi32>
      %122 = vector.shape_cast %113 : vector<1x1xi32> to vector<1x1xi32>
      %123 = vector.broadcast %122 : vector<1x1xi32> to vector<5x1xi32>
      %124 = arith.select %121, %123, %arg21 : vector<5x1xi1>, vector<5x1xi32>
      %125 = vector.shape_cast %119 : vector<1x1xf32> to vector<1x1xf32>
      %126 = vector.broadcast %125 : vector<1x1xf32> to vector<5x1xf32>
      %127 = arith.select %121, %126, %arg22 : vector<5x1xi1>, vector<5x1xf32>
      %128 = vector.broadcast %113 : vector<1x1xi32> to vector<1x64xi32>
      %129 = arith.cmpi eq, %14, %128 : vector<1x64xi32>
      %130 = arith.extui %129 : vector<1x64xi1> to vector<1x64xi32>
      %131 = arith.sitofp %130 : vector<1x64xi32> to vector<1x64xf32>
      %cst_58 = arith.constant dense<0.000000e+00> : vector<1x32xf32>
      %132 = tpu.matmul %131, %0, %cst_58 {dimension_numbers = #tpu.dot_dimension_numbers<[1], [0], [0], [1], [0, 0, 1, 1], [], []>} : vector<1x64xf32>, vector<64x32xf32>, vector<1x32xf32> -> vector<1x32xf32>
      scf.yield %54, %84, %132, %124, %127 : vector<1x32xf32>, vector<1x32xf32>, vector<1x32xf32>, vector<5x1xi32>, vector<5x1xf32>
    }
    %c5_i32_33 = arith.constant 5 : i32
    %c0_34 = arith.constant 0 : index
    %c0_35 = arith.constant 0 : index
    %23 = vector.load %arg15[%c0_34, %c0_35] : memref<5x1xi32, #tpu.memory_space<vmem>>, vector<5x1xi32>
    tpu.vector_store %arg15[%c0_34, %c0_35], %22#3 {strides = array<i32>} : memref<5x1xi32, #tpu.memory_space<vmem>>, vector<5x1xi32>,
    %c0_36 = arith.constant 0 : index
    %c0_37 = arith.constant 0 : index
    %24 = vector.load %arg16[%c0_36, %c0_37] : memref<5x1xf32, #tpu.memory_space<vmem>>, vector<5x1xf32>
    tpu.vector_store %arg16[%c0_36, %c0_37], %22#4 {strides = array<i32>} : memref<5x1xf32, #tpu.memory_space<vmem>>, vector<5x1xf32>,
    return
  }
}

</mosaic_0001>

<bundles_post_ra>
// kernel: greedy_decode.3
= control target key start
LH: loop header
LB: loop body
LE: loop exit
PB: predicated region body
PF: predicated region fallthrough
CT: control target
= control target key end

     0   :  { %v95_v0 = vlaneseq  ;;  %v1663_v49 = vmov 0.0   ;;  %v1665_v50 = vmov 0   ;;  %s1833_s0 = inlined_call_operand.vmem [shape: f32[64,32], index: 0, kind: input, shape index: {}]   ;;  %s1834_s1 = inlined_call_operand.vmem [shape: f32[8,32], index: 1, kind: input, shape index: {}]   ;;  %s1835_s15 = inlined_call_operand.vmem [shape: s32[5,1], index: 15, kind: output, shape index: {0}]   ;;  %s1836_s16 = inlined_call_operand.vmem [shape: f32[5,1], index: 16, kind: output, shape index: {1}]   ;;  %s1837_s3 = inlined_call_operand.vmem [shape: f32[32,96], index: 3, kind: input, shape index: {}]   ;;  %s1838_s4 = inlined_call_operand.vmem [shape: f32[32,96], index: 4, kind: input, shape index: {}]   ;;  %s1839_s5 = inlined_call_operand.vmem [shape: f32[1,96], index: 5, kind: input, shape index: {}]   ;;  %s1840_s6 = inlined_call_operand.vmem [shape: f32[1,96], index: 6, kind: input, shape index: {}]   ;;  %s1841_s7 = inlined_call_operand.vmem [shape: f32[32,96], index: 7, kind: input, shape index: {}]   ;;  %s1842_s8 = inlined_call_operand.vmem [shape: f32[32,96], index: 8, kind: input, shape index: {}]   ;;  %s1843_s9 = inlined_call_operand.vmem [shape: f32[1,96], index: 9, kind: input, shape index: {}]   ;;  %s1844_s10 = inlined_call_operand.vmem [shape: f32[1,96], index: 10, kind: input, shape index: {}]   ;;  %s1845_s11 = inlined_call_operand.vmem [shape: f32[64,32], index: 11, kind: input, shape index: {}]   ;;  %s1846_s12 = inlined_call_operand.vmem [shape: f32[1,32], index: 12, kind: input, shape index: {}]   ;;  %s1847_s13 = inlined_call_operand.vmem [shape: f32[32,64], index: 13, kind: input, shape index: {}]   ;;  %s1848_s2 = inlined_call_operand.vmem [shape: f32[2,32], index: 2, kind: input, shape index: {}]   ;;  %s1849_s14 = inlined_call_operand.vmem [shape: f32[1,64], index: 14, kind: input, shape index: {}]  }
   0x1   :  { %1855 = sst [smem:[#allocation3_spill]] %s1833_s0  ;;  %v1482_v11 = vld [vmem:[%s1834_s1] sm:$0xff]  ;;  %v1492_v13 = vld [vmem:[%s1837_s3 + $0x8] sm:$0xff]  ;;  %v1497_v14 = vld [vmem:[%s1837_s3 + $0x10] sm:$0xff] }
   0x2   :  { %s1856_s23 = sld [smem:[#allocation3_spill]]  ;;  %v1465_v7 = vand.u32 127, %v95_v0  ;;  %v1467_v8 = vshrl.u32 %v95_v0, 7  ;;  %v1487_v12 = vld [vmem:[%s1837_s3] sm:$0xff]  ;;  %v1502_v15 = vld [vmem:[%s1837_s3 + $0x18] sm:$0xff]  ;;  %v1512_v17 = vld [vmem:[%s1838_s4 + $0x8] sm:$0xff] }
   0x3   :  { %v1507_v16 = vld [vmem:[%s1838_s4] sm:$0xff]  ;;  %v1517_v18 = vld [vmem:[%s1838_s4 + $0x10] sm:$0xff]  ;;  %v1522_v19 = vld [vmem:[%s1838_s4 + $0x18] sm:$0xff] }
   0x4   :  { %v1527_v20 = vld [vmem:[%s1839_s5] sm:$0x1]  ;;  %v1542_v23 = vld [vmem:[%s1841_s7 + $0x8] sm:$0xff]  ;;  %v1547_v24 = vld [vmem:[%s1841_s7 + $0x10] sm:$0xff] }
   0x5   :  { %v1532_v21 = vld [vmem:[%s1840_s6] sm:$0x1]  ;;  %v1552_v25 = vld [vmem:[%s1841_s7 + $0x18] sm:$0xff]  ;;  %v1562_v27 = vld [vmem:[%s1842_s8 + $0x8] sm:$0xff] }
   0x6   :  { %v1537_v22 = vld [vmem:[%s1841_s7] sm:$0xff]  ;;  %v1567_v28 = vld [vmem:[%s1842_s8 + $0x10] sm:$0xff]  ;;  %v1572_v29 = vld [vmem:[%s1842_s8 + $0x18] sm:$0xff] }
   0x7   :  { %v1557_v26 = vld [vmem:[%s1842_s8] sm:$0xff]  ;;  %v1592_v33 = vld [vmem:[%s1845_s11 + $0x8] sm:$0xff]  ;;  %v1597_v34 = vld [vmem:[%s1845_s11 + $0x10] sm:$0xff] }
   0x8   :  { %v1438_v1 = vld [vmem:[%s1856_s23] sm:$0xff]  ;;  %v1443_v2 = vld [vmem:[%s1856_s23 + $0x8] sm:$0xff]  ;;  %v1448_v3 = vld [vmem:[%s1856_s23 + $0x10] sm:$0xff] }
   0x9   :  { %1857 = vst [vmem:[#allocation2_spill] sm:$0xff] %v1438_v1  ;;  %v1453_v4 = vld [vmem:[%s1856_s23 + $0x18] sm:$0xff]  ;;  %v1458_v5 = vld [vmem:[%s1856_s23 + $0x20] sm:$0xff]  ;;  %v1463_v6 = vld [vmem:[%s1856_s23 + $0x28] sm:$0xff] }
   0xa   :  { %v1472_v9 = vld [vmem:[%s1856_s23 + $0x30] sm:$0xff]  ;;  %v1477_v10 = vld [vmem:[%s1856_s23 + $0x38] sm:$0xff]  ;;  %v1577_v30 = vld [vmem:[%s1843_s9] sm:$0x1] }
   0xb   :  { %v1582_v31 = vld [vmem:[%s1844_s10] sm:$0x1]  ;;  %v1602_v35 = vld [vmem:[%s1845_s11 + $0x18] sm:$0xff]  ;;  %v1612_v37 = vld [vmem:[%s1845_s11 + $0x28] sm:$0xff] }
   0xc   :  { %v1587_v32 = vld [vmem:[%s1845_s11] sm:$0xff]  ;;  %v1617_v38 = vld [vmem:[%s1845_s11 + $0x30] sm:$0xff]  ;;  %v1622_v39 = vld [vmem:[%s1845_s11 + $0x38] sm:$0xff] }
   0xd   :  { %v1607_v36 = vld [vmem:[%s1845_s11 + $0x20] sm:$0xff]  ;;  %v1637_v42 = vld [vmem:[%s1847_s13 + $0x8] sm:$0xff]  ;;  %v1642_v43 = vld [vmem:[%s1847_s13 + $0x10] sm:$0xff] }
   0xe   :  { %v1627_v40 = vld [vmem:[%s1846_s12] sm:$0x1]  ;;  %v1647_v44 = vld [vmem:[%s1847_s13 + $0x18] sm:$0xff]  ;;  %v100_v47 = vld [vmem:[%s1848_s2 + $0x1] sm:$0x1]  }
   0xf   :  { %v1632_v41 = vld [vmem:[%s1847_s13] sm:$0xff]  ;;  %s1673_s13 = smov 0  }
  0x10   :  { %v1652_v45 = vld [vmem:[%s1849_s14] sm:$0x1]  ;;  %v101_v48 = vld [vmem:[%s1856_s23 + $0x1] sm:$0x1]  }
  0x11   :  { %v99_v46 = vld [vmem:[%s1848_s2] sm:$0x1]  }
  0x12 LB: > { %v1167_v51 = vpack.c.bf16 %v1492_v13, %v1487_v12  ;;  %v1173_v52 = vpack.c.bf16 %v1512_v17, %v1507_v16  ;;  %v1853_v53 = vmov 0.0|0.0   ;;  %v1170_v54 = vpack.c.bf16 %v1502_v15, %v1497_v14  ;;  %s1347_s2 = smov 64   ;;  %s1348_s14 = smov 96   ;;  %v1860_v1 = vld [vmem:[#allocation2_spill] sm:$0xff]  ;;  %s1342_s13 = sphi %s1673_s13, %s107_s13   ;;  %v1338_v46 = vphi %v99_v46, %v1738_v46   ;;  %v1334_v47 = vphi %v100_v47, %v1759_v47   ;;  %v1330_v48 = vphi %v101_v48, %v961_v48   ;;  %v1326_v50 = vphi %v1665_v50, %v1862_v50   ;;  %v1322_v49 = vphi %v1663_v49, %v1861_v49  }
  0x13   : > { %1166 = vmatprep.subr.bf16.mxu0 %v1853_v53  ;;  %1172 = vmatprep.subr.bf16.mxu1 %v1853_v53  ;;  %v1176_v55 = vpack.c.bf16 %v1522_v19, %v1517_v18  ;;  %vm1345_vm0 = vmmov 0   ;;  %v1851_v56 = vmov 0.0   ;;  %vm113_vm1 = vcmask 261120   ;;  %s1349_s23 = smov 32  }
  0x14   : > { %1168 = vmatpush3.bf16.msra.mxu0 %v1167_v51  ;;  %1174 = vmatpush3.bf16.msra.mxu1 %v1173_v52  ;;  %vm544_vm2 = vcmask 57344   ;;  %vm556_vm3 = vcmask 64512   ;;  %vm848_vm4 = vcmask 516096   ;;  %vm891_vm8 = vcmask 523264  }
  0x15   : > { %1169 = vmatprep.subr.bf16.mxu0 %v1853_v53  ;;  %1175 = vmatprep.subr.bf16.mxu1 %v1853_v53 }
  0x16   : > { %1068 = vmatprep.mubr.msk.f32.mxu0 %vm1345_vm0, %v1851_v56  ;;  %1079 = vmatprep.mubr.msk.f32.mxu1 %vm1345_vm0, %v1851_v56 }
  0x18   : > { %1171 = vmatpush3.bf16.msra.mxu0 %v1170_v54  ;;  %1177 = vmatpush3.bf16.msra.mxu1 %v1176_v55 }
  0x19   : > { %1184 = vmatprep.subr.bf16.mxu1 %v1853_v53  ;;  %1178 = vmatprep.subr.bf16.mxu0 %v1853_v53 }
  0x1b   : > { %1069 = vmatmul.mubr.msk.f32.vlgmr.msra.gmra.mrb[0].mxu0 %vm113_vm1, %v1330_v48  ;;  %1080 = vmatmul.mubr.msk.f32.vlgmr.msra.gmra.mrb[0].mxu1 %vm113_vm1, %v1338_v46 }
  0x1c   : > { %1101 = vmatprep.mubr.msk.f32.mxu1 %vm1345_vm0, %v1851_v56  ;;  %1090 = vmatprep.mubr.msk.f32.mxu0 %vm1345_vm0, %v1851_v56 }
  0xee   : > { %v183_v57 = vpop.f32.mrb[0].mxu0  ;;  %v256_v58 = vpop.f32.mrb[0].mxu1 }
  0xef   : > { %v257_v59 = vadd.f32 %v256_v58, %v1532_v21  ;;  %v1081_v60 = vpop.f32.mrb[1].mxu1  ;;  %v1070_v61 = vpop.f32.mrb[1].mxu0  ;;  %v184_v62 = vadd.f32 %v183_v57, %v1527_v20  ;;  %v1179_v57 = vpack.c.bf16 %v1542_v23, %v1537_v22 }
  0xf0   : > { %v1185_v60 = vpack.c.bf16 %v1562_v27, %v1557_v26  ;;  %v1182_v61 = vpack.c.bf16 %v1552_v25, %v1547_v24 }
  0xf1   : > { %268 = vrot.lane.b32.xlu0 %v257_v59, %s1347_s2  ;;  %v260_v63 = vadd.f32 %v257_v59, %v184_v62  ;;  %v1188_v59 = vpack.c.bf16 %v1572_v29, %v1567_v28  ;;  %1180 = vmatpush3.bf16.msra.mxu0 %v1179_v57 }
  0xf2   : > { %1186 = vmatpush3.bf16.msra.mxu1 %v1185_v60  ;;  %1181 = vmatprep.subr.bf16.mxu0 %v1853_v53 }
  0xf3   : > { %v1000_v0 = vmul.f32 -1.442695, %v260_v63  ;;  %1187 = vmatprep.subr.bf16.mxu1 %v1853_v53 }
  0xf5   : > { %1274 = vpow2.f32 %v1000_v0  ;;  %1183 = vmatpush3.bf16.msra.mxu0 %v1182_v61 }
  0xf6   : > { %1189 = vmatpush3.bf16.msra.mxu1 %v1188_v59 }
  0xf7   : > { %1196 = vmatprep.subr.bf16.mxu1 %v1853_v53 }
  0xf9   : > { %1102 = vmatmul.mubr.msk.f32.vlgmr.msra.gmra.mrb[2].mxu1 %vm113_vm1, %v1334_v47 }
  0xff   : > { %v1275_v48 = vpop.eup %1274 }
 0x100   : > { %v264_v51 = vadd.f32 1.0, %v1275_v48 }
 0x102   : > { %1276 = vrcp.f32 %v264_v51 }
 0x10c   : > { %v1277_v52 = vpop.eup %1276 }
 0x10d   : > { %v278_v0 = vsub.f32 1.0, %v1277_v52 }
 0x163   : > { %v269_v54 = vpop.permute.xlu0 %268 }
 0x164   : > { %v271_v55 = vmul.f32 %v1277_v52, %v269_v54 }
 0x166   : > { %273 = vrot.lane.b32.xlu0 %v271_v55, %s1347_s2 }
 0x1d8   : > { %v274_v56 = vpop.permute.xlu0 %273 }
 0x1d9   : > { %v276_v58 = vadd.f32 %v274_v56, %v184_v62  ;;  %v1858_v62 = vmov 0.0  }
 0x1da   : > { %1104 = vmatprep.subr.mxu0 %v1858_v62  ;;  %1133 = vmatprep.mubr.msk.f32.mxu1 %vm1345_vm0, %v1858_v62 }
 0x1db   : > { %1278 = vtanh.f32 %v276_v58  ;;  %v433_v58 = vpop.f32.mrb[2].mxu1 }
 0x1dc   : > { %v434_v60 = vadd.f32 %v433_v58, %v1582_v31  ;;  %v1103_v57 = vpop.f32.mrb[3].mxu1 }
 0x1e5   : > { %v1279_v56 = vpop.eup %1278 }
 0x1e6   : > { %280 = vrot.lane.b32.xlu1 %v1279_v56, %s1348_s14 }
 0x1ea   : > { %284 = vrot.lane.b32.xlu1 %v1338_v46, %s1349_s23 }
 0x1ee   : > { %445 = vrot.lane.b32.xlu1 %v434_v60, %s1347_s2 }
 0x258   : > { %v281_v63 = vpop.permute.xlu1 %280 }
 0x259   : > { %v283_v51 = vmul.f32 %v281_v63, %v278_v0 }
 0x25c   : > { %v285_v48 = vpop.permute.xlu1 %284 }
 0x25d   : > { %v287_v54 = vmul.f32 %v1277_v52, %v285_v48 }
 0x25f   : > { %v288_v55 = vadd.f32 %v287_v54, %v283_v51 }
 0x260   : > { %v446_v51 = vpop.permute.xlu1 %445 }
 0x261   : > { %290 = vrot.lane.b32.xlu0 %v288_v55, %s1348_s14 }
 0x2d3   : > { %v1738_v46 = vpop.permute.xlu0 %290  }
 0x2d4   : > { %1091 = vmatmul.mubr.msk.f32.vlgmr.msra.gmra.mrb[2].mxu0 %vm113_vm1, %v1738_v46 }
 0x2d5   : > { %1105 = vmatpush3.xpose.msk.msra.mxu0 %vm113_vm1, %v1482_v11  ;;  %1106 = vmatprep.mubr.msk.f32.mxu0 %vm1345_vm0, %v1858_v62 }
 0x2d6   : > { %1109 = vmatprep.subr.mxu0 %v1858_v62 }
 0x3a7   : > { %v360_v52 = vpop.f32.mrb[2].mxu0 }
 0x3a8   : > { %v361_v59 = vadd.f32 %v360_v52, %v1577_v30  ;;  %v1092_v61 = vpop.f32.mrb[3].mxu0  ;;  %v1197_v52 = vpack.c.bf16 %v1592_v33, %v1587_v32 }
 0x3aa   : > { %v437_v56 = vadd.f32 %v434_v60, %v361_v59  ;;  %1198 = vmatpush3.bf16.msra.mxu1 %v1197_v52  ;;  %v1200_v60 = vpack.c.bf16 %v1602_v35, %v1597_v34 }
 0x3ab   : > { %1199 = vmatprep.subr.bf16.mxu1 %v1853_v53 }
 0x3ac   : > { %v1003_v63 = vmul.f32 -1.442695, %v437_v56 }
 0x3ae   : > { %1280 = vpow2.f32 %v1003_v63  ;;  %1201 = vmatpush3.bf16.msra.mxu1 %v1200_v60 }
 0x3af   : > { %1208 = vmatprep.subr.bf16.mxu1 %v1853_v53 }
 0x3b8   : > { %v1281_v0 = vpop.eup %1280 }
 0x3b9   : > { %v441_v48 = vadd.f32 1.0, %v1281_v0 }
 0x3bb   : > { %1282 = vrcp.f32 %v441_v48 }
 0x3c5   : > { %v1283_v54 = vpop.eup %1282 }
 0x3c6   : > { %v448_v55 = vmul.f32 %v1283_v54, %v446_v51 }
 0x3c8   : > { %450 = vrot.lane.b32.xlu0 %v448_v55, %s1347_s2 }
 0x3cc   : > { %461 = vrot.lane.b32.xlu0 %v1334_v47, %s1349_s23  ;;  %v455_v47 = vsub.f32 1.0, %v1283_v54 }
 0x43a   : > { %v451_v58 = vpop.permute.xlu0 %450 }
 0x43b   : > { %v453_v57 = vadd.f32 %v451_v58, %v361_v59 }
 0x43d   : > { %1284 = vtanh.f32 %v453_v57 }
 0x43e   : > { %v462_v56 = vpop.permute.xlu0 %461 }
 0x43f   : > { %v464_v59 = vmul.f32 %v1283_v54, %v462_v56 }
 0x447   : > { %v1285_v61 = vpop.eup %1284 }
 0x448   : > { %457 = vrot.lane.b32.xlu1 %v1285_v61, %s1348_s14 }
 0x4ba   : > { %v458_v63 = vpop.permute.xlu1 %457 }
 0x4bb   : > { %v460_v0 = vmul.f32 %v458_v63, %v455_v47 }
 0x4bd   : > { %v465_v48 = vadd.f32 %v464_v59, %v460_v0 }
 0x4bf   : > { %467 = vrot.lane.b32.xlu1 %v465_v48, %s1348_s14  ;;  %v1191_v48 = vpack.c.bf16 %v1612_v37, %v1607_v36 }
 0x531   : > { %v1759_v47 = vpop.permute.xlu1 %467  }
 0x532   : > { %1107 = vmatmul.mubr.msk.f32.vlgmr.msra.gmra.mrb[4].mxu0 %vm113_vm1, %v1759_v47  ;;  %1134 = vmatmul.mubr.msk.f32.vlgmr.msra.gmra.mrb[4].mxu1 %vm113_vm1, %v1759_v47 }
 0x533   : > { %1110 = vmatpush3.msra.mxu0 %v1482_v11  ;;  %1111 = vmatprep.mubr.msk.f32.mxu0 %vm1345_vm0, %v1858_v62 }
 0x534   : > { %1190 = vmatprep.subr.bf16.mxu0 %v1853_v53  ;;  %1163 = vmatprep.mubr.msk.f32.mxu1 %vm1345_vm0, %v1858_v62 }
 0x605   : > { %v540_v51 = vpop.f32.mrb[4].mxu0  ;;  %v769_v54 = vpop.f32.mrb[4].mxu1 }
 0x606   : > { %v1108_v55 = vpop.f32.mrb[5].mxu0  ;;  %v1135_v58 = vpop.f32.mrb[5].mxu1  ;;  %v545_v57 = vsel %vm544_vm2, %v540_v51, -inf }
 0x607   : > { %546 = vmax.xlane.f32.xlu0 %v545_v57  ;;  %v1194_v55 = vpack.c.bf16 %v1622_v39, %v1617_v38 }
 0x694   : > { %v547_v52 = vpop.xlane.xlu0 %546 }
 0x695   : > { %v548_v60 = vsub.f32 %v540_v51, %v547_v52  ;;  %v1859_v51 = vmov 0.0|0.0   ;;  %v1206_v52 = vpack.c.bf16 %v1647_v44, %v1642_v43 }
 0x697   : > { %v549_v61 = vmul.f32 1.442695, %v548_v60 }
 0x699   : > { %1286 = vpow2.f32 %v549_v61 }
 0x6a3   : > { %v1287_v56 = vpop.eup %1286 }
 0x6a4   : > { %v551_v63 = vsel %vm544_vm2, %v1287_v56, 0.0 }
 0x6a5   : > { %552 = vadd.xlane.f32.xlu1 %v551_v63 }
 0x732   : > { %v553_v59 = vpop.xlane.xlu1 %552 }
 0x733   : > { %1288 = vrcp.f32 %v553_v59 }
 0x73d   : > { %v1289_v0 = vpop.eup %1288 }
 0x73e   : > { %v555_v53 = vmul.f32 %v1289_v0, %v1287_v56 }
 0x740   : > { %1112 = vmatmul.mubr.msk.f32.vlgmr.msra.gmra.mrb[6].mxu0 %vm556_vm3, %v555_v53  ;;  %v1203_v53 = vpack.c.bf16 %v1637_v42, %v1632_v41 }
 0x741   : > { %1192 = vmatpush3.bf16.msra.mxu0 %v1191_v48  ;;  %1122 = vmatprep.mubr.msk.f32.mxu0 %vm1345_vm0, %v1858_v62 }
 0x742   : > { %1193 = vmatprep.subr.bf16.mxu0 %v1859_v51 }
 0x745   : > { %1195 = vmatpush3.bf16.msra.mxu0 %v1194_v55 }
 0x746   : > { %1202 = vmatprep.subr.bf16.mxu0 %v1859_v51 }
 0x813   : > { %v626_v58 = vpop.f32.mrb[6].mxu0 }
 0x814   : > { %v1113_v57 = vpop.f32.mrb[7].mxu0  ;;  %1123 = vmatmul.mubr.msk.f32.vlgmr.msra.gmra.mrb[8].mxu0 %vm113_vm1, %v626_v58 }
 0x815   : > { %1144 = vmatprep.mubr.msk.f32.mxu0 %vm1345_vm0, %v1858_v62  ;;  %1204 = vmatpush3.bf16.msra.mxu0 %v1203_v53 }
 0x816   : > { %1205 = vmatprep.subr.bf16.mxu0 %v1859_v51 }
 0x819   : > { %1207 = vmatpush3.bf16.msra.mxu0 %v1206_v52 }
 0x8e7   : > { %v699_v60 = vpop.f32.mrb[8].mxu0 }
 0x8e8   : > { %v770_v61 = vadd.f32 %v769_v54, %v699_v60  ;;  %v1124_v56 = vpop.f32.mrb[9].mxu0 }
 0x8ea   : > { %v773_v63 = vadd.f32 %v770_v61, %v1627_v40 }
 0x8ec   : > { %1290 = vtanh.f32 %v773_v63 }
 0x8f6   : > { %v1291_v59 = vpop.eup %1290 }
 0x8f7   : > { %1145 = vmatmul.mubr.msk.f32.vlgmr.msra.gmra.mrb[10].mxu0 %vm113_vm1, %v1291_v59 }
 0x9ca   : > { %v844_v0 = vpop.f32.mrb[10].mxu0 }
 0x9cb   : > { %v845_v48 = vadd.f32 %v844_v0, %v1652_v45  ;;  %v1146_v55 = vpop.f32.mrb[11].mxu0  ;;  %v1209_v0 = vpack.c.bf16 %v1443_v2, %v1860_v1 }
 0x9cc   : > { %v1215_v55 = vpack.c.bf16 %v1463_v6, %v1458_v5 }
 0x9cd   : > { %v849_v58 = vsel %vm848_vm4, %v845_v48, -inf  ;;  %1210 = vmatpush3.bf16.msra.mxu1 %v1209_v0 }
 0x9ce   : > { %850 = vmax.xlane.f32.xlu0 %v849_v58  ;;  %1211 = vmatprep.subr.bf16.mxu1 %v1859_v51 }
 0xa5b   : > { %v851_v57 = vpop.xlane.xlu0 %850 }
 0xa5c   : > { %vm852_vm5 = vcmp.eq.f32.partialorder %v845_v48, %v851_v57  ;;  %v869_v53 = vsub.f32 %v845_v48, %v851_v57  ;;  %v1212_v48 = vpack.c.bf16 %v1453_v4, %v1448_v3 }
 0xa5d   : > { %v853_v54 = vsel %vm852_vm5, %v1465_v7, 64 }
 0xa5e   : > { %v870_v52 = vmul.f32 1.442695, %v869_v53  ;;  %v854_v60 = vsel %vm848_vm4, %v853_v54, 2147483647  ;;  %1213 = vmatpush3.bf16.msra.mxu1 %v1212_v48 }
 0xa5f   : > { %v856_v61 = vshra.s32 %v854_v60, 16  ;;  %1214 = vmatprep.subr.bf16.mxu1 %v1859_v51  ;;  %v855_v58 = vand.u32 65535, %v854_v60 }
 0xa60   : > { %1292 = vpow2.f32 %v870_v52 }
 0xa61   : > { %v858_v56 = vcvt.s32.f32 %v856_v61  ;;  %v857_v53 = vcvt.s32.f32 %v855_v58  ;;  %v876_v61 = vstv %s1342_s13  ;;  %s107_s13 = sadd.s32 1, %s1342_s13  }
 0xa62   : > { %1216 = vmatpush3.bf16.msra.mxu1 %v1215_v55  ;;  %vm877_vm7 = vcmp.eq.s32.totalorder %v1467_v8, %v876_v61  ;;  %p104_p0 = scmp.ge.s32.totalorder %s107_s13, 5  }
 0xa63   : > { %859 = vmin.xlane.f32.xlu0 %v858_v56  ;;  %1217 = vmatprep.subr.bf16.mxu1 %v1859_v51  ;;  %vm967_vm10 = vcmask (%p104_p0), 4096  }
 0xa6a   : > { %v1293_v63 = vpop.eup %1292 }
 0xa6b   : > { %v872_v59 = vsel %vm848_vm4, %v1293_v63, 0.0  ;;  %v880_v63 = vsub.s32 0, %v1467_v8 }
 0xa6c   : > { %873 = vadd.xlane.f32.xlu0 %v872_v59  ;;  %v1218_v59 = vpack.c.bf16 %v1477_v10, %v1472_v9 }
 0xa6e   : > { %1219 = vmatpush3.bf16.msra.mxu1 %v1218_v59 }
 0xaf0   : > { %v860_v57 = vpop.xlane.xlu0 %859 }
 0xaf1   : > { %vm861_vm6 = vcmp.eq.f32.partialorder %v858_v56, %v860_v57  ;;  %v866_v60 = vcvt.f32.s32 %v860_v57 }
 0xaf2   : > { %v862_v54 = vsel %vm861_vm6, %v857_v53, inf }
 0xaf3   : > { %863 = vmin.xlane.f32.xlu1 %v862_v54  ;;  %v867_v56 = vshll.u32 %v866_v60, 16 }
 0xaf9   : > { %v874_v52 = vpop.xlane.xlu0 %873 }
 0xafa   : > { %1294 = vrcp.f32 %v874_v52 }
 0xb04   : > { %v1295_v0 = vpop.eup %1294 }
 0xb05   : > { %v886_v48 = vrot.slane %v1295_v0, %v880_v63 }
 0xb07   : > { %v887_v51 = vsel %vm877_vm7, %v886_v48, %v1322_v49  }
 0xb08   : > { %v1861_v49 = vmov %v887_v51  ;;  %969 = vst.msk [vmem:[%s1836_s16] sm:$0x1f] (%p104_p0), %vm967_vm10, %v887_v51 }
 0xb80   : > { %v864_v55 = vpop.xlane.xlu1 %863 }
 0xb81   : > { %v865_v58 = vcvt.f32.s32 %v864_v55 }
 0xb83   : > { %v868_v53 = vadd.s32 %v867_v56, %v865_v58 }
 0xb85   : > { %v881_v54 = vrot.slane %v868_v53, %v880_v63  ;;  %vm888_vm9 = vcmp.eq.s32.totalorder %v1465_v7, %v868_v53 }
 0xb86   : > { %v1010_v52 = vsel %vm888_vm9, 1.0, %v1858_v62 }
 0xb87   : > { %v882_v1 = vsel %vm877_vm7, %v881_v54, %v1326_v50   ;;  %1164 = vmatmul.mubr.msk.f32.vlgmr.msra.gmra.mrb[6].mxu1 %vm891_vm8, %v1010_v52 }
 0xb88   : > { %v1862_v50 = vmov %v882_v1  ;;  %968 = vst.msk [vmem:[%s1835_s15] sm:$0x1f] (%p104_p0), %vm967_vm10, %v882_v1 }
 0xc55   :  { %106 = sbr.rel (!%p104_p0) target bundleno = 18 (0x12), region = 95 }
 0xc5a   : > { %v961_v48 = vpop.f32.mrb[6].mxu1  }
 0xc5b   : > { %v1165_v61 = vpop.f32.mrb[7].mxu1 }

// kernel: greedy_decode.2
= control target key start
LH: loop header
LB: loop body
LE: loop exit
PB: predicated region body
PF: predicated region fallthrough
CT: control target
= control target key end

     0   :  { %s6349_s0 = inlined_call_operand.vmem [shape: f32[8,32], index: 0, kind: input, shape index: {}]   ;;  %s6350_s1 = inlined_call_operand.vmem [shape: f32[32,96], index: 1, kind: input, shape index: {}]   ;;  %s6351_s2 = inlined_call_operand.vmem [shape: f32[32,96], index: 2, kind: input, shape index: {}]   ;;  %s6352_s3 = inlined_call_operand.vmem [shape: f32[1,96], index: 3, kind: input, shape index: {}]   ;;  %s6353_s4 = inlined_call_operand.vmem [shape: f32[1,96], index: 4, kind: input, shape index: {}]   ;;  %s6354_s5 = inlined_call_operand.vmem [shape: f32[32,96], index: 5, kind: input, shape index: {}]   ;;  %s6355_s6 = inlined_call_operand.vmem [shape: f32[32,96], index: 6, kind: input, shape index: {}]   ;;  %s6356_s7 = inlined_call_operand.vmem [shape: f32[1,96], index: 7, kind: input, shape index: {}]   ;;  %s6357_s8 = inlined_call_operand.vmem [shape: f32[1,96], index: 8, kind: input, shape index: {}]   ;;  %s6358_s9 = inlined_call_operand.vmem [shape: f32[32,96], index: 9, kind: input, shape index: {}]   ;;  %s6359_s10 = inlined_call_operand.vmem [shape: f32[32,96], index: 10, kind: input, shape index: {}]   ;;  %s6360_s11 = inlined_call_operand.vmem [shape: f32[32,96], index: 11, kind: input, shape index: {}]   ;;  %s6361_s12 = inlined_call_operand.vmem [shape: f32[1,96], index: 12, kind: input, shape index: {}]   ;;  %s6362_s13 = inlined_call_operand.vmem [shape: f32[1,96], index: 13, kind: input, shape index: {}]   ;;  %s6363_s14 = inlined_call_operand.hbm [shape: f32[32,96], index: 14, kind: input, shape index: {}]   ;;  %s6364_s15 = inlined_call_operand.hbm [shape: f32[32,96], index: 15, kind: input, shape index: {}]   ;;  %s6365_s16 = inlined_call_operand.hbm [shape: f32[32,96], index: 16, kind: input, shape index: {}]   ;;  %s6366_s17 = inlined_call_operand.vmem [shape: f32[1,96], index: 17, kind: input, shape index: {}]   ;;  %s6367_s18 = inlined_call_operand.vmem [shape: f32[1,96], index: 18, kind: input, shape index: {}]   ;;  %s6368_s19 = inlined_call_operand.vmem [shape: f32[8,32], index: 19, kind: output, shape index: {0}]   ;;  %s6369_s20 = inlined_call_operand.vmem [shape: f32[2,32], index: 20, kind: output, shape index: {1}]  }
   0x1   :  { %6373 = sst [smem:[#allocation11_spill]] %s6349_s0 }
   0x2   :  { %6374 = sst [smem:[#allocation12_spill]] %s6350_s1 }
   0x3   :  { %6375 = sst [smem:[#allocation13_spill]] %s6351_s2 }
   0x4   :  { %6376 = sst [smem:[#allocation14_spill]] %s6352_s3 }
   0x5   :  { %6377 = sst [smem:[#allocation15_spill]] %s6353_s4 }
   0x6   :  { %26 = vsyncpa [#allocation5], 0 }
   0x7   :  { %27 = vsyncpa [#allocation7], 0  ;;  %s5292_s1 = smov [#allocation6]   ;;  %s5293_s23 = smov [#allocation4]  }
   0x8   :  { %s73_s22 = sshll.u32 %s5292_s1, 4  ;;  %s61_s24 = sshll.u32 %s5293_s23, 4  ;;  %s74_s22 = int_to_ptr.vmem [resolvable:$true] %s73_s22  ;;  %s5407_s24 = int_to_ptr.vmem [resolvable:$true] %s61_s24 }
   0x9   :  { %s5222_s3 = scalar_lea.hbm %s6364_s15, 512 }
   0xa   :  { %p5223_p0 = scmp.ne.s32.totalorder %s6364_s15, %s5222_s3  ;;  %p5226_p1 = scmp.lt.u32.totalorder %s5222_s3, %s6364_s15 }
   0xc   :  { %p5228_p2 = pnand %p5226_p1, %p5223_p0 }
   0xe   :  { %5231 = shalt.err (!%p5228_p2)
}
   0xf   :  { %s5232_s29 = scalar_lea.vmem %s74_s22, 512  ;;  %p5237_p4 = scmp.lt.s32.totalorder %s74_s22, %s74_s22 }
  0x10   :  { %p5233_p3 = scmp.ne.s32.totalorder %s74_s22, %s5232_s29  ;;  %p5238_p5 = scmp.lt.s32.totalorder %s5232_s29, %s5232_s29 }
  0x12   :  { %p5239_p6 = por %p5238_p5, %p5237_p4 }
  0x14   :  { %p5240_p7 = pnand %p5239_p6, %p5233_p3 }
  0x16   :  { %5243 = shalt.err (!%p5240_p7)
}
  0x17   :  { %s5294_s30 = smov 128   ;;  %s5295_s0 = smov 8  }
  0x18   :  { %79 = dma.hbm_to_vmem [thread:$0]  %s6364_s15, 512, %s74_s22, [#allocation7], %s5294_s30, %s5294_s30, %s5295_s0  }
  0x19   :  { %s5244_s25 = scalar_lea.hbm %s6363_s14, 512 }
  0x1a   :  { %p5245_p8 = scmp.ne.s32.totalorder %s6363_s14, %s5244_s25  ;;  %p5248_p9 = scmp.lt.u32.totalorder %s5244_s25, %s6363_s14 }
  0x1c   :  { %p5250_p10 = pnand %p5248_p9, %p5245_p8 }
  0x1e   :  { %5253 = shalt.err (!%p5250_p10)
}
  0x1f   :  { %s5254_s4 = scalar_lea.vmem %s5407_s24, 512  ;;  %p5259_p12 = scmp.lt.s32.totalorder %s5407_s24, %s5407_s24 }
  0x20   :  { %p5255_p11 = scmp.ne.s32.totalorder %s5407_s24, %s5254_s4  ;;  %p5260_p13 = scmp.lt.s32.totalorder %s5254_s4, %s5254_s4 }
  0x22   :  { %p5261_p0 = por %p5260_p13, %p5259_p12 }
  0x24   :  { %p5262_p1 = pnand %p5261_p0, %p5255_p11 }
  0x26   :  { %5265 = shalt.err (!%p5262_p1)
}
  0x27   :  { %67 = dma.hbm_to_vmem [thread:$0]  %s6363_s14, 512, %s5407_s24, [#allocation5], %s5294_s30, %s5294_s30, %s5295_s0  }
  0x28   :  { %s5296_s29 = smov [#allocation8]   ;;  %s5266_s2 = scalar_lea.hbm %s6365_s16, 512 }
  0x29   :  { %s85_s21 = sshll.u32 %s5296_s29, 4  ;;  %p5267_p2 = scmp.ne.s32.totalorder %s6365_s16, %s5266_s2  ;;  %s86_s21 = int_to_ptr.vmem [resolvable:$true] %s85_s21 }
  0x2a   :  { %p5270_p3 = scmp.lt.u32.totalorder %s5266_s2, %s6365_s16 }
  0x2c   :  { %p5272_p4 = pnand %p5270_p3, %p5267_p2 }
  0x2e   :  { %5275 = shalt.err (!%p5272_p4)
}
  0x2f   :  { %s5276_s28 = scalar_lea.vmem %s86_s21, 512  ;;  %p5281_p6 = scmp.lt.s32.totalorder %s86_s21, %s86_s21 }
  0x30   :  { %p5277_p5 = scmp.ne.s32.totalorder %s86_s21, %s5276_s28  ;;  %p5282_p7 = scmp.lt.s32.totalorder %s5276_s28, %s5276_s28 }
  0x32   :  { %p5283_p8 = por %p5282_p7, %p5281_p6 }
  0x34   :  { %p5284_p9 = pnand %p5283_p8, %p5277_p5 }
  0x36   :  { %5287 = shalt.err (!%p5284_p9)
}
  0x37   :  { %91 = dma.hbm_to_vmem [thread:$0]  %s6365_s16, 512, %s86_s21, [#allocation7], %s5294_s30, %s5294_s30, %s5295_s0  }
  0x38   :  { %5288 = dma.done.wait [#allocation5], 512  }
  0x39   :  { %5289 = vsyncadd [#allocation5], 4294966784 }
  0x3a   :  { %5290 = dma.done.wait [#allocation7], 1024  }
  0x3b   :  { %5291 = vsyncadd [#allocation7], 4294966272  ;;  %v5297_v0 = vmov 0.0|0.0   ;;  %vm5298_vm0 = vmmov 0   ;;  %v5299_v1 = vmov 0.0   ;;  %s6378_s16 = sld [smem:[#allocation12_spill]] }
  0x3c   :  { %4791 = vmatprep.subr.bf16.mxu0 %v5297_v0  ;;  %4381 = vmatprep.mubr.msk.f32.mxu0 %vm5298_vm0, %v5299_v1  ;;  %s6379_s25 = sld [smem:[#allocation13_spill]]  ;;  %s6380_s14 = sld [smem:[#allocation11_spill]]  ;;  %vm117_vm1 = vcmask 261120   ;;  %v191_v32 = vld [vmem:[%s6354_s5] sm:$0xff]  ;;  %v192_v33 = vld [vmem:[%s6354_s5 + $0x8] sm:$0xff]  ;;  %v193_v34 = vld [vmem:[%s6354_s5 + $0x10] sm:$0xff] }
  0x3d   :  { %4797 = vmatprep.subr.bf16.mxu1 %v5297_v0  ;;  %4392 = vmatprep.mubr.msk.f32.mxu1 %vm5298_vm0, %v5299_v1  ;;  %s6381_s22 = sld [smem:[#allocation15_spill]]  ;;  %s5300_s29 = smov 64   ;;  %v4798_v35 = vpack.c.bf16 %v192_v33, %v191_v32  ;;  %v194_v36 = vld [vmem:[%s6354_s5 + $0x18] sm:$0xff]  ;;  %vm380_vm2 = vcmask 253952   ;;  %vm1043_vm3 = vcmask 260102   ;;  %vm821_vm4 = vcmask 258052  }
  0x3e   :  { %s6382_s23 = sld [smem:[#allocation14_spill]]  ;;  %v4801_v37 = vpack.c.bf16 %v194_v36, %v193_v34  ;;  %s5301_s4 = smov 96   ;;  %vm599_vm5 = vcmask 256002   ;;  %vm1154_vm6 = vcmask 261127   ;;  %vm932_vm7 = vcmask 259077  }
  0x3f   :  { %4799 = vmatpush3.bf16.msra.mxu1 %v4798_v35  ;;  %vm710_vm8 = vcmask 257027   ;;  %vm488_vm9 = vcmask 254977  }
  0x40   :  { %4800 = vmatprep.subr.bf16.mxu1 %v5297_v0 }
  0x41   :  { %v106_v2 = vld [vmem:[%s6378_s16] sm:$0xff]  ;;  %v107_v3 = vld [vmem:[%s6378_s16 + $0x8] sm:$0xff]  ;;  %v108_v4 = vld [vmem:[%s6378_s16 + $0x10] sm:$0xff] }
  0x42   :  { %v4792_v5 = vpack.c.bf16 %v107_v3, %v106_v2  ;;  %v109_v6 = vld [vmem:[%s6378_s16 + $0x18] sm:$0xff]  ;;  %v272_v8 = vld [vmem:[%s6379_s25] sm:$0xff]  ;;  %v273_v9 = vld [vmem:[%s6379_s25 + $0x8] sm:$0xff] }
  0x43   :  { %v4795_v7 = vpack.c.bf16 %v109_v6, %v108_v4  ;;  %v105_v10 = vld [vmem:[%s6380_s14] sm:$0xff]  ;;  %v5487_v11 = vpack.c.bf16 %v273_v9, %v272_v8  ;;  %v274_v12 = vld [vmem:[%s6379_s25 + $0x10] sm:$0xff]  ;;  %v275_v13 = vld [vmem:[%s6379_s25 + $0x18] sm:$0xff]  ;;  %4802 = vmatpush3.bf16.msra.mxu1 %v4801_v37 }
  0x44   :  { %4793 = vmatpush3.bf16.msra.mxu0 %v4792_v5  ;;  %v5498_v14 = vpack.c.bf16 %v275_v13, %v274_v12  ;;  %v5515_v17 = vld [vmem:[%s6381_s22] sm:$0x1]  ;;  %4809 = vmatprep.subr.bf16.mxu1 %v5297_v0 }
  0x45   :  { %4794 = vmatprep.subr.bf16.mxu0 %v5297_v0  ;;  %v4113_v21 = vld [vmem:[%s6382_s23] ss:$0 sm:$0xff] }
  0x46   :  { %4393 = vmatmul.mubr.msk.f32.vlgmr.msra.gmra.mrb[0].mxu1 %vm117_vm1, %v105_v10 }
  0x47   :  { %4811 = vmatpush3.bf16.msra.mxu1 %v5487_v11  ;;  %4414 = vmatprep.mubr.msk.f32.mxu1 %vm5298_vm0, %v5299_v1 }
  0x48   :  { %4796 = vmatpush3.bf16.msra.mxu0 %v4795_v7  ;;  %4812 = vmatprep.subr.bf16.mxu1 %v5297_v0 }
  0x49   :  { %4803 = vmatprep.subr.bf16.mxu0 %v5297_v0 }
  0x4b   :  { %4382 = vmatmul.mubr.msk.f32.vlgmr.msra.gmra.mrb[0].mxu0 %vm117_vm1, %v105_v10  ;;  %4814 = vmatpush3.bf16.msra.mxu1 %v5498_v14 }
  0x4c   :  { %4805 = vmatpush3.bf16.msra.mxu0 %v5487_v11  ;;  %4403 = vmatprep.mubr.msk.f32.mxu0 %vm5298_vm0, %v5299_v1 }
  0x4d   :  { %4806 = vmatprep.subr.bf16.mxu0 %v5297_v0  ;;  %4821 = vmatprep.subr.bf16.mxu1 %v5297_v0 }
  0x50   :  { %4808 = vmatpush3.bf16.msra.mxu0 %v5498_v14 }
  0x51   :  { %4815 = vmatprep.subr.bf16.mxu0 %v5297_v0 }
  0x53   :  { %4404 = vmatmul.mubr.f32.vlgmr.msra.gmra.mrb[2].mxu0 %v5299_v1 }
  0x54   :  { %4817 = vmatpush3.bf16.msra.mxu0 %v5487_v11  ;;  %4425 = vmatprep.mubr.msk.f32.mxu0 %vm5298_vm0, %v5299_v1 }
  0x55   :  { %4818 = vmatprep.subr.bf16.mxu0 %v5297_v0 }
  0x58   :  { %4820 = vmatpush3.bf16.msra.mxu0 %v5498_v14 }
  0x59   :  { %4827 = vmatprep.subr.bf16.mxu0 %v5297_v0 }
 0x119   :  { %v5550_v44 = vpop.f32.mrb[0].mxu1 }
 0x11a   :  { %v4394_v45 = vpop.f32.mrb[1].mxu1 }
 0x11e   :  { %v187_v15 = vpop.f32.mrb[0].mxu0 }
 0x11f   :  { %v4383_v16 = vpop.f32.mrb[1].mxu0  ;;  %v5522_v22 = vadd.f32 %v4113_v21, %v187_v15 }
 0x126   :  { %v346_v18 = vpop.f32.mrb[2].mxu0 }
 0x127   :  { %v347_v19 = vadd.f32 %v346_v18, %v5515_v17  ;;  %v4405_v20 = vpop.f32.mrb[3].mxu0 }
 0x129   :  { %358 = vrot.lane.b32.xlu0 %v347_v19, %s5300_s29  ;;  %v350_v23 = vadd.f32 %v347_v19, %v5522_v22 }
 0x12b   :  { %v4117_v24 = vmul.f32 -1.442695, %v350_v23 }
 0x12d   :  { %5029 = vpow2.f32 %v4117_v24 }
 0x137   :  { %v5030_v25 = vpop.eup %5029 }
 0x138   :  { %v354_v26 = vadd.f32 1.0, %v5030_v25 }
 0x13a   :  { %5031 = vrcp.f32 %v354_v26 }
 0x144   :  { %v5032_v27 = vpop.eup %5031 }
 0x145   :  { %v368_v39 = vsub.f32 1.0, %v5032_v27  ;;  %v374_v41 = vmul.f32 0.0, %v5032_v27 }
 0x19b   :  { %v359_v28 = vpop.permute.xlu0 %358 }
 0x19c   :  { %v361_v29 = vmul.f32 %v5032_v27, %v359_v28 }
 0x19e   :  { %363 = vrot.lane.b32.xlu0 %v361_v29, %s5300_s29 }
 0x210   :  { %v364_v30 = vpop.permute.xlu0 %363 }
 0x211   :  { %v366_v31 = vadd.f32 %v364_v30, %v5522_v22 }
 0x213   :  { %5033 = vtanh.f32 %v366_v31 }
 0x21d   :  { %v5034_v38 = vpop.eup %5033 }
 0x21e   :  { %370 = vrot.lane.b32.xlu1 %v5034_v38, %s5301_s4 }
 0x290   :  { %v371_v40 = vpop.permute.xlu1 %370 }
 0x291   :  { %v373_v42 = vmul.f32 %v371_v40, %v368_v39 }
 0x293   :  { %v375_v43 = vadd.f32 %v374_v41, %v373_v42 }
 0x295   :  { %377 = vrot.lane.b32.xlu1 %v375_v43, %s5301_s4  ;;  %v480_v61 = vrot.slane %v375_v43, 7 }
 0x307   :  { %v378_v46 = vpop.permute.xlu1 %377 }
 0x308   :  { %381 = vst.msk [vmem:[#allocation2] sm:$0x1] %vm380_vm2, %v378_v46  ;;  %4415 = vmatmul.mubr.msk.f32.vlgmr.msra.gmra.mrb[2].mxu1 %vm117_vm1, %v378_v46 }
 0x309   :  { %4823 = vmatpush3.bf16.msra.mxu1 %v5487_v11  ;;  %4436 = vmatprep.mubr.msk.f32.mxu1 %vm5298_vm0, %v5299_v1 }
 0x30a   :  { %4824 = vmatprep.subr.bf16.mxu1 %v5297_v0 }
 0x30d   :  { %4826 = vmatpush3.bf16.msra.mxu1 %v5498_v14 }
 0x30e   :  { %4833 = vmatprep.subr.bf16.mxu1 %v5297_v0 }
 0x3db   :  { %v450_v47 = vpop.f32.mrb[2].mxu1 }
 0x3dc   :  { %v451_v48 = vadd.f32 %v450_v47, %v5515_v17  ;;  %v4416_v49 = vpop.f32.mrb[3].mxu1 }
 0x3de   :  { %v455_v50 = vrot.slane %v451_v48, 7 }
 0x3e0   :  { %464 = vrot.lane.b32.xlu0 %v455_v50, %s5300_s29  ;;  %v457_v51 = vadd.f32 %v455_v50, %v5522_v22 }
 0x3e2   :  { %v4119_v52 = vmul.f32 -1.442695, %v457_v51 }
 0x3e4   :  { %5035 = vpow2.f32 %v4119_v52 }
 0x3ee   :  { %v5036_v53 = vpop.eup %5035 }
 0x3ef   :  { %v461_v54 = vadd.f32 1.0, %v5036_v53 }
 0x3f1   :  { %5037 = vrcp.f32 %v461_v54 }
 0x3fb   :  { %v5038_v55 = vpop.eup %5037 }
 0x3fc   :  { %v474_v62 = vsub.f32 1.0, %v5038_v55  ;;  %v482_v3 = vmul.f32 %v5038_v55, %v480_v61 }
 0x452   :  { %v465_v56 = vpop.permute.xlu0 %464 }
 0x453   :  { %v467_v57 = vmul.f32 %v5038_v55, %v465_v56 }
 0x455   :  { %469 = vrot.lane.b32.xlu1 %v467_v57, %s5300_s29 }
 0x4c7   :  { %v470_v58 = vpop.permute.xlu1 %469 }
 0x4c8   :  { %v472_v59 = vadd.f32 %v470_v58, %v5522_v22 }
 0x4ca   :  { %5039 = vtanh.f32 %v472_v59 }
 0x4d4   :  { %v5040_v60 = vpop.eup %5039 }
 0x4d5   :  { %476 = vrot.lane.b32.xlu0 %v5040_v60, %s5301_s4 }
 0x547   :  { %v477_v63 = vpop.permute.xlu0 %476 }
 0x548   :  { %v479_v2 = vmul.f32 %v477_v63, %v474_v62 }
 0x54a   :  { %v5566_v4 = vadd.f32 %v482_v3, %v479_v2 }
 0x54c   :  { %v490_v5 = vrot.slane %v5566_v4, 1  ;;  %v591_v26 = vrot.slane %v5566_v4, 7 }
 0x54e   :  { %491 = vrot.lane.b32.xlu1 %v490_v5, %s5301_s4 }
 0x5c0   :  { %v492_v6 = vpop.permute.xlu1 %491 }
 0x5c1   :  { %4426 = vmatmul.mubr.msk.f32.vlgmr.msra.gmra.mrb[4].mxu0 %vm117_vm1, %v492_v6 }
 0x5c2   :  { %4829 = vmatpush3.bf16.msra.mxu0 %v5487_v11  ;;  %4447 = vmatprep.mubr.msk.f32.mxu0 %vm5298_vm0, %v5299_v1 }
 0x5c3   :  { %4830 = vmatprep.subr.bf16.mxu0 %v5297_v0 }
 0x5c6   :  { %4832 = vmatpush3.bf16.msra.mxu0 %v5498_v14 }
 0x5c7   :  { %4839 = vmatprep.subr.bf16.mxu0 %v5297_v0 }
 0x694   :  { %v561_v7 = vpop.f32.mrb[4].mxu0 }
 0x695   :  { %v562_v8 = vadd.f32 %v561_v7, %v5515_v17  ;;  %v4427_v9 = vpop.f32.mrb[5].mxu0 }
 0x697   :  { %v566_v10 = vrot.slane %v562_v8, 6 }
 0x699   :  { %575 = vrot.lane.b32.xlu0 %v566_v10, %s5300_s29  ;;  %v568_v12 = vadd.f32 %v566_v10, %v5522_v22 }
 0x69b   :  { %v4121_v13 = vmul.f32 -1.442695, %v568_v12 }
 0x69d   :  { %5041 = vpow2.f32 %v4121_v13 }
 0x6a7   :  { %v5042_v15 = vpop.eup %5041 }
 0x6a8   :  { %v572_v16 = vadd.f32 1.0, %v5042_v15 }
 0x6aa   :  { %5043 = vrcp.f32 %v572_v16 }
 0x6b4   :  { %v5044_v18 = vpop.eup %5043 }
 0x6b5   :  { %v585_v25 = vsub.f32 1.0, %v5044_v18  ;;  %v593_v28 = vmul.f32 %v5044_v18, %v591_v26 }
 0x70b   :  { %v576_v19 = vpop.permute.xlu0 %575 }
 0x70c   :  { %v578_v20 = vmul.f32 %v5044_v18, %v576_v19 }
 0x70e   :  { %580 = vrot.lane.b32.xlu1 %v578_v20, %s5300_s29 }
 0x780   :  { %v581_v21 = vpop.permute.xlu1 %580 }
 0x781   :  { %v583_v23 = vadd.f32 %v581_v21, %v5522_v22 }
 0x783   :  { %5045 = vtanh.f32 %v583_v23 }
 0x78d   :  { %v5046_v24 = vpop.eup %5045 }
 0x78e   :  { %587 = vrot.lane.b32.xlu0 %v5046_v24, %s5301_s4 }
 0x800   :  { %v588_v27 = vpop.permute.xlu0 %587 }
 0x801   :  { %v590_v29 = vmul.f32 %v588_v27, %v585_v25 }
 0x803   :  { %v5584_v30 = vadd.f32 %v593_v28, %v590_v29 }
 0x805   :  { %v601_v31 = vrot.slane %v5584_v30, 2  ;;  %v702_v49 = vrot.slane %v5584_v30, 7 }
 0x807   :  { %602 = vrot.lane.b32.xlu1 %v601_v31, %s5301_s4 }
 0x879   :  { %v603_v32 = vpop.permute.xlu1 %602 }
 0x87a   :  { %4437 = vmatmul.mubr.msk.f32.vlgmr.msra.gmra.mrb[4].mxu1 %vm117_vm1, %v603_v32 }
 0x87b   :  { %4835 = vmatpush3.bf16.msra.mxu1 %v5487_v11  ;;  %4458 = vmatprep.mubr.msk.f32.mxu1 %vm5298_vm0, %v5299_v1 }
 0x87c   :  { %4836 = vmatprep.subr.bf16.mxu1 %v5297_v0 }
 0x87f   :  { %4838 = vmatpush3.bf16.msra.mxu1 %v5498_v14 }
 0x880   :  { %4845 = vmatprep.subr.bf16.mxu1 %v5297_v0 }
 0x94d   :  { %v672_v33 = vpop.f32.mrb[4].mxu1 }
 0x94e   :  { %v673_v34 = vadd.f32 %v672_v33, %v5515_v17  ;;  %v4438_v35 = vpop.f32.mrb[5].mxu1 }
 0x950   :  { %v677_v36 = vrot.slane %v673_v34, 5 }
 0x952   :  { %686 = vrot.lane.b32.xlu0 %v677_v36, %s5300_s29  ;;  %v679_v37 = vadd.f32 %v677_v36, %v5522_v22 }
 0x954   :  { %v4123_v38 = vmul.f32 -1.442695, %v679_v37 }
 0x956   :  { %5047 = vpow2.f32 %v4123_v38 }
 0x960   :  { %v5048_v39 = vpop.eup %5047 }
 0x961   :  { %v683_v40 = vadd.f32 1.0, %v5048_v39 }
 0x963   :  { %5049 = vrcp.f32 %v683_v40 }
 0x96d   :  { %v5050_v41 = vpop.eup %5049 }
 0x96e   :  { %v696_v48 = vsub.f32 1.0, %v5050_v41  ;;  %v704_v51 = vmul.f32 %v5050_v41, %v702_v49 }
 0x9c4   :  { %v687_v42 = vpop.permute.xlu0 %686 }
 0x9c5   :  { %v689_v43 = vmul.f32 %v5050_v41, %v687_v42  ;;  %v1156_v41 = vld [vmem:[%s6355_s6] sm:$0xff]  ;;  %v1157_v42 = vld [vmem:[%s6355_s6 + $0x8] sm:$0xff] }
 0x9c7   :  { %691 = vrot.lane.b32.xlu1 %v689_v43, %s5300_s29  ;;  %v5648_v43 = vpack.c.bf16 %v1157_v42, %v1156_v41 }
 0xa39   :  { %v692_v45 = vpop.permute.xlu1 %691 }
 0xa3a   :  { %v694_v46 = vadd.f32 %v692_v45, %v5522_v22  ;;  %v1158_v45 = vld [vmem:[%s6355_s6 + $0x10] sm:$0xff] }
 0xa3c   :  { %5051 = vtanh.f32 %v694_v46  ;;  %v1159_v46 = vld [vmem:[%s6355_s6 + $0x18] sm:$0xff] }
 0xa46   :  { %v5052_v47 = vpop.eup %5051 }
 0xa47   :  { %698 = vrot.lane.b32.xlu0 %v5052_v47, %s5301_s4 }
 0xab9   :  { %v699_v50 = vpop.permute.xlu0 %698 }
 0xaba   :  { %v701_v52 = vmul.f32 %v699_v50, %v696_v48  ;;  %v5658_v48 = vpack.c.bf16 %v1159_v46, %v1158_v45 }
 0xabc   :  { %v5602_v53 = vadd.f32 %v704_v51, %v701_v52 }
 0xabe   :  { %v712_v54 = vrot.slane %v5602_v53, 3  ;;  %v813_v10 = vrot.slane %v5602_v53, 7 }
 0xac0   :  { %713 = vrot.lane.b32.xlu1 %v712_v54, %s5301_s4  ;;  %v5677_v54 = vld [vmem:[%s6357_s8] sm:$0x1] }
 0xb32   :  { %v714_v55 = vpop.permute.xlu1 %713 }
 0xb33   :  { %4448 = vmatmul.mubr.msk.f32.vlgmr.msra.gmra.mrb[6].mxu0 %vm117_vm1, %v714_v55 }
 0xb34   :  { %4841 = vmatpush3.bf16.msra.mxu0 %v5487_v11  ;;  %4469 = vmatprep.mubr.msk.f32.mxu0 %vm5298_vm0, %v5299_v1 }
 0xb35   :  { %4842 = vmatprep.subr.bf16.mxu0 %v5297_v0 }
 0xb38   :  { %4844 = vmatpush3.bf16.msra.mxu0 %v5498_v14 }
 0xb39   :  { %4851 = vmatprep.subr.bf16.mxu0 %v5297_v0 }
 0xc06   :  { %v783_v56 = vpop.f32.mrb[6].mxu0 }
 0xc07   :  { %v784_v57 = vadd.f32 %v783_v56, %v5515_v17  ;;  %v4449_v58 = vpop.f32.mrb[7].mxu0 }
 0xc09   :  { %v788_v59 = vrot.slane %v784_v57, 4 }
 0xc0b   :  { %797 = vrot.lane.b32.xlu0 %v788_v59, %s5300_s29  ;;  %v790_v60 = vadd.f32 %v788_v59, %v5522_v22 }
 0xc0d   :  { %v4125_v61 = vmul.f32 -1.442695, %v790_v60 }
 0xc0f   :  { %5053 = vpow2.f32 %v4125_v61 }
 0xc19   :  { %v5054_v62 = vpop.eup %5053 }
 0xc1a   :  { %v794_v63 = vadd.f32 1.0, %v5054_v62 }
 0xc1c   :  { %5055 = vrcp.f32 %v794_v63 }
 0xc26   :  { %v5056_v2 = vpop.eup %5055 }
 0xc27   :  { %v807_v9 = vsub.f32 1.0, %v5056_v2  ;;  %v815_v13 = vmul.f32 %v5056_v2, %v813_v10 }
 0xc7d   :  { %v798_v3 = vpop.permute.xlu0 %797 }
 0xc7e   :  { %v800_v5 = vmul.f32 %v5056_v2, %v798_v3 }
 0xc80   :  { %802 = vrot.lane.b32.xlu1 %v800_v5, %s5300_s29 }
 0xcf2   :  { %v803_v6 = vpop.permute.xlu1 %802 }
 0xcf3   :  { %v805_v7 = vadd.f32 %v803_v6, %v5522_v22 }
 0xcf5   :  { %5057 = vtanh.f32 %v805_v7 }
 0xcff   :  { %v5058_v8 = vpop.eup %5057 }
 0xd00   :  { %809 = vrot.lane.b32.xlu0 %v5058_v8, %s5301_s4 }
 0xd72   :  { %v810_v12 = vpop.permute.xlu0 %809 }
 0xd73   :  { %v812_v15 = vmul.f32 %v810_v12, %v807_v9 }
 0xd75   :  { %v5620_v16 = vadd.f32 %v815_v13, %v812_v15 }
 0xd77   :  { %v823_v18 = vrot.slane %v5620_v16, 4  ;;  %v924_v35 = vrot.slane %v5620_v16, 7 }
 0xd79   :  { %824 = vrot.lane.b32.xlu1 %v823_v18, %s5301_s4 }
 0xdeb   :  { %v825_v19 = vpop.permute.xlu1 %824 }
 0xdec   :  { %4459 = vmatmul.mubr.msk.f32.vlgmr.msra.gmra.mrb[6].mxu1 %vm117_vm1, %v825_v19 }
 0xded   :  { %4847 = vmatpush3.bf16.msra.mxu1 %v5487_v11  ;;  %4480 = vmatprep.mubr.msk.f32.mxu1 %vm5298_vm0, %v5299_v1 }
 0xdee   :  { %4848 = vmatprep.subr.bf16.mxu1 %v5297_v0 }
 0xdf1   :  { %4850 = vmatpush3.bf16.msra.mxu1 %v5498_v14 }
 0xdf2   :  { %4857 = vmatprep.subr.bf16.mxu1 %v5297_v0 }
 0xebf   :  { %v894_v20 = vpop.f32.mrb[6].mxu1 }
 0xec0   :  { %v895_v21 = vadd.f32 %v894_v20, %v5515_v17  ;;  %v4460_v23 = vpop.f32.mrb[7].mxu1 }
 0xec2   :  { %v899_v24 = vrot.slane %v895_v21, 3 }
 0xec4   :  { %908 = vrot.lane.b32.xlu0 %v899_v24, %s5300_s29  ;;  %v901_v25 = vadd.f32 %v899_v24, %v5522_v22 }
 0xec6   :  { %v4127_v26 = vmul.f32 -1.442695, %v901_v25 }
 0xec8   :  { %5059 = vpow2.f32 %v4127_v26 }
 0xed2   :  { %v5060_v11 = vpop.eup %5059 }
 0xed3   :  { %v905_v27 = vadd.f32 1.0, %v5060_v11 }
 0xed5   :  { %5061 = vrcp.f32 %v905_v27 }
 0xedf   :  { %v5062_v28 = vpop.eup %5061 }
 0xee0   :  { %v918_v34 = vsub.f32 1.0, %v5062_v28  ;;  %v926_v37 = vmul.f32 %v5062_v28, %v924_v35 }
 0xf36   :  { %v909_v29 = vpop.permute.xlu0 %908 }
 0xf37   :  { %v911_v31 = vmul.f32 %v5062_v28, %v909_v29 }
 0xf39   :  { %913 = vrot.lane.b32.xlu1 %v911_v31, %s5300_s29 }
 0xfab   :  { %v914_v14 = vpop.permute.xlu1 %913 }
 0xfac   :  { %v916_v32 = vadd.f32 %v914_v14, %v5522_v22 }
 0xfae   :  { %5063 = vtanh.f32 %v916_v32 }
 0xfb8   :  { %v5064_v33 = vpop.eup %5063 }
 0xfb9   :  { %920 = vrot.lane.b32.xlu0 %v5064_v33, %s5301_s4 }
0x102b   :  { %v921_v36 = vpop.permute.xlu0 %920 }
0x102c   :  { %v923_v38 = vmul.f32 %v921_v36, %v918_v34 }
0x102e   :  { %v5638_v39 = vadd.f32 %v926_v37, %v923_v38 }
0x1030   :  { %v934_v40 = vrot.slane %v5638_v39, 5  ;;  %v1035_v24 = vrot.slane %v5638_v39, 7 }
0x1032   :  { %935 = vrot.lane.b32.xlu1 %v934_v40, %s5301_s4 }
0x10a4   :  { %v936_v47 = vpop.permute.xlu1 %935 }
0x10a5   :  { %4470 = vmatmul.mubr.msk.f32.vlgmr.msra.gmra.mrb[8].mxu0 %vm117_vm1, %v936_v47 }
0x10a6   :  { %4853 = vmatpush3.bf16.msra.mxu0 %v5648_v43  ;;  %4491 = vmatprep.mubr.msk.f32.mxu0 %vm5298_vm0, %v5299_v1 }
0x10a7   :  { %4854 = vmatprep.subr.bf16.mxu0 %v5297_v0 }
0x10aa   :  { %4856 = vmatpush3.bf16.msra.mxu0 %v5658_v48 }
0x10ab   :  { %4863 = vmatprep.subr.bf16.mxu0 %v5297_v0 }
0x10ad   :  { %4492 = vmatmul.mubr.f32.vlgmr.msra.gmra.mrb[10].mxu0 %v5299_v1 }
0x10ae   :  { %4865 = vmatpush3.bf16.msra.mxu0 %v5648_v43  ;;  %4513 = vmatprep.mubr.msk.f32.mxu0 %vm5298_vm0, %v5299_v1 }
0x10af   :  { %4866 = vmatprep.subr.bf16.mxu0 %v5297_v0 }
0x10b2   :  { %4868 = vmatpush3.bf16.msra.mxu0 %v5658_v48 }
0x10b3   :  { %4875 = vmatprep.subr.bf16.mxu0 %v5297_v0 }
0x1178   :  { %v1005_v49 = vpop.f32.mrb[8].mxu0 }
0x1179   :  { %v1006_v50 = vadd.f32 %v1005_v49, %v5515_v17  ;;  %v4471_v51 = vpop.f32.mrb[9].mxu0  ;;  %v4115_v17 = vld [vmem:[%s6356_s7] ss:$0 sm:$0xff] }
0x117a   :  { %v5686_v61 = vadd.f32 %v4115_v17, %v5550_v44 }
0x117b   :  { %v1010_v52 = vrot.slane %v1006_v50, 2 }
0x117d   :  { %1019 = vrot.lane.b32.xlu0 %v1010_v52, %s5300_s29  ;;  %v1012_v59 = vadd.f32 %v1010_v52, %v5522_v22 }
0x117f   :  { %v4129_v60 = vmul.f32 -1.442695, %v1012_v59 }
0x1180   :  { %v1227_v55 = vpop.f32.mrb[10].mxu0 }
0x1181   :  { %v1228_v56 = vadd.f32 %v1227_v55, %v5677_v54  ;;  %v4493_v57 = vpop.f32.mrb[11].mxu0  ;;  %5065 = vpow2.f32 %v4129_v60 }
0x1183   :  { %v1232_v58 = vrot.slane %v1228_v56, 1 }
0x1185   :  { %1241 = vrot.lane.b32.xlu1 %v1232_v58, %s5300_s29  ;;  %v1234_v62 = vadd.f32 %v1232_v58, %v5686_v61 }
0x1187   :  { %v4132_v63 = vmul.f32 -1.442695, %v1234_v62 }
0x1189   :  { %5067 = vpow2.f32 %v4132_v63 }
0x118b   :  { %v5066_v2 = vpop.eup %5065 }
0x118c   :  { %v1016_v3 = vadd.f32 1.0, %v5066_v2 }
0x118e   :  { %5069 = vrcp.f32 %v1016_v3 }
0x1193   :  { %v5068_v5 = vpop.eup %5067 }
0x1194   :  { %v1238_v6 = vadd.f32 1.0, %v5068_v5 }
0x1196   :  { %5071 = vrcp.f32 %v1238_v6 }
0x1198   :  { %v5070_v7 = vpop.eup %5069 }
0x1199   :  { %v1029_v23 = vsub.f32 1.0, %v5070_v7  ;;  %v1037_v26 = vmul.f32 %v5070_v7, %v1035_v24 }
0x11a0   :  { %v5072_v10 = vpop.eup %5071 }
0x11a1   :  { %v1251_v29 = vsub.f32 1.0, %v5072_v10  ;;  %v1257_v14 = vmul.f32 0.0, %v5072_v10 }
0x11ef   :  { %v1020_v8 = vpop.permute.xlu0 %1019 }
0x11f0   :  { %v1022_v9 = vmul.f32 %v5070_v7, %v1020_v8 }
0x11f2   :  { %1024 = vrot.lane.b32.xlu0 %v1022_v9, %s5300_s29 }
0x11f7   :  { %v1242_v12 = vpop.permute.xlu1 %1241 }
0x11f8   :  { %v1244_v44 = vmul.f32 %v5072_v10, %v1242_v12 }
0x11fa   :  { %1246 = vrot.lane.b32.xlu1 %v1244_v44, %s5300_s29 }
0x1264   :  { %v1025_v13 = vpop.permute.xlu0 %1024 }
0x1265   :  { %v1027_v15 = vadd.f32 %v1025_v13, %v5522_v22 }
0x1267   :  { %5073 = vtanh.f32 %v1027_v15 }
0x126c   :  { %v1247_v18 = vpop.permute.xlu1 %1246 }
0x126d   :  { %v1249_v19 = vadd.f32 %v1247_v18, %v5686_v61 }
0x126f   :  { %5075 = vtanh.f32 %v1249_v19 }
0x1271   :  { %v5074_v20 = vpop.eup %5073 }
0x1272   :  { %1031 = vrot.lane.b32.xlu0 %v5074_v20, %s5301_s4 }
0x1279   :  { %v5076_v21 = vpop.eup %5075 }
0x127a   :  { %1253 = vrot.lane.b32.xlu1 %v5076_v21, %s5301_s4 }
0x12e4   :  { %v1032_v25 = vpop.permute.xlu0 %1031 }
0x12e5   :  { %v1034_v11 = vmul.f32 %v1032_v25, %v1029_v23 }
0x12e7   :  { %v5696_v27 = vadd.f32 %v1037_v26, %v1034_v11 }
0x12e9   :  { %v1045_v28 = vrot.slane %v5696_v27, 6 }
0x12eb   :  { %1046 = vrot.lane.b32.xlu0 %v1045_v28, %s5301_s4 }
0x12ec   :  { %v1254_v31 = vpop.permute.xlu1 %1253 }
0x12ed   :  { %v1256_v32 = vmul.f32 %v1254_v31, %v1251_v29 }
0x12ef   :  { %v5700_v33 = vadd.f32 %v1257_v14, %v1256_v32 }
0x12f1   :  { %v1264_v34 = vrot.slane %v5700_v33, 7  ;;  %v1365_v17 = vrot.slane %v5700_v33, 1 }
0x12f3   :  { %1265 = vrot.lane.b32.xlu1 %v1264_v34, %s5301_s4 }
0x135d   :  { %v1047_v35 = vpop.permute.xlu0 %1046 }
0x135e   :  { %4481 = vmatmul.mubr.msk.f32.vlgmr.msra.gmra.mrb[8].mxu1 %vm117_vm1, %v1047_v35 }
0x135f   :  { %4859 = vmatpush3.bf16.msra.mxu1 %v5648_v43  ;;  %4502 = vmatprep.mubr.msk.f32.mxu1 %vm5298_vm0, %v5299_v1 }
0x1360   :  { %4860 = vmatprep.subr.bf16.mxu1 %v5297_v0 }
0x1363   :  { %4862 = vmatpush3.bf16.msra.mxu1 %v5658_v48 }
0x1364   :  { %4869 = vmatprep.subr.bf16.mxu1 %v5297_v0 }
0x1365   :  { %v1266_v36 = vpop.permute.xlu1 %1265 }
0x1366   :  { %4503 = vmatmul.mubr.msk.f32.vlgmr.msra.gmra.mrb[10].mxu1 %vm117_vm1, %v1266_v36 }
0x1367   :  { %4871 = vmatpush3.bf16.msra.mxu1 %v5648_v43  ;;  %4524 = vmatprep.mubr.msk.f32.mxu1 %vm5298_vm0, %v5299_v1 }
0x1368   :  { %4872 = vmatprep.subr.bf16.mxu1 %v5297_v0 }
0x136b   :  { %4874 = vmatpush3.bf16.msra.mxu1 %v5658_v48 }
0x136c   :  { %4881 = vmatprep.subr.bf16.mxu1 %v5297_v0 }
0x1431   :  { %v5718_v37 = vpop.f32.mrb[8].mxu1 }
0x1432   :  { %v4482_v38 = vpop.f32.mrb[9].mxu1 }
0x1439   :  { %v1335_v40 = vpop.f32.mrb[10].mxu1 }
0x143a   :  { %v1336_v41 = vadd.f32 %v1335_v40, %v5677_v54  ;;  %v4504_v42 = vpop.f32.mrb[11].mxu1 }
0x143c   :  { %v1340_v45 = vrot.slane %v1336_v41, 2 }
0x143e   :  { %1349 = vrot.lane.b32.xlu0 %v1340_v45, %s5300_s29  ;;  %v1342_v46 = vadd.f32 %v1340_v45, %v5686_v61 }
0x1440   :  { %v4134_v47 = vmul.f32 -1.442695, %v1342_v46 }
0x1442   :  { %5077 = vpow2.f32 %v4134_v47 }
0x144c   :  { %v5078_v49 = vpop.eup %5077 }
0x144d   :  { %v1346_v50 = vadd.f32 1.0, %v5078_v49 }
0x144f   :  { %5079 = vrcp.f32 %v1346_v50 }
0x1459   :  { %v5080_v51 = vpop.eup %5079 }
0x145a   :  { %v1359_v59 = vsub.f32 1.0, %v5080_v51  ;;  %v1367_v62 = vmul.f32 %v5080_v51, %v1365_v17 }
0x14b0   :  { %v1350_v52 = vpop.permute.xlu0 %1349 }
0x14b1   :  { %v1352_v55 = vmul.f32 %v5080_v51, %v1350_v52 }
0x14b3   :  { %1354 = vrot.lane.b32.xlu1 %v1352_v55, %s5300_s29 }
0x1525   :  { %v1355_v56 = vpop.permute.xlu1 %1354 }
0x1526   :  { %v1357_v57 = vadd.f32 %v1355_v56, %v5686_v61 }
0x1528   :  { %5081 = vtanh.f32 %v1357_v57 }
0x1532   :  { %v5082_v58 = vpop.eup %5081 }
0x1533   :  { %1361 = vrot.lane.b32.xlu0 %v5082_v58, %s5301_s4 }
0x15a5   :  { %v1362_v60 = vpop.permute.xlu0 %1361 }
0x15a6   :  { %v1364_v63 = vmul.f32 %v1362_v60, %v1359_v59 }
0x15a8   :  { %v5727_v2 = vadd.f32 %v1367_v62, %v1364_v63 }
0x15aa   :  { %v1374_v3 = vrot.slane %v5727_v2, 6  ;;  %v1475_v25 = vrot.slane %v5727_v2, 1 }
0x15ac   :  { %1375 = vrot.lane.b32.xlu1 %v1374_v3, %s5301_s4 }
0x161e   :  { %v1376_v5 = vpop.permute.xlu1 %1375 }
0x161f   :  { %4514 = vmatmul.mubr.msk.f32.vlgmr.msra.gmra.mrb[12].mxu0 %vm117_vm1, %v1376_v5 }
0x1620   :  { %4877 = vmatpush3.bf16.msra.mxu0 %v5648_v43  ;;  %4535 = vmatprep.mubr.msk.f32.mxu0 %vm5298_vm0, %v5299_v1 }
0x1621   :  { %4878 = vmatprep.subr.bf16.mxu0 %v5297_v0 }
0x1624   :  { %4880 = vmatpush3.bf16.msra.mxu0 %v5658_v48 }
0x1625   :  { %4887 = vmatprep.subr.bf16.mxu0 %v5297_v0 }
0x16f2   :  { %v1445_v6 = vpop.f32.mrb[12].mxu0 }
0x16f3   :  { %v1446_v7 = vadd.f32 %v1445_v6, %v5677_v54  ;;  %v4515_v8 = vpop.f32.mrb[13].mxu0 }
0x16f5   :  { %v1450_v9 = vrot.slane %v1446_v7, 3 }
0x16f7   :  { %1459 = vrot.lane.b32.xlu0 %v1450_v9, %s5300_s29  ;;  %v1452_v10 = vadd.f32 %v1450_v9, %v5686_v61 }
0x16f9   :  { %v4136_v12 = vmul.f32 -1.442695, %v1452_v10 }
0x16fb   :  { %5083 = vpow2.f32 %v4136_v12 }
0x1705   :  { %v5084_v44 = vpop.eup %5083 }
0x1706   :  { %v1456_v13 = vadd.f32 1.0, %v5084_v44 }
0x1708   :  { %5085 = vrcp.f32 %v1456_v13 }
0x1712   :  { %v5086_v15 = vpop.eup %5085 }
0x1713   :  { %v1469_v24 = vsub.f32 1.0, %v5086_v15  ;;  %v1477_v11 = vmul.f32 %v5086_v15, %v1475_v25 }
0x1769   :  { %v1460_v18 = vpop.permute.xlu0 %1459 }
0x176a   :  { %v1462_v19 = vmul.f32 %v5086_v15, %v1460_v18 }
0x176c   :  { %1464 = vrot.lane.b32.xlu1 %v1462_v19, %s5300_s29 }
0x17de   :  { %v1465_v20 = vpop.permute.xlu1 %1464 }
0x17df   :  { %v1467_v21 = vadd.f32 %v1465_v20, %v5686_v61 }
0x17e1   :  { %5087 = vtanh.f32 %v1467_v21 }
0x17eb   :  { %v5088_v23 = vpop.eup %5087 }
0x17ec   :  { %1471 = vrot.lane.b32.xlu0 %v5088_v23, %s5301_s4 }
0x185e   :  { %v1472_v26 = vpop.permute.xlu0 %1471 }
0x185f   :  { %v1474_v28 = vmul.f32 %v1472_v26, %v1469_v24 }
0x1861   :  { %v5745_v29 = vadd.f32 %v1477_v11, %v1474_v28 }
0x1863   :  { %v1484_v31 = vrot.slane %v5745_v29, 5  ;;  %v1585_v55 = vrot.slane %v5745_v29, 1 }
0x1865   :  { %1485 = vrot.lane.b32.xlu1 %v1484_v31, %s5301_s4 }
0x18d7   :  { %v1486_v14 = vpop.permute.xlu1 %1485 }
0x18d8   :  { %4525 = vmatmul.mubr.msk.f32.vlgmr.msra.gmra.mrb[12].mxu1 %vm117_vm1, %v1486_v14 }
0x18d9   :  { %4883 = vmatpush3.bf16.msra.mxu1 %v5648_v43  ;;  %4546 = vmatprep.mubr.msk.f32.mxu1 %vm5298_vm0, %v5299_v1 }
0x18da   :  { %4884 = vmatprep.subr.bf16.mxu1 %v5297_v0 }
0x18dd   :  { %4886 = vmatpush3.bf16.msra.mxu1 %v5658_v48 }
0x18de   :  { %4893 = vmatprep.subr.bf16.mxu1 %v5297_v0 }
0x19ab   :  { %v1555_v32 = vpop.f32.mrb[12].mxu1 }
0x19ac   :  { %v1556_v34 = vadd.f32 %v1555_v32, %v5677_v54  ;;  %v4526_v35 = vpop.f32.mrb[13].mxu1 }
0x19ae   :  { %v1560_v36 = vrot.slane %v1556_v34, 4 }
0x19b0   :  { %1569 = vrot.lane.b32.xlu0 %v1560_v36, %s5300_s29  ;;  %v1562_v38 = vadd.f32 %v1560_v36, %v5686_v61 }
0x19b2   :  { %v4138_v40 = vmul.f32 -1.442695, %v1562_v38 }
0x19b4   :  { %5089 = vpow2.f32 %v4138_v40 }
0x19be   :  { %v5090_v41 = vpop.eup %5089 }
0x19bf   :  { %v1566_v42 = vadd.f32 1.0, %v5090_v41 }
0x19c1   :  { %5091 = vrcp.f32 %v1566_v42 }
0x19cb   :  { %v5092_v45 = vpop.eup %5091 }
0x19cc   :  { %v1579_v52 = vsub.f32 1.0, %v5092_v45  ;;  %v1587_v57 = vmul.f32 %v5092_v45, %v1585_v55 }
0x1a22   :  { %v1570_v46 = vpop.permute.xlu0 %1569 }
0x1a23   :  { %v1572_v47 = vmul.f32 %v5092_v45, %v1570_v46 }
0x1a25   :  { %1574 = vrot.lane.b32.xlu1 %v1572_v47, %s5300_s29 }
0x1a97   :  { %v1575_v49 = vpop.permute.xlu1 %1574 }
0x1a98   :  { %v1577_v50 = vadd.f32 %v1575_v49, %v5686_v61 }
0x1a9a   :  { %5093 = vtanh.f32 %v1577_v50 }
0x1aa4   :  { %v5094_v51 = vpop.eup %5093 }
0x1aa5   :  { %1581 = vrot.lane.b32.xlu0 %v5094_v51, %s5301_s4 }
0x1b17   :  { %v1582_v56 = vpop.permute.xlu0 %1581 }
0x1b18   :  { %v1584_v58 = vmul.f32 %v1582_v56, %v1579_v52 }
0x1b1a   :  { %v5763_v59 = vadd.f32 %v1587_v57, %v1584_v58 }
0x1b1c   :  { %v1594_v17 = vrot.slane %v5763_v59, 4  ;;  %v1695_v20 = vrot.slane %v5763_v59, 1 }
0x1b1e   :  { %1595 = vrot.lane.b32.xlu1 %v1594_v17, %s5301_s4 }
0x1b90   :  { %v1596_v60 = vpop.permute.xlu1 %1595 }
0x1b91   :  { %4536 = vmatmul.mubr.msk.f32.vlgmr.msra.gmra.mrb[14].mxu0 %vm117_vm1, %v1596_v60 }
0x1b92   :  { %4889 = vmatpush3.bf16.msra.mxu0 %v5648_v43  ;;  %4557 = vmatprep.mubr.msk.f32.mxu0 %vm5298_vm0, %v5299_v1 }
0x1b93   :  { %4890 = vmatprep.subr.bf16.mxu0 %v5297_v0 }
0x1b96   :  { %4892 = vmatpush3.bf16.msra.mxu0 %v5658_v48 }
0x1b97   :  { %4899 = vmatprep.subr.bf16.mxu0 %v5297_v0 }
0x1c64   :  { %v1665_v62 = vpop.f32.mrb[14].mxu0 }
0x1c65   :  { %v1666_v63 = vadd.f32 %v1665_v62, %v5677_v54  ;;  %v4537_v3 = vpop.f32.mrb[15].mxu0 }
0x1c67   :  { %v1670_v5 = vrot.slane %v1666_v63, 5 }
0x1c69   :  { %1679 = vrot.lane.b32.xlu0 %v1670_v5, %s5300_s29  ;;  %v1672_v6 = vadd.f32 %v1670_v5, %v5686_v61 }
0x1c6b   :  { %v4140_v7 = vmul.f32 -1.442695, %v1672_v6 }
0x1c6d   :  { %5095 = vpow2.f32 %v4140_v7 }
0x1c77   :  { %v5096_v8 = vpop.eup %5095 }
0x1c78   :  { %v1676_v9 = vadd.f32 1.0, %v5096_v8 }
0x1c7a   :  { %5097 = vrcp.f32 %v1676_v9 }
0x1c84   :  { %v5098_v10 = vpop.eup %5097 }
0x1c85   :  { %v1689_v19 = vsub.f32 1.0, %v5098_v10  ;;  %v1697_v23 = vmul.f32 %v5098_v10, %v1695_v20 }
0x1cdb   :  { %v1680_v12 = vpop.permute.xlu0 %1679 }
0x1cdc   :  { %v1682_v44 = vmul.f32 %v5098_v10, %v1680_v12 }
0x1cde   :  { %1684 = vrot.lane.b32.xlu1 %v1682_v44, %s5300_s29 }
0x1d50   :  { %v1685_v13 = vpop.permute.xlu1 %1684 }
0x1d51   :  { %v1687_v15 = vadd.f32 %v1685_v13, %v5686_v61 }
0x1d53   :  { %5099 = vtanh.f32 %v1687_v15 }
0x1d5d   :  { %v5100_v18 = vpop.eup %5099 }
0x1d5e   :  { %1691 = vrot.lane.b32.xlu0 %v5100_v18, %s5301_s4 }
0x1dd0   :  { %v1692_v21 = vpop.permute.xlu0 %1691 }
0x1dd1   :  { %v1694_v24 = vmul.f32 %v1692_v21, %v1689_v19  ;;  %v5221_v21 = vld [vmem:[%s6381_s22] sm:$0x1] }
0x1dd3   :  { %v5781_v25 = vadd.f32 %v1697_v23, %v1694_v24  ;;  %v1117_v23 = vadd.f32 %v5221_v21, %v5718_v37 }
0x1dd5   :  { %v1704_v26 = vrot.slane %v5781_v25, 3  ;;  %v1805_v47 = vrot.slane %v5781_v25, 1 }
0x1dd7   :  { %1705 = vrot.lane.b32.xlu1 %v1704_v26, %s5301_s4  ;;  %v1121_v26 = vrot.slane %v1117_v23, 1 }
0x1e49   :  { %v1706_v11 = vpop.permute.xlu1 %1705 }
0x1e4a   :  { %4547 = vmatmul.mubr.msk.f32.vlgmr.msra.gmra.mrb[14].mxu1 %vm117_vm1, %v1706_v11  ;;  %v1123_v11 = vadd.f32 %v1121_v26, %v5522_v22 }
0x1e4b   :  { %4895 = vmatpush3.bf16.msra.mxu1 %v5648_v43  ;;  %4568 = vmatprep.mubr.msk.f32.mxu1 %vm5298_vm0, %v5299_v1 }
0x1e4c   :  { %4896 = vmatprep.subr.bf16.mxu1 %v5297_v0 }
0x1e4f   :  { %4898 = vmatpush3.bf16.msra.mxu1 %v5658_v48 }
0x1e50   :  { %4905 = vmatprep.subr.bf16.mxu1 %v5297_v0 }
0x1f1d   :  { %v1775_v28 = vpop.f32.mrb[14].mxu1 }
0x1f1e   :  { %v1776_v31 = vadd.f32 %v1775_v28, %v5677_v54  ;;  %v4548_v14 = vpop.f32.mrb[15].mxu1  ;;  %v4131_v28 = vmul.f32 -1.442695, %v1123_v11 }
0x1f20   :  { %v1780_v32 = vrot.slane %v1776_v31, 6 }
0x1f22   :  { %1789 = vrot.lane.b32.xlu0 %v1780_v32, %s5300_s29  ;;  %v1782_v34 = vadd.f32 %v1780_v32, %v5686_v61 }
0x1f24   :  { %v4142_v35 = vmul.f32 -1.442695, %v1782_v34 }
0x1f26   :  { %5101 = vpow2.f32 %v4142_v35 }
0x1f30   :  { %v5102_v43 = vpop.eup %5101 }
0x1f31   :  { %v1786_v36 = vadd.f32 1.0, %v5102_v43 }
0x1f33   :  { %5103 = vrcp.f32 %v1786_v36 }
0x1f3d   :  { %v5104_v38 = vpop.eup %5103 }
0x1f3e   :  { %v1799_v46 = vsub.f32 1.0, %v5104_v38  ;;  %v1807_v50 = vmul.f32 %v5104_v38, %v1805_v47 }
0x1f94   :  { %v1790_v40 = vpop.permute.xlu0 %1789 }
0x1f95   :  { %v1792_v41 = vmul.f32 %v5104_v38, %v1790_v40 }
0x1f97   :  { %1794 = vrot.lane.b32.xlu1 %v1792_v41, %s5300_s29 }
0x2009   :  { %v1795_v48 = vpop.permute.xlu1 %1794 }
0x200a   :  { %v1797_v42 = vadd.f32 %v1795_v48, %v5686_v61 }
0x200c   :  { %5105 = vtanh.f32 %v1797_v42 }
0x2016   :  { %v5106_v45 = vpop.eup %5105 }
0x2017   :  { %1801 = vrot.lane.b32.xlu0 %v5106_v45, %s5301_s4 }
0x2089   :  { %v1802_v49 = vpop.permute.xlu0 %1801 }
0x208a   :  { %v1804_v51 = vmul.f32 %v1802_v49, %v1799_v46 }
0x208c   :  { %v1808_v52 = vadd.f32 %v1807_v50, %v1804_v51 }
0x208e   :  { %v1814_v55 = vrot.slane %v1808_v52, 2  ;;  %v1915_v13 = vrot.slane %v1808_v52, 1 }
0x2090   :  { %1815 = vrot.lane.b32.xlu1 %v1814_v55, %s5301_s4 }
0x2102   :  { %v1816_v56 = vpop.permute.xlu1 %1815 }
0x2103   :  { %4558 = vmatmul.mubr.msk.f32.vlgmr.msra.gmra.mrb[16].mxu0 %vm117_vm1, %v1816_v56 }
0x2104   :  { %4579 = vmatprep.mubr.msk.f32.mxu0 %vm5298_vm0, %v5299_v1 }
0x21d6   :  { %v1885_v57 = vpop.f32.mrb[16].mxu0 }
0x21d7   :  { %v1886_v58 = vadd.f32 %v1885_v57, %v5677_v54  ;;  %v4559_v17 = vpop.f32.mrb[17].mxu0  ;;  %v1146_v57 = vrot.slane %v5696_v27, 7 }
0x21d9   :  { %v1890_v60 = vrot.slane %v1886_v58, 7 }
0x21db   :  { %1899 = vrot.lane.b32.xlu0 %v1890_v60, %s5300_s29  ;;  %v1892_v62 = vadd.f32 %v1890_v60, %v5686_v61 }
0x21dd   :  { %v4144_v63 = vmul.f32 -1.442695, %v1892_v62 }
0x21df   :  { %5107 = vpow2.f32 %v4144_v63 }
0x21e9   :  { %v5108_v3 = vpop.eup %5107 }
0x21ea   :  { %v1896_v5 = vadd.f32 1.0, %v5108_v3 }
0x21ec   :  { %5109 = vrcp.f32 %v1896_v5 }
0x21f6   :  { %v5110_v6 = vpop.eup %5109 }
0x21f7   :  { %v1909_v44 = vsub.f32 1.0, %v5110_v6  ;;  %v1917_v18 = vmul.f32 %v5110_v6, %v1915_v13 }
0x224d   :  { %v1900_v7 = vpop.permute.xlu0 %1899 }
0x224e   :  { %v1902_v8 = vmul.f32 %v5110_v6, %v1900_v7  ;;  %v2033_v6 = vld [vmem:[%s6358_s9] sm:$0xff]  ;;  %v2034_v7 = vld [vmem:[%s6358_s9 + $0x8] sm:$0xff] }
0x2250   :  { %1904 = vrot.lane.b32.xlu1 %v1902_v8, %s5300_s29 }
0x22c2   :  { %v1905_v9 = vpop.permute.xlu1 %1904 }
0x22c3   :  { %v1907_v10 = vadd.f32 %v1905_v9, %v5686_v61  ;;  %v4906_v9 = vpack.c.bf16 %v2034_v7, %v2033_v6 }
0x22c5   :  { %5111 = vtanh.f32 %v1907_v10 }
0x22c6   :  { %5113 = vpow2.f32 %v4131_v28  ;;  %v2201_v28 = vld [vmem:[#allocation6 + $0x10] sm:$0xff] }
0x22cf   :  { %v5112_v12 = vpop.eup %5111 }
0x22d0   :  { %1911 = vrot.lane.b32.xlu0 %v5112_v12, %s5301_s4  ;;  %v5114_v31 = vpop.eup %5113  ;;  %v2035_v12 = vld [vmem:[%s6358_s9 + $0x10] sm:$0xff] }
0x22d1   :  { %v1127_v14 = vadd.f32 1.0, %v5114_v31  ;;  %v2202_v31 = vld [vmem:[#allocation6 + $0x18] sm:$0xff] }
0x22d3   :  { %5115 = vrcp.f32 %v1127_v14 }
0x22dd   :  { %v5116_v37 = vpop.eup %5115 }
0x2342   :  { %v1912_v15 = vpop.permute.xlu0 %1911 }
0x2343   :  { %v1914_v19 = vmul.f32 %v1912_v15, %v1909_v44  ;;  %v2036_v44 = vld [vmem:[%s6358_s9 + $0x18] sm:$0xff] }
0x2344   :  { %v4909_v13 = vpack.c.bf16 %v2036_v44, %v2035_v12 }
0x2345   :  { %v5809_v20 = vadd.f32 %v1917_v18, %v1914_v19 }
0x2347   :  { %v1924_v24 = vrot.slane %v5809_v20, 1 }
0x2349   :  { %1925 = vrot.lane.b32.xlu1 %v1924_v24, %s5301_s4 }
0x234d   :  { %1130 = vrot.lane.b32.xlu1 %v1121_v26, %s5300_s29 }
0x23bb   :  { %v1926_v32 = vpop.permute.xlu1 %1925 }
0x23bc   :  { %4569 = vmatmul.mubr.msk.f32.vlgmr.msra.gmra.mrb[16].mxu1 %vm117_vm1, %v1926_v32 }
0x23bd   :  { %4590 = vmatprep.mubr.msk.f32.mxu1 %vm5298_vm0, %v5299_v1  ;;  %4907 = vmatpush3.bf16.msra.mxu1 %v4906_v9 }
0x23be   :  { %4908 = vmatprep.subr.bf16.mxu1 %v5297_v0 }
0x23bf   :  { %v1131_v34 = vpop.permute.xlu1 %1130 }
0x23c0   :  { %v1133_v35 = vmul.f32 %v5116_v37, %v1131_v34  ;;  %v2351_v34 = vld [vmem:[%s6360_s11] sm:$0xff] }
0x23c1   :  { %4910 = vmatpush3.bf16.msra.mxu1 %v4909_v13 }
0x23c2   :  { %1135 = vrot.lane.b32.xlu1 %v1133_v35, %s5300_s29  ;;  %4917 = vmatprep.subr.bf16.mxu1 %v5297_v0  ;;  %v2352_v35 = vld [vmem:[%s6360_s11 + $0x8] sm:$0xff] }
0x2434   :  { %v1136_v43 = vpop.permute.xlu1 %1135 }
0x2435   :  { %v1138_v36 = vadd.f32 %v1136_v43, %v5522_v22 }
0x2437   :  { %5117 = vtanh.f32 %v1138_v36  ;;  %v5924_v36 = vpack.c.bf16 %v2352_v35, %v2351_v34 }
0x2441   :  { %v5118_v38 = vpop.eup %5117 }
0x2442   :  { %1142 = vrot.lane.b32.xlu1 %v5118_v38, %s5301_s4  ;;  %v2195_v38 = vld [vmem:[#allocation4] sm:$0xff] }
0x2446   :  { %1370 = vrot.lane.b32.xlu1 %v5727_v2, %s5301_s4 }
0x244a   :  { %1590 = vrot.lane.b32.xlu1 %v5763_v59, %s5301_s4 }
0x244e   :  { %1810 = vrot.lane.b32.xlu1 %v1808_v52, %s5301_s4 }
0x248f   :  { %v1995_v40 = vpop.f32.mrb[16].mxu1 }
0x2490   :  { %v1996_v41 = vadd.f32 %v1995_v40, %v5677_v54  ;;  %v4570_v48 = vpop.f32.mrb[17].mxu1  ;;  %v2196_v40 = vld [vmem:[#allocation4 + $0x8] sm:$0xff] }
0x2491   :  { %v2354_v48 = vld [vmem:[%s6360_s11 + $0x18] sm:$0xff] }
0x2492   :  { %2007 = vrot.lane.b32.xlu0 %v1996_v41, %s5300_s29  ;;  %v1999_v59 = vadd.f32 %v1996_v41, %v5686_v61  ;;  %v2353_v41 = vld [vmem:[%s6360_s11 + $0x10] sm:$0xff] }
0x2494   :  { %v4146_v46 = vmul.f32 -1.442695, %v1999_v59 }
0x2496   :  { %5119 = vpow2.f32 %v4146_v46 }
0x24a0   :  { %v5120_v54 = vpop.eup %5119 }
0x24a1   :  { %v2003_v47 = vadd.f32 1.0, %v5120_v54 }
0x24a3   :  { %5121 = vrcp.f32 %v2003_v47 }
0x24ad   :  { %v5122_v49 = vpop.eup %5121 }
0x24ae   :  { %v2017_v62 = vsub.f32 1.0, %v5122_v49  ;;  %v2024_v3 = vmul.f32 %v5122_v49, %v1924_v24  ;;  %v2200_v24 = vld [vmem:[#allocation6 + $0x8] sm:$0xff] }
0x24b4   :  { %v1143_v42 = vpop.permute.xlu1 %1142 }
0x24b8   :  { %v1371_v22 = vpop.permute.xlu1 %1370 }
0x24b9   :  { %1373 = vst.msk [vmem:[#allocation3] sm:$0x40] %vm1043_vm3, %v1371_v22  ;;  %v5935_v22 = vpack.c.bf16 %v2354_v48, %v2353_v41 }
0x24bc   :  { %v1591_v45 = vpop.permute.xlu1 %1590 }
0x24bd   :  { %1593 = vst.msk [vmem:[#allocation3] sm:$0x10] %vm821_vm4, %v1591_v45  ;;  %v2197_v45 = vld [vmem:[#allocation4 + $0x10] sm:$0xff] }
0x24c0   :  { %v1811_v2 = vpop.permute.xlu1 %1810 }
0x24c1   :  { %1813 = vst.msk [vmem:[#allocation3] sm:$0x4] %vm599_vm5, %v1811_v2  ;;  %v2198_v2 = vld [vmem:[#allocation4 + $0x18] sm:$0xff] }
0x24c2   :  { %v4921_v46 = vpack.c.bf16 %v2198_v2, %v2197_v45 }
0x2504   :  { %v2008_v50 = vpop.permute.xlu0 %2007 }
0x2505   :  { %v2010_v51 = vmul.f32 %v5122_v49, %v2008_v50 }
0x2507   :  { %2012 = vrot.lane.b32.xlu0 %v2010_v51, %s5300_s29 }
0x2579   :  { %v2013_v52 = vpop.permute.xlu0 %2012 }
0x257a   :  { %v2015_v55 = vadd.f32 %v2013_v52, %v5686_v61  ;;  %v1140_v61 = vsub.f32 1.0, %v5116_v37 }
0x257c   :  { %5123 = vtanh.f32 %v2015_v55  ;;  %v1145_v58 = vmul.f32 %v1143_v42, %v1140_v61  ;;  %v4918_v42 = vpack.c.bf16 %v2196_v40, %v2195_v38 }
0x2586   :  { %v5124_v56 = vpop.eup %5123 }
0x2587   :  { %2019 = vrot.lane.b32.xlu0 %v5124_v56, %s5301_s4  ;;  %v5964_v56 = vld [vmem:[%s6362_s13] sm:$0x1] }
0x258b   :  { %1260 = vrot.lane.b32.xlu0 %v5700_v33, %s5301_s4  ;;  %v1148_v33 = vmul.f32 %v5116_v37, %v1146_v57  ;;  %v4915_v37 = vpack.c.bf16 %v2202_v31, %v2201_v28 }
0x258f   :  { %1480 = vrot.lane.b32.xlu0 %v5745_v29, %s5301_s4  ;;  %v1149_v29 = vadd.f32 %v1148_v33, %v1145_v58 }
0x2593   :  { %1700 = vrot.lane.b32.xlu0 %v5781_v25, %s5301_s4  ;;  %v2037_v25 = vld [vmem:[%s6359_s10] sm:$0xff] }
0x2597   :  { %1920 = vrot.lane.b32.xlu0 %v5809_v20, %s5301_s4 }
0x259b   :  { %485 = vrot.lane.b32.xlu0 %v5566_v4, %s5301_s4  ;;  %v2038_v4 = vld [vmem:[%s6359_s10 + $0x8] sm:$0xff] }
0x259c   :  { %v4900_v17 = vpack.c.bf16 %v2038_v4, %v2037_v25  ;;  %v4149_v4 = vld [vmem:[%s6361_s12] ss:$0 sm:$0xff] }
0x259e   :  { %4901 = vmatpush3.bf16.msra.mxu0 %v4900_v17 }
0x259f   :  { %707 = vrot.lane.b32.xlu0 %v5602_v53, %s5301_s4  ;;  %4902 = vmatprep.subr.bf16.mxu0 %v5297_v0  ;;  %v2039_v53 = vld [vmem:[%s6359_s10 + $0x10] sm:$0xff] }
0x25a3   :  { %929 = vrot.lane.b32.xlu0 %v5638_v39, %s5301_s4  ;;  %v2040_v39 = vld [vmem:[%s6359_s10 + $0x18] sm:$0xff] }
0x25a4   :  { %v4903_v60 = vpack.c.bf16 %v2040_v39, %v2039_v53 }
0x25a6   :  { %4904 = vmatpush3.bf16.msra.mxu0 %v4903_v60 }
0x25a7   :  { %1151 = vrot.lane.b32.xlu0 %v1149_v29, %s5301_s4  ;;  %4911 = vmatprep.subr.bf16.mxu0 %v5297_v0 }
0x25f9   :  { %v2020_v63 = vpop.permute.xlu0 %2019 }
0x25fa   :  { %v2022_v5 = vmul.f32 %v2020_v63, %v2017_v62 }
0x25fc   :  { %v2025_v8 = vadd.f32 %v2024_v3, %v2022_v5 }
0x25fd   :  { %v1261_v10 = vpop.permute.xlu0 %1260 }
0x25fe   :  { %1263 = vst.msk [vmem:[#allocation3] sm:$0x80] %vm1154_vm6, %v1261_v10  ;;  %2027 = vrot.lane.b32.xlu1 %v2025_v8, %s5301_s4 }
0x2601   :  { %v1481_v15 = vpop.permute.xlu0 %1480 }
0x2602   :  { %1483 = vst.msk [vmem:[#allocation3] sm:$0x20] %vm932_vm7, %v1481_v15  ;;  %596 = vrot.lane.b32.xlu1 %v5584_v30, %s5301_s4 }
0x2605   :  { %v1701_v18 = vpop.permute.xlu0 %1700 }
0x2606   :  { %1703 = vst.msk [vmem:[#allocation3] sm:$0x8] %vm710_vm8, %v1701_v18  ;;  %818 = vrot.lane.b32.xlu1 %v5620_v16, %s5301_s4 }
0x2609   :  { %v1921_v19 = vpop.permute.xlu0 %1920 }
0x260a   :  { %1923 = vst.msk [vmem:[#allocation3] sm:$0x2] %vm488_vm9, %v1921_v19  ;;  %1040 = vrot.lane.b32.xlu1 %v5696_v27, %s5301_s4  ;;  %v2199_v27 = vld [vmem:[#allocation6] sm:$0xff] }
0x260b   :  { %v4912_v11 = vpack.c.bf16 %v2200_v24, %v2199_v27 }
0x260d   :  { %v486_v20 = vpop.permute.xlu0 %485 }
0x260e   :  { %489 = vst.msk [vmem:[#allocation2] sm:$0x2] %vm488_vm9, %v486_v20 }
0x2611   :  { %v708_v30 = vpop.permute.xlu0 %707 }
0x2612   :  { %711 = vst.msk [vmem:[#allocation2] sm:$0x8] %vm710_vm8, %v708_v30 }
0x2615   :  { %v930_v21 = vpop.permute.xlu0 %929 }
0x2616   :  { %933 = vst.msk [vmem:[#allocation2] sm:$0x20] %vm932_vm7, %v930_v21 }
0x2619   :  { %v1152_v23 = vpop.permute.xlu0 %1151 }
0x261a   :  { %1155 = vst.msk [vmem:[#allocation2] sm:$0x80] %vm1154_vm6, %v1152_v23  ;;  %4101 = vst.msk [vmem:[%s6369_s20 - $0x7] sm:$0x80] %vm1154_vm6, %v1152_v23 }
0x2670   :  { %v2028_v16 = vpop.permute.xlu1 %2027 }
0x2671   :  { %2030 = vst.msk [vmem:[#allocation3] sm:$0x1] %vm380_vm2, %v2028_v16  ;;  %4102 = vst.msk [vmem:[%s6369_s20 + $0x1] sm:$0x1] %vm380_vm2, %v2028_v16 }
0x2674   :  { %v597_v26 = vpop.permute.xlu1 %596 }
0x2675   :  { %600 = vst.msk [vmem:[#allocation2] sm:$0x4] %vm599_vm5, %v597_v26 }
0x2678   :  { %v819_v14 = vpop.permute.xlu1 %818  ;;  %v2032_v32 = vld [vmem:[#allocation3] sm:$0xff] }
0x2679   :  { %822 = vst.msk [vmem:[#allocation2] sm:$0x10] %vm821_vm4, %v819_v14  ;;  %4580 = vmatmul.mubr.msk.f32.vlgmr.msra.gmra.mrb[18].mxu0 %vm117_vm1, %v2032_v32 }
0x267a   :  { %4913 = vmatpush3.bf16.msra.mxu0 %v4912_v11  ;;  %4601 = vmatprep.mubr.msk.f32.mxu0 %vm5298_vm0, %v5299_v1 }
0x267b   :  { %4914 = vmatprep.subr.bf16.mxu0 %v5297_v0 }
0x267c   :  { %v1041_v43 = vpop.permute.xlu1 %1040 }
0x267d   :  { %1044 = vst.msk [vmem:[#allocation2] sm:$0x40] %vm1043_vm3, %v1041_v43 }
0x267e   :  { %4916 = vmatpush3.bf16.msra.mxu0 %v4915_v37 }
0x267f   :  { %4923 = vmatprep.subr.bf16.mxu0 %v5297_v0 }
0x2681   :  { %4602 = vmatmul.mubr.msk.f32.vlgmr.msra.gmra.mrb[20].mxu0 %vm117_vm1, %v2032_v32 }
0x2682   :  { %4925 = vmatpush3.bf16.msra.mxu0 %v5924_v36  ;;  %4623 = vmatprep.mubr.msk.f32.mxu0 %vm5298_vm0, %v5299_v1 }
0x2683   :  { %4926 = vmatprep.subr.bf16.mxu0 %v5297_v0 }
0x2684   :  { %v2031_v59 = vld [vmem:[#allocation2] sm:$0xff] }
0x2685   :  { %4591 = vmatmul.mubr.msk.f32.vlgmr.msra.gmra.mrb[18].mxu1 %vm117_vm1, %v2031_v59 }
0x2686   :  { %4919 = vmatpush3.bf16.msra.mxu1 %v4918_v42  ;;  %4928 = vmatpush3.bf16.msra.mxu0 %v5935_v22 }
0x2687   :  { %4920 = vmatprep.subr.bf16.mxu1 %v5297_v0  ;;  %4612 = vmatprep.mubr.msk.f32.mxu1 %vm5298_vm0, %v5299_v1 }
0x2688   :  { %4935 = vmatprep.subr.bf16.mxu0 %v5297_v0 }
0x2689   :  { %4624 = vmatmul.mubr.f32.vlgmr.msra.gmra.mrb[22].mxu0 %v5299_v1 }
0x268a   :  { %4922 = vmatpush3.bf16.msra.mxu1 %v4921_v46  ;;  %4937 = vmatpush3.bf16.msra.mxu0 %v5924_v36 }
0x268b   :  { %4929 = vmatprep.subr.bf16.mxu1 %v5297_v0  ;;  %4938 = vmatprep.subr.bf16.mxu0 %v5297_v0 }
0x268c   :  { %4645 = vmatprep.mubr.msk.f32.mxu0 %vm5298_vm0, %v5299_v1 }
0x268d   :  { %4613 = vmatmul.mubr.msk.f32.vlgmr.msra.gmra.mrb[20].mxu1 %vm117_vm1, %v2031_v59 }
0x268e   :  { %4931 = vmatpush3.bf16.msra.mxu1 %v5924_v36  ;;  %4634 = vmatprep.mubr.msk.f32.mxu1 %vm5298_vm0, %v5299_v1 }
0x268f   :  { %4932 = vmatprep.subr.bf16.mxu1 %v5297_v0  ;;  %4940 = vmatpush3.bf16.msra.mxu0 %v5935_v22 }
0x2690   :  { %4947 = vmatprep.subr.bf16.mxu0 %v5297_v0 }
0x2692   :  { %4934 = vmatpush3.bf16.msra.mxu1 %v5935_v22 }
0x2693   :  { %4941 = vmatprep.subr.bf16.mxu1 %v5297_v0 }
0x274c   :  { %v2110_v54 = vpop.f32.mrb[18].mxu0 }
0x274d   :  { %v4581_v47 = vpop.f32.mrb[19].mxu0 }
0x2754   :  { %v2269_v49 = vpop.f32.mrb[20].mxu0 }
0x2755   :  { %v4603_v50 = vpop.f32.mrb[21].mxu0 }
0x2758   :  { %v2183_v51 = vpop.f32.mrb[18].mxu1 }
0x2759   :  { %v2184_v52 = vadd.f32 %v2183_v51, %v2110_v54  ;;  %v4592_v55 = vpop.f32.mrb[19].mxu1 }
0x275b   :  { %v5973_v17 = vadd.f32 %v4149_v4, %v2184_v52 }
0x275c   :  { %v2422_v61 = vpop.f32.mrb[22].mxu0 }
0x275d   :  { %v2423_v57 = vadd.f32 %v2422_v61, %v5964_v56  ;;  %v4625_v58 = vpop.f32.mrb[23].mxu0 }
0x275f   :  { %2434 = vrot.lane.b32.xlu1 %v2423_v57, %s5300_s29  ;;  %v2426_v53 = vadd.f32 %v2423_v57, %v5973_v17 }
0x2760   :  { %v2339_v33 = vpop.f32.mrb[20].mxu1 }
0x2761   :  { %v5968_v29 = vadd.f32 %v2339_v33, %v2269_v49  ;;  %v4614_v25 = vpop.f32.mrb[21].mxu1  ;;  %v4153_v39 = vmul.f32 -1.442695, %v2426_v53 }
0x2763   :  { %5125 = vpow2.f32 %v4153_v39 }
0x276d   :  { %v5126_v60 = vpop.eup %5125 }
0x276e   :  { %v2430_v62 = vadd.f32 1.0, %v5126_v60 }
0x2770   :  { %5127 = vrcp.f32 %v2430_v62 }
0x277a   :  { %v5128_v63 = vpop.eup %5127 }
0x277b   :  { %v2444_v9 = vsub.f32 1.0, %v5128_v63  ;;  %v2450_v12 = vmul.f32 0.0, %v5128_v63 }
0x27d1   :  { %v2435_v3 = vpop.permute.xlu1 %2434 }
0x27d2   :  { %v2437_v5 = vmul.f32 %v5128_v63, %v2435_v3 }
0x27d4   :  { %2439 = vrot.lane.b32.xlu0 %v2437_v5, %s5300_s29 }
0x2846   :  { %v2440_v6 = vpop.permute.xlu0 %2439 }
0x2847   :  { %v2442_v7 = vadd.f32 %v2440_v6, %v5973_v17 }
0x2849   :  { %5129 = vtanh.f32 %v2442_v7 }
0x2853   :  { %v5130_v8 = vpop.eup %5129 }
0x2854   :  { %2446 = vrot.lane.b32.xlu1 %v5130_v8, %s5301_s4 }
0x28c6   :  { %v2447_v10 = vpop.permute.xlu1 %2446 }
0x28c7   :  { %v2449_v44 = vmul.f32 %v2447_v10, %v2444_v9 }
0x28c9   :  { %v2451_v13 = vadd.f32 %v2450_v12, %v2449_v44 }
0x28cb   :  { %2453 = vrot.lane.b32.xlu0 %v2451_v13, %s5301_s4  ;;  %v2555_v32 = vrot.slane %v2451_v13, 7 }
0x293d   :  { %v2454_v15 = vpop.permute.xlu0 %2453 }
0x293e   :  { %2456 = vst.msk [vmem:[%s6368_s19] sm:$0x1] %vm380_vm2, %v2454_v15  ;;  %4635 = vmatmul.mubr.msk.f32.vlgmr.msra.gmra.mrb[22].mxu1 %vm117_vm1, %v2454_v15 }
0x293f   :  { %4943 = vmatpush3.bf16.msra.mxu1 %v5924_v36  ;;  %4656 = vmatprep.mubr.msk.f32.mxu1 %vm5298_vm0, %v5299_v1 }
0x2940   :  { %4944 = vmatprep.subr.bf16.mxu1 %v5297_v0 }
0x2943   :  { %4946 = vmatpush3.bf16.msra.mxu1 %v5935_v22 }
0x2944   :  { %4953 = vmatprep.subr.bf16.mxu1 %v5297_v0 }
0x2a11   :  { %v2525_v18 = vpop.f32.mrb[22].mxu1 }
0x2a12   :  { %v2526_v19 = vadd.f32 %v2525_v18, %v5964_v56  ;;  %v4636_v20 = vpop.f32.mrb[23].mxu1 }
0x2a14   :  { %v2530_v30 = vrot.slane %v2526_v19, 7 }
0x2a16   :  { %2539 = vrot.lane.b32.xlu1 %v2530_v30, %s5300_s29  ;;  %v2532_v21 = vadd.f32 %v2530_v30, %v5973_v17 }
0x2a18   :  { %v4155_v23 = vmul.f32 -1.442695, %v2532_v21 }
0x2a1a   :  { %5131 = vpow2.f32 %v4155_v23 }
0x2a24   :  { %v5132_v16 = vpop.eup %5131 }
0x2a25   :  { %v2536_v27 = vadd.f32 1.0, %v5132_v16 }
0x2a27   :  { %5133 = vrcp.f32 %v2536_v27 }
0x2a31   :  { %v5134_v24 = vpop.eup %5133 }
0x2a32   :  { %v2549_v37 = vsub.f32 1.0, %v5134_v24  ;;  %v2557_v43 = vmul.f32 %v5134_v24, %v2555_v32 }
0x2a88   :  { %v2540_v26 = vpop.permute.xlu1 %2539 }
0x2a89   :  { %v2542_v11 = vmul.f32 %v5134_v24, %v2540_v26 }
0x2a8b   :  { %2544 = vrot.lane.b32.xlu0 %v2542_v11, %s5300_s29 }
0x2afd   :  { %v2545_v28 = vpop.permute.xlu0 %2544 }
0x2afe   :  { %v2547_v31 = vadd.f32 %v2545_v28, %v5973_v17 }
0x2b00   :  { %5135 = vtanh.f32 %v2547_v31 }
0x2b0a   :  { %v5136_v14 = vpop.eup %5135 }
0x2b0b   :  { %2551 = vrot.lane.b32.xlu1 %v5136_v14, %s5301_s4 }
0x2b7d   :  { %v2552_v34 = vpop.permute.xlu1 %2551 }
0x2b7e   :  { %v2554_v35 = vmul.f32 %v2552_v34, %v2549_v37 }
0x2b80   :  { %v5997_v38 = vadd.f32 %v2557_v43, %v2554_v35 }
0x2b82   :  { %v2564_v40 = vrot.slane %v5997_v38, 1  ;;  %v2665_v58 = vrot.slane %v5997_v38, 7 }
0x2b84   :  { %2565 = vrot.lane.b32.xlu0 %v2564_v40, %s5301_s4 }
0x2bf6   :  { %v2566_v41 = vpop.permute.xlu0 %2565 }
0x2bf7   :  { %4646 = vmatmul.mubr.msk.f32.vlgmr.msra.gmra.mrb[24].mxu0 %vm117_vm1, %v2566_v41 }
0x2bf8   :  { %4949 = vmatpush3.bf16.msra.mxu0 %v5924_v36  ;;  %4667 = vmatprep.mubr.msk.f32.mxu0 %vm5298_vm0, %v5299_v1 }
0x2bf9   :  { %4950 = vmatprep.subr.bf16.mxu0 %v5297_v0 }
0x2bfc   :  { %4952 = vmatpush3.bf16.msra.mxu0 %v5935_v22 }
0x2bfd   :  { %4959 = vmatprep.subr.bf16.mxu0 %v5297_v0 }
0x2cca   :  { %v2635_v48 = vpop.f32.mrb[24].mxu0 }
0x2ccb   :  { %v2636_v42 = vadd.f32 %v2635_v48, %v5964_v56  ;;  %v4647_v45 = vpop.f32.mrb[25].mxu0 }
0x2ccd   :  { %v2640_v2 = vrot.slane %v2636_v42, 6 }
0x2ccf   :  { %2649 = vrot.lane.b32.xlu1 %v2640_v2, %s5300_s29  ;;  %v2642_v59 = vadd.f32 %v2640_v2, %v5973_v17 }
0x2cd1   :  { %v4157_v46 = vmul.f32 -1.442695, %v2642_v59 }
0x2cd3   :  { %5137 = vpow2.f32 %v4157_v46 }
0x2cdd   :  { %v5138_v54 = vpop.eup %5137 }
0x2cde   :  { %v2646_v47 = vadd.f32 1.0, %v5138_v54 }
0x2ce0   :  { %5139 = vrcp.f32 %v2646_v47 }
0x2cea   :  { %v5140_v49 = vpop.eup %5139 }
0x2ceb   :  { %v2659_v57 = vsub.f32 1.0, %v5140_v49  ;;  %v2667_v25 = vmul.f32 %v5140_v49, %v2665_v58 }
0x2d41   :  { %v2650_v50 = vpop.permute.xlu1 %2649 }
0x2d42   :  { %v2652_v51 = vmul.f32 %v5140_v49, %v2650_v50 }
0x2d44   :  { %2654 = vrot.lane.b32.xlu0 %v2652_v51, %s5300_s29 }
0x2db6   :  { %v2655_v52 = vpop.permute.xlu0 %2654 }
0x2db7   :  { %v2657_v55 = vadd.f32 %v2655_v52, %v5973_v17 }
0x2db9   :  { %5141 = vtanh.f32 %v2657_v55 }
0x2dc3   :  { %v5142_v61 = vpop.eup %5141 }
0x2dc4   :  { %2661 = vrot.lane.b32.xlu1 %v5142_v61, %s5301_s4 }
0x2e36   :  { %v2662_v33 = vpop.permute.xlu1 %2661 }
0x2e37   :  { %v2664_v4 = vmul.f32 %v2662_v33, %v2659_v57 }
0x2e39   :  { %v6015_v53 = vadd.f32 %v2667_v25, %v2664_v4 }
0x2e3b   :  { %v2674_v39 = vrot.slane %v6015_v53, 2  ;;  %v2775_v20 = vrot.slane %v6015_v53, 7 }
0x2e3d   :  { %2675 = vrot.lane.b32.xlu0 %v2674_v39, %s5301_s4 }
0x2eaf   :  { %v2676_v60 = vpop.permute.xlu0 %2675 }
0x2eb0   :  { %4657 = vmatmul.mubr.msk.f32.vlgmr.msra.gmra.mrb[24].mxu1 %vm117_vm1, %v2676_v60 }
0x2eb1   :  { %4955 = vmatpush3.bf16.msra.mxu1 %v5924_v36  ;;  %4678 = vmatprep.mubr.msk.f32.mxu1 %vm5298_vm0, %v5299_v1 }
0x2eb2   :  { %4956 = vmatprep.subr.bf16.mxu1 %v5297_v0 }
0x2eb5   :  { %4958 = vmatpush3.bf16.msra.mxu1 %v5935_v22 }
0x2eb6   :  { %4965 = vmatprep.subr.bf16.mxu1 %v5297_v0 }
0x2f83   :  { %v2745_v62 = vpop.f32.mrb[24].mxu1 }
0x2f84   :  { %v2746_v63 = vadd.f32 %v2745_v62, %v5964_v56  ;;  %v4658_v3 = vpop.f32.mrb[25].mxu1 }
0x2f86   :  { %v2750_v5 = vrot.slane %v2746_v63, 5 }
0x2f88   :  { %2759 = vrot.lane.b32.xlu1 %v2750_v5, %s5300_s29  ;;  %v2752_v6 = vadd.f32 %v2750_v5, %v5973_v17 }
0x2f8a   :  { %v4159_v7 = vmul.f32 -1.442695, %v2752_v6 }
0x2f8c   :  { %5143 = vpow2.f32 %v4159_v7 }
0x2f96   :  { %v5144_v8 = vpop.eup %5143 }
0x2f97   :  { %v2756_v9 = vadd.f32 1.0, %v5144_v8 }
0x2f99   :  { %5145 = vrcp.f32 %v2756_v9 }
0x2fa3   :  { %v5146_v10 = vpop.eup %5145 }
0x2fa4   :  { %v2769_v19 = vsub.f32 1.0, %v5146_v10  ;;  %v2777_v21 = vmul.f32 %v5146_v10, %v2775_v20 }
0x2ffa   :  { %v2760_v12 = vpop.permute.xlu1 %2759 }
0x2ffb   :  { %v2762_v44 = vmul.f32 %v5146_v10, %v2760_v12  ;;  %v3224_v10 = vld [vmem:[#allocation8] sm:$0xff]  ;;  %v3225_v12 = vld [vmem:[#allocation8 + $0x8] sm:$0xff] }
0x2ffd   :  { %2764 = vrot.lane.b32.xlu0 %v2762_v44, %s5300_s29  ;;  %v6073_v44 = vpack.c.bf16 %v3225_v12, %v3224_v10 }
0x306f   :  { %v2765_v13 = vpop.permute.xlu0 %2764 }
0x3070   :  { %v2767_v15 = vadd.f32 %v2765_v13, %v5973_v17  ;;  %v3226_v13 = vld [vmem:[#allocation8 + $0x10] sm:$0xff] }
0x3072   :  { %5147 = vtanh.f32 %v2767_v15  ;;  %v3227_v15 = vld [vmem:[#allocation8 + $0x18] sm:$0xff] }
0x307c   :  { %v5148_v18 = vpop.eup %5147 }
0x307d   :  { %2771 = vrot.lane.b32.xlu1 %v5148_v18, %s5301_s4 }
0x30ef   :  { %v2772_v30 = vpop.permute.xlu1 %2771 }
0x30f0   :  { %v2774_v23 = vmul.f32 %v2772_v30, %v2769_v19  ;;  %v6077_v19 = vpack.c.bf16 %v3227_v15, %v3226_v13 }
0x30f2   :  { %v6033_v16 = vadd.f32 %v2777_v21, %v2774_v23 }
0x30f4   :  { %v2784_v27 = vrot.slane %v6033_v16, 3  ;;  %v2885_v2 = vrot.slane %v6033_v16, 7 }
0x30f6   :  { %2785 = vrot.lane.b32.xlu0 %v2784_v27, %s5301_s4  ;;  %v6096_v27 = vld [vmem:[%s6367_s18] sm:$0x1] }
0x3168   :  { %v2786_v24 = vpop.permute.xlu0 %2785 }
0x3169   :  { %4668 = vmatmul.mubr.msk.f32.vlgmr.msra.gmra.mrb[26].mxu0 %vm117_vm1, %v2786_v24 }
0x316a   :  { %4961 = vmatpush3.bf16.msra.mxu0 %v5924_v36  ;;  %4689 = vmatprep.mubr.msk.f32.mxu0 %vm5298_vm0, %v5299_v1 }
0x316b   :  { %4962 = vmatprep.subr.bf16.mxu0 %v5297_v0 }
0x316e   :  { %4964 = vmatpush3.bf16.msra.mxu0 %v5935_v22 }
0x316f   :  { %4971 = vmatprep.subr.bf16.mxu0 %v5297_v0 }
0x323c   :  { %v2855_v26 = vpop.f32.mrb[26].mxu0 }
0x323d   :  { %v2856_v11 = vadd.f32 %v2855_v26, %v5964_v56  ;;  %v4669_v28 = vpop.f32.mrb[27].mxu0 }
0x323f   :  { %v2860_v31 = vrot.slane %v2856_v11, 4 }
0x3241   :  { %2869 = vrot.lane.b32.xlu1 %v2860_v31, %s5300_s29  ;;  %v2862_v14 = vadd.f32 %v2860_v31, %v5973_v17 }
0x3243   :  { %v4161_v32 = vmul.f32 -1.442695, %v2862_v14  ;;  %v4152_v14 = vld [vmem:[%s6366_s17] ss:$0 sm:$0xff] }
0x3245   :  { %5149 = vpow2.f32 %v4161_v32 }
0x324f   :  { %v5150_v37 = vpop.eup %5149 }
0x3250   :  { %v2866_v34 = vadd.f32 1.0, %v5150_v37  ;;  %v6105_v37 = vadd.f32 %v4152_v14, %v5968_v29 }
0x3252   :  { %5151 = vrcp.f32 %v2866_v34 }
0x325c   :  { %v5152_v35 = vpop.eup %5151 }
0x325d   :  { %v2879_v45 = vsub.f32 1.0, %v5152_v35  ;;  %v2887_v46 = vmul.f32 %v5152_v35, %v2885_v2 }
0x32b3   :  { %v2870_v43 = vpop.permute.xlu1 %2869 }
0x32b4   :  { %v2872_v40 = vmul.f32 %v5152_v35, %v2870_v43 }
0x32b6   :  { %2874 = vrot.lane.b32.xlu0 %v2872_v40, %s5300_s29 }
0x3328   :  { %v2875_v41 = vpop.permute.xlu0 %2874 }
0x3329   :  { %v2877_v48 = vadd.f32 %v2875_v41, %v5973_v17 }
0x332b   :  { %5153 = vtanh.f32 %v2877_v48 }
0x3335   :  { %v5154_v42 = vpop.eup %5153 }
0x3336   :  { %2881 = vrot.lane.b32.xlu1 %v5154_v42, %s5301_s4 }
0x33a8   :  { %v2882_v59 = vpop.permute.xlu1 %2881 }
0x33a9   :  { %v2884_v54 = vmul.f32 %v2882_v59, %v2879_v45 }
0x33ab   :  { %v6051_v47 = vadd.f32 %v2887_v46, %v2884_v54 }
0x33ad   :  { %v2894_v49 = vrot.slane %v6051_v47, 4  ;;  %v2995_v3 = vrot.slane %v6051_v47, 7 }
0x33af   :  { %2895 = vrot.lane.b32.xlu0 %v2894_v49, %s5301_s4 }
0x3421   :  { %v2896_v50 = vpop.permute.xlu0 %2895 }
0x3422   :  { %4679 = vmatmul.mubr.msk.f32.vlgmr.msra.gmra.mrb[26].mxu1 %vm117_vm1, %v2896_v50 }
0x3423   :  { %4967 = vmatpush3.bf16.msra.mxu1 %v5924_v36  ;;  %4700 = vmatprep.mubr.msk.f32.mxu1 %vm5298_vm0, %v5299_v1 }
0x3424   :  { %4968 = vmatprep.subr.bf16.mxu1 %v5297_v0 }
0x3427   :  { %4970 = vmatpush3.bf16.msra.mxu1 %v5935_v22 }
0x3428   :  { %4977 = vmatprep.subr.bf16.mxu1 %v5297_v0 }
0x34f5   :  { %v2965_v51 = vpop.f32.mrb[26].mxu1 }
0x34f6   :  { %v2966_v52 = vadd.f32 %v2965_v51, %v5964_v56  ;;  %v4680_v55 = vpop.f32.mrb[27].mxu1 }
0x34f8   :  { %v2970_v61 = vrot.slane %v2966_v52, 3 }
0x34fa   :  { %2979 = vrot.lane.b32.xlu1 %v2970_v61, %s5300_s29  ;;  %v2972_v57 = vadd.f32 %v2970_v61, %v5973_v17 }
0x34fc   :  { %v4163_v58 = vmul.f32 -1.442695, %v2972_v57 }
0x34fe   :  { %5155 = vpow2.f32 %v4163_v58 }
0x3508   :  { %v5156_v36 = vpop.eup %5155 }
0x3509   :  { %v2976_v33 = vadd.f32 1.0, %v5156_v36 }
0x350b   :  { %5157 = vrcp.f32 %v2976_v33 }
0x3515   :  { %v5158_v25 = vpop.eup %5157 }
0x3516   :  { %v2989_v63 = vsub.f32 1.0, %v5158_v25  ;;  %v2997_v6 = vmul.f32 %v5158_v25, %v2995_v3 }
0x356c   :  { %v2980_v4 = vpop.permute.xlu1 %2979 }
0x356d   :  { %v2982_v39 = vmul.f32 %v5158_v25, %v2980_v4 }
0x356f   :  { %2984 = vrot.lane.b32.xlu0 %v2982_v39, %s5300_s29 }
0x35e1   :  { %v2985_v22 = vpop.permute.xlu0 %2984 }
0x35e2   :  { %v2987_v60 = vadd.f32 %v2985_v22, %v5973_v17 }
0x35e4   :  { %5159 = vtanh.f32 %v2987_v60 }
0x35ee   :  { %v5160_v62 = vpop.eup %5159 }
0x35ef   :  { %2991 = vrot.lane.b32.xlu1 %v5160_v62, %s5301_s4 }
0x3661   :  { %v2992_v5 = vpop.permute.xlu1 %2991 }
0x3662   :  { %v2994_v7 = vmul.f32 %v2992_v5, %v2989_v63 }
0x3664   :  { %v6069_v8 = vadd.f32 %v2997_v6, %v2994_v7 }
0x3666   :  { %v3004_v9 = vrot.slane %v6069_v8, 5  ;;  %v3105_v57 = vrot.slane %v6069_v8, 7 }
0x3668   :  { %3005 = vrot.lane.b32.xlu0 %v3004_v9, %s5301_s4 }
0x36da   :  { %v3006_v18 = vpop.permute.xlu0 %3005 }
0x36db   :  { %4690 = vmatmul.mubr.msk.f32.vlgmr.msra.gmra.mrb[28].mxu0 %vm117_vm1, %v3006_v18 }
0x36dc   :  { %4973 = vmatpush3.bf16.msra.mxu0 %v6073_v44  ;;  %4711 = vmatprep.mubr.msk.f32.mxu0 %vm5298_vm0, %v5299_v1 }
0x36dd   :  { %4974 = vmatprep.subr.bf16.mxu0 %v5297_v0 }
0x36e0   :  { %4976 = vmatpush3.bf16.msra.mxu0 %v6077_v19 }
0x36e1   :  { %4983 = vmatprep.subr.bf16.mxu0 %v5297_v0 }
0x36e3   :  { %4712 = vmatmul.mubr.f32.vlgmr.msra.gmra.mrb[30].mxu0 %v5299_v1 }
0x36e4   :  { %4985 = vmatpush3.bf16.msra.mxu0 %v6073_v44  ;;  %4733 = vmatprep.mubr.msk.f32.mxu0 %vm5298_vm0, %v5299_v1 }
0x36e5   :  { %4986 = vmatprep.subr.bf16.mxu0 %v5297_v0 }
0x36e8   :  { %4988 = vmatpush3.bf16.msra.mxu0 %v6077_v19 }
0x36e9   :  { %4995 = vmatprep.subr.bf16.mxu0 %v5297_v0 }
0x37ae   :  { %v3075_v20 = vpop.f32.mrb[28].mxu0 }
0x37af   :  { %v3076_v30 = vadd.f32 %v3075_v20, %v5964_v56  ;;  %v4691_v21 = vpop.f32.mrb[29].mxu0 }
0x37b1   :  { %v3080_v23 = vrot.slane %v3076_v30, 2 }
0x37b3   :  { %3089 = vrot.lane.b32.xlu1 %v3080_v23, %s5300_s29  ;;  %v3082_v31 = vadd.f32 %v3080_v23, %v5973_v17 }
0x37b5   :  { %v4165_v32 = vmul.f32 -1.442695, %v3082_v31 }
0x37b6   :  { %v3295_v24 = vpop.f32.mrb[30].mxu0 }
0x37b7   :  { %v3296_v26 = vadd.f32 %v3295_v24, %v6096_v27  ;;  %v4713_v11 = vpop.f32.mrb[31].mxu0  ;;  %5161 = vpow2.f32 %v4165_v32 }
0x37b9   :  { %v3300_v28 = vrot.slane %v3296_v26, 1 }
0x37bb   :  { %3309 = vrot.lane.b32.xlu0 %v3300_v28, %s5300_s29  ;;  %v3302_v34 = vadd.f32 %v3300_v28, %v6105_v37 }
0x37bd   :  { %v4168_v35 = vmul.f32 -1.442695, %v3302_v34 }
0x37bf   :  { %5163 = vpow2.f32 %v4168_v35 }
0x37c1   :  { %v5162_v43 = vpop.eup %5161 }
0x37c2   :  { %v3086_v40 = vadd.f32 1.0, %v5162_v43 }
0x37c4   :  { %5165 = vrcp.f32 %v3086_v40 }
0x37c9   :  { %v5164_v41 = vpop.eup %5163 }
0x37ca   :  { %v3306_v48 = vadd.f32 1.0, %v5164_v41 }
0x37cc   :  { %5167 = vrcp.f32 %v3306_v48 }
0x37ce   :  { %v5166_v42 = vpop.eup %5165 }
0x37cf   :  { %v3099_v61 = vsub.f32 1.0, %v5166_v42  ;;  %v3107_v36 = vmul.f32 %v5166_v42, %v3105_v57 }
0x37d6   :  { %v5168_v59 = vpop.eup %5167 }
0x37d7   :  { %v3319_v39 = vsub.f32 1.0, %v5168_v59  ;;  %v3325_v60 = vmul.f32 0.0, %v5168_v59 }
0x3825   :  { %v3090_v45 = vpop.permute.xlu1 %3089 }
0x3826   :  { %v3092_v2 = vmul.f32 %v5166_v42, %v3090_v45 }
0x3828   :  { %3094 = vrot.lane.b32.xlu1 %v3092_v2, %s5300_s29 }
0x382d   :  { %v3310_v46 = vpop.permute.xlu0 %3309 }
0x382e   :  { %v3312_v29 = vmul.f32 %v5168_v59, %v3310_v46 }
0x3830   :  { %3314 = vrot.lane.b32.xlu0 %v3312_v29, %s5300_s29 }
0x389a   :  { %v3095_v54 = vpop.permute.xlu1 %3094 }
0x389b   :  { %v3097_v49 = vadd.f32 %v3095_v54, %v5973_v17 }
0x389d   :  { %5169 = vtanh.f32 %v3097_v49 }
0x38a2   :  { %v3315_v50 = vpop.permute.xlu0 %3314 }
0x38a3   :  { %v3317_v51 = vadd.f32 %v3315_v50, %v6105_v37 }
0x38a5   :  { %5171 = vtanh.f32 %v3317_v51 }
0x38a7   :  { %v5170_v52 = vpop.eup %5169 }
0x38a8   :  { %3101 = vrot.lane.b32.xlu1 %v5170_v52, %s5301_s4 }
0x38af   :  { %v5172_v55 = vpop.eup %5171 }
0x38b0   :  { %3321 = vrot.lane.b32.xlu0 %v5172_v55, %s5301_s4 }
0x391a   :  { %v3102_v58 = vpop.permute.xlu1 %3101 }
0x391b   :  { %v3104_v33 = vmul.f32 %v3102_v58, %v3099_v61 }
0x391d   :  { %v6115_v25 = vadd.f32 %v3107_v36, %v3104_v33 }
0x391f   :  { %v3114_v4 = vrot.slane %v6115_v25, 6 }
0x3921   :  { %3115 = vrot.lane.b32.xlu1 %v3114_v4, %s5301_s4 }
0x3922   :  { %v3322_v22 = vpop.permute.xlu0 %3321 }
0x3923   :  { %v3324_v62 = vmul.f32 %v3322_v22, %v3319_v39 }
0x3925   :  { %v3326_v63 = vadd.f32 %v3325_v60, %v3324_v62 }
0x3927   :  { %v3329_v3 = vrot.slane %v3326_v63, 7  ;;  %v3433_v14 = vrot.slane %v3326_v63, 1 }
0x3929   :  { %3330 = vrot.lane.b32.xlu0 %v3329_v3, %s5301_s4 }
0x3993   :  { %v3116_v5 = vpop.permute.xlu1 %3115 }
0x3994   :  { %4701 = vmatmul.mubr.msk.f32.vlgmr.msra.gmra.mrb[28].mxu1 %vm117_vm1, %v3116_v5 }
0x3995   :  { %4979 = vmatpush3.bf16.msra.mxu1 %v6073_v44  ;;  %4722 = vmatprep.mubr.msk.f32.mxu1 %vm5298_vm0, %v5299_v1 }
0x3996   :  { %4980 = vmatprep.subr.bf16.mxu1 %v5297_v0 }
0x3999   :  { %4982 = vmatpush3.bf16.msra.mxu1 %v6077_v19 }
0x399a   :  { %4989 = vmatprep.subr.bf16.mxu1 %v5297_v0 }
0x399b   :  { %v6127_v6 = vpop.permute.xlu0 %3330 }
0x399c   :  { %4723 = vmatmul.mubr.msk.f32.vlgmr.msra.gmra.mrb[30].mxu1 %vm117_vm1, %v6127_v6 }
0x399d   :  { %4991 = vmatpush3.bf16.msra.mxu1 %v6073_v44  ;;  %4744 = vmatprep.mubr.msk.f32.mxu1 %vm5298_vm0, %v5299_v1 }
0x399e   :  { %4992 = vmatprep.subr.bf16.mxu1 %v5297_v0 }
0x39a1   :  { %4994 = vmatpush3.bf16.msra.mxu1 %v6077_v19 }
0x39a2   :  { %5001 = vmatprep.subr.bf16.mxu1 %v5297_v0 }
0x3a67   :  { %v6137_v7 = vpop.f32.mrb[28].mxu1 }
0x3a68   :  { %v4702_v9 = vpop.f32.mrb[29].mxu1 }
0x3a6f   :  { %v3403_v10 = vpop.f32.mrb[30].mxu1 }
0x3a70   :  { %v3404_v12 = vadd.f32 %v3403_v10, %v6096_v27  ;;  %v4724_v13 = vpop.f32.mrb[31].mxu1 }
0x3a72   :  { %v3408_v15 = vrot.slane %v3404_v12, 2 }
0x3a74   :  { %3417 = vrot.lane.b32.xlu1 %v3408_v15, %s5300_s29  ;;  %v3410_v18 = vadd.f32 %v3408_v15, %v6105_v37 }
0x3a76   :  { %v4170_v20 = vmul.f32 -1.442695, %v3410_v18 }
0x3a78   :  { %5173 = vpow2.f32 %v4170_v20 }
0x3a82   :  { %v5174_v30 = vpop.eup %5173 }
0x3a83   :  { %v3414_v21 = vadd.f32 1.0, %v5174_v30 }
0x3a85   :  { %5175 = vrcp.f32 %v3414_v21 }
0x3a8f   :  { %v5176_v23 = vpop.eup %5175 }
0x3a90   :  { %v3427_v32 = vsub.f32 1.0, %v5176_v23  ;;  %v3435_v35 = vmul.f32 %v5176_v23, %v3433_v14 }
0x3ae6   :  { %v3418_v24 = vpop.permute.xlu1 %3417 }
0x3ae7   :  { %v3420_v26 = vmul.f32 %v5176_v23, %v3418_v24 }
0x3ae9   :  { %3422 = vrot.lane.b32.xlu0 %v3420_v26, %s5300_s29 }
0x3b5b   :  { %v3423_v11 = vpop.permute.xlu0 %3422 }
0x3b5c   :  { %v3425_v28 = vadd.f32 %v3423_v11, %v6105_v37 }
0x3b5e   :  { %5177 = vtanh.f32 %v3425_v28 }
0x3b68   :  { %v5178_v31 = vpop.eup %5177 }
0x3b69   :  { %3429 = vrot.lane.b32.xlu1 %v5178_v31, %s5301_s4 }
0x3bdb   :  { %v3430_v34 = vpop.permute.xlu1 %3429 }
0x3bdc   :  { %v3432_v43 = vmul.f32 %v3430_v34, %v3427_v32 }
0x3bde   :  { %v3436_v40 = vadd.f32 %v3435_v35, %v3432_v43 }
0x3be0   :  { %v3439_v41 = vrot.slane %v3436_v40, 6  ;;  %v3543_v58 = vrot.slane %v3436_v40, 1 }
0x3be2   :  { %3440 = vrot.lane.b32.xlu0 %v3439_v41, %s5301_s4 }
0x3c54   :  { %v6146_v48 = vpop.permute.xlu0 %3440 }
0x3c55   :  { %4734 = vmatmul.mubr.msk.f32.vlgmr.msra.gmra.mrb[32].mxu0 %vm117_vm1, %v6146_v48 }
0x3c56   :  { %4997 = vmatpush3.bf16.msra.mxu0 %v6073_v44  ;;  %4755 = vmatprep.mubr.msk.f32.mxu0 %vm5298_vm0, %v5299_v1 }
0x3c57   :  { %4998 = vmatprep.subr.bf16.mxu0 %v5297_v0 }
0x3c5a   :  { %5000 = vmatpush3.bf16.msra.mxu0 %v6077_v19 }
0x3c5b   :  { %5007 = vmatprep.subr.bf16.mxu0 %v5297_v0 }
0x3d28   :  { %v3513_v42 = vpop.f32.mrb[32].mxu0 }
0x3d29   :  { %v3514_v45 = vadd.f32 %v3513_v42, %v6096_v27  ;;  %v4735_v2 = vpop.f32.mrb[33].mxu0 }
0x3d2b   :  { %v3518_v59 = vrot.slane %v3514_v45, 3 }
0x3d2d   :  { %3527 = vrot.lane.b32.xlu1 %v3518_v59, %s5300_s29  ;;  %v3520_v46 = vadd.f32 %v3518_v59, %v6105_v37 }
0x3d2f   :  { %v4172_v29 = vmul.f32 -1.442695, %v3520_v46 }
0x3d31   :  { %5179 = vpow2.f32 %v4172_v29 }
0x3d3b   :  { %v5180_v54 = vpop.eup %5179 }
0x3d3c   :  { %v3524_v49 = vadd.f32 1.0, %v5180_v54 }
0x3d3e   :  { %5181 = vrcp.f32 %v3524_v49 }
0x3d48   :  { %v5182_v50 = vpop.eup %5181 }
0x3d49   :  { %v3537_v36 = vsub.f32 1.0, %v5182_v50  ;;  %v3545_v4 = vmul.f32 %v5182_v50, %v3543_v58 }
0x3d9f   :  { %v3528_v51 = vpop.permute.xlu1 %3527 }
0x3da0   :  { %v3530_v52 = vmul.f32 %v5182_v50, %v3528_v51 }
0x3da2   :  { %3532 = vrot.lane.b32.xlu0 %v3530_v52, %s5300_s29 }
0x3e14   :  { %v3533_v55 = vpop.permute.xlu0 %3532 }
0x3e15   :  { %v3535_v61 = vadd.f32 %v3533_v55, %v6105_v37 }
0x3e17   :  { %5183 = vtanh.f32 %v3535_v61 }
0x3e21   :  { %v5184_v57 = vpop.eup %5183 }
0x3e22   :  { %3539 = vrot.lane.b32.xlu1 %v5184_v57, %s5301_s4 }
0x3e94   :  { %v3540_v33 = vpop.permute.xlu1 %3539 }
0x3e95   :  { %v3542_v39 = vmul.f32 %v3540_v33, %v3537_v36 }
0x3e97   :  { %v3546_v22 = vadd.f32 %v3545_v4, %v3542_v39 }
0x3e99   :  { %v3549_v60 = vrot.slane %v3546_v22, 5  ;;  %v3653_v26 = vrot.slane %v3546_v22, 1 }
0x3e9b   :  { %3550 = vrot.lane.b32.xlu0 %v3549_v60, %s5301_s4 }
0x3f0d   :  { %v6163_v62 = vpop.permute.xlu0 %3550 }
0x3f0e   :  { %4745 = vmatmul.mubr.msk.f32.vlgmr.msra.gmra.mrb[32].mxu1 %vm117_vm1, %v6163_v62 }
0x3f0f   :  { %5003 = vmatpush3.bf16.msra.mxu1 %v6073_v44  ;;  %4766 = vmatprep.mubr.msk.f32.mxu1 %vm5298_vm0, %v5299_v1 }
0x3f10   :  { %5004 = vmatprep.subr.bf16.mxu1 %v5297_v0 }
0x3f13   :  { %5006 = vmatpush3.bf16.msra.mxu1 %v6077_v19 }
0x3f14   :  { %5013 = vmatprep.subr.bf16.mxu1 %v5297_v0 }
0x3fe1   :  { %v3623_v63 = vpop.f32.mrb[32].mxu1 }
0x3fe2   :  { %v3624_v3 = vadd.f32 %v3623_v63, %v6096_v27  ;;  %v4746_v5 = vpop.f32.mrb[33].mxu1 }
0x3fe4   :  { %v3628_v9 = vrot.slane %v3624_v3, 4 }
0x3fe6   :  { %3637 = vrot.lane.b32.xlu1 %v3628_v9, %s5300_s29  ;;  %v3630_v10 = vadd.f32 %v3628_v9, %v6105_v37 }
0x3fe8   :  { %v4174_v12 = vmul.f32 -1.442695, %v3630_v10 }
0x3fea   :  { %5185 = vpow2.f32 %v4174_v12 }
0x3ff4   :  { %v5186_v13 = vpop.eup %5185 }
0x3ff5   :  { %v3634_v15 = vadd.f32 1.0, %v5186_v13 }
0x3ff7   :  { %5187 = vrcp.f32 %v3634_v15 }
0x4001   :  { %v5188_v18 = vpop.eup %5187 }
0x4002   :  { %v3647_v11 = vsub.f32 1.0, %v5188_v18  ;;  %v3655_v31 = vmul.f32 %v5188_v18, %v3653_v26 }
0x4058   :  { %v3638_v20 = vpop.permute.xlu1 %3637 }
0x4059   :  { %v3640_v30 = vmul.f32 %v5188_v18, %v3638_v20 }
0x405b   :  { %3642 = vrot.lane.b32.xlu0 %v3640_v30, %s5300_s29 }
0x40cd   :  { %v3643_v21 = vpop.permute.xlu0 %3642 }
0x40ce   :  { %v3645_v23 = vadd.f32 %v3643_v21, %v6105_v37 }
0x40d0   :  { %5189 = vtanh.f32 %v3645_v23 }
0x40da   :  { %v5190_v24 = vpop.eup %5189 }
0x40db   :  { %3649 = vrot.lane.b32.xlu1 %v5190_v24, %s5301_s4 }
0x414d   :  { %v3650_v28 = vpop.permute.xlu1 %3649 }
0x414e   :  { %v3652_v14 = vmul.f32 %v3650_v28, %v3647_v11 }
0x4150   :  { %v3656_v32 = vadd.f32 %v3655_v31, %v3652_v14 }
0x4152   :  { %v3659_v34 = vrot.slane %v3656_v32, 4  ;;  %v3763_v55 = vrot.slane %v3656_v32, 1 }
0x4154   :  { %3660 = vrot.lane.b32.xlu0 %v3659_v34, %s5301_s4 }
0x41c6   :  { %v6180_v35 = vpop.permute.xlu0 %3660 }
0x41c7   :  { %4756 = vmatmul.mubr.msk.f32.vlgmr.msra.gmra.mrb[34].mxu0 %vm117_vm1, %v6180_v35 }
0x41c8   :  { %5009 = vmatpush3.bf16.msra.mxu0 %v6073_v44  ;;  %4777 = vmatprep.mubr.msk.f32.mxu0 %vm5298_vm0, %v5299_v1 }
0x41c9   :  { %5010 = vmatprep.subr.bf16.mxu0 %v5297_v0 }
0x41cc   :  { %5012 = vmatpush3.bf16.msra.mxu0 %v6077_v19 }
0x429a   :  { %v3733_v43 = vpop.f32.mrb[34].mxu0 }
0x429b   :  { %v3734_v40 = vadd.f32 %v3733_v43, %v6096_v27  ;;  %v4757_v41 = vpop.f32.mrb[35].mxu0 }
0x429d   :  { %v3738_v42 = vrot.slane %v3734_v40, 5 }
0x429f   :  { %3747 = vrot.lane.b32.xlu1 %v3738_v42, %s5300_s29  ;;  %v3740_v45 = vadd.f32 %v3738_v42, %v6105_v37 }
0x42a1   :  { %v4176_v2 = vmul.f32 -1.442695, %v3740_v45 }
0x42a3   :  { %5191 = vpow2.f32 %v4176_v2 }
0x42ad   :  { %v5192_v59 = vpop.eup %5191 }
0x42ae   :  { %v3744_v46 = vadd.f32 1.0, %v5192_v59 }
0x42b0   :  { %5193 = vrcp.f32 %v3744_v46 }
0x42ba   :  { %v5194_v29 = vpop.eup %5193 }
0x42bb   :  { %v3757_v61 = vsub.f32 1.0, %v5194_v29  ;;  %v3765_v58 = vmul.f32 %v5194_v29, %v3763_v55 }
0x4311   :  { %v3748_v54 = vpop.permute.xlu1 %3747 }
0x4312   :  { %v3750_v49 = vmul.f32 %v5194_v29, %v3748_v54  ;;  %v3186_v29 = vadd.f32 %v6137_v7, %v5964_v56 }
0x4314   :  { %3752 = vrot.lane.b32.xlu0 %v3750_v49, %s5300_s29  ;;  %v3190_v49 = vrot.slane %v3186_v29, 1 }
0x4386   :  { %v3753_v50 = vpop.permute.xlu0 %3752 }
0x4387   :  { %v3755_v51 = vadd.f32 %v3753_v50, %v6105_v37  ;;  %v3192_v50 = vadd.f32 %v3190_v49, %v5973_v17 }
0x4389   :  { %5195 = vtanh.f32 %v3755_v51  ;;  %v4167_v51 = vmul.f32 -1.442695, %v3192_v50 }
0x4393   :  { %v5196_v52 = vpop.eup %5195 }
0x4394   :  { %3759 = vrot.lane.b32.xlu1 %v5196_v52, %s5301_s4 }
0x4406   :  { %v3760_v57 = vpop.permute.xlu1 %3759 }
0x4407   :  { %v3762_v36 = vmul.f32 %v3760_v57, %v3757_v61 }
0x4409   :  { %v3766_v33 = vadd.f32 %v3765_v58, %v3762_v36 }
0x440b   :  { %v3769_v4 = vrot.slane %v3766_v33, 3  ;;  %v3873_v18 = vrot.slane %v3766_v33, 1 }
0x440d   :  { %3770 = vrot.lane.b32.xlu0 %v3769_v4, %s5301_s4 }
0x447f   :  { %v6196_v39 = vpop.permute.xlu0 %3770 }
0x4480   :  { %4767 = vmatmul.mubr.msk.f32.vlgmr.msra.gmra.mrb[34].mxu1 %vm117_vm1, %v6196_v39 }
0x4481   :  { %5015 = vmatpush3.bf16.msra.mxu1 %v6073_v44  ;;  %4788 = vmatprep.mubr.msk.f32.mxu1 %vm5298_vm0, %v5299_v1 }
0x4482   :  { %5016 = vmatprep.subr.bf16.mxu1 %v5297_v0 }
0x4485   :  { %5018 = vmatpush3.bf16.msra.mxu1 %v6077_v19 }
0x4553   :  { %v3843_v22 = vpop.f32.mrb[34].mxu1 }
0x4554   :  { %v3844_v60 = vadd.f32 %v3843_v22, %v6096_v27  ;;  %v4768_v63 = vpop.f32.mrb[35].mxu1 }
0x4556   :  { %v3848_v3 = vrot.slane %v3844_v60, 6 }
0x4558   :  { %3857 = vrot.lane.b32.xlu1 %v3848_v3, %s5300_s29  ;;  %v3850_v5 = vadd.f32 %v3848_v3, %v6105_v37 }
0x455a   :  { %v4178_v9 = vmul.f32 -1.442695, %v3850_v5 }
0x455c   :  { %5197 = vpow2.f32 %v4178_v9 }
0x4566   :  { %v5198_v10 = vpop.eup %5197 }
0x4567   :  { %v3854_v44 = vadd.f32 1.0, %v5198_v10 }
0x4569   :  { %5199 = vrcp.f32 %v3854_v44  ;;  %v3215_v44 = vrot.slane %v6115_v25, 7 }
0x4573   :  { %v5200_v12 = vpop.eup %5199 }
0x4574   :  { %v3867_v20 = vsub.f32 1.0, %v5200_v12  ;;  %v3875_v21 = vmul.f32 %v5200_v12, %v3873_v18 }
0x45ca   :  { %v3858_v1 = vpop.permute.xlu1 %3857 }
0x45cb   :  { %v3860_v13 = vmul.f32 %v5200_v12, %v3858_v1 }
0x45cd   :  { %3862 = vrot.lane.b32.xlu0 %v3860_v13, %s5300_s29 }
0x463f   :  { %v3863_v0 = vpop.permute.xlu0 %3862 }
0x4640   :  { %v3865_v19 = vadd.f32 %v3863_v0, %v6105_v37 }
0x4642   :  { %5201 = vtanh.f32 %v3865_v19 }
0x464c   :  { %v5202_v15 = vpop.eup %5201 }
0x464d   :  { %3869 = vrot.lane.b32.xlu1 %v5202_v15, %s5301_s4 }
0x46bf   :  { %v3870_v30 = vpop.permute.xlu1 %3869 }
0x46c0   :  { %v3872_v23 = vmul.f32 %v3870_v30, %v3867_v20 }
0x46c2   :  { %v3876_v24 = vadd.f32 %v3875_v21, %v3872_v23 }
0x46c4   :  { %v3879_v26 = vrot.slane %v3876_v24, 2  ;;  %v3983_v61 = vrot.slane %v3876_v24, 1 }
0x46c6   :  { %3880 = vrot.lane.b32.xlu0 %v3879_v26, %s5301_s4 }
0x4738   :  { %v6212_v11 = vpop.permute.xlu0 %3880 }
0x4739   :  { %4778 = vmatmul.mubr.msk.f32.vlgmr.msra.gmra.mrb[36].mxu0 %vm117_vm1, %v6212_v11 }
0x480c   :  { %v3953_v28 = vpop.f32.mrb[36].mxu0 }
0x480d   :  { %v3954_v31 = vadd.f32 %v3953_v28, %v6096_v27  ;;  %v4779_v14 = vpop.f32.mrb[37].mxu0 }
0x480f   :  { %v3958_v32 = vrot.slane %v3954_v31, 7 }
0x4811   :  { %3967 = vrot.lane.b32.xlu1 %v3958_v32, %s5300_s29  ;;  %v3960_v34 = vadd.f32 %v3958_v32, %v6105_v37 }
0x4813   :  { %v4180_v43 = vmul.f32 -1.442695, %v3960_v34 }
0x4815   :  { %5203 = vpow2.f32 %v4180_v43 }
0x481f   :  { %v5204_v40 = vpop.eup %5203 }
0x4820   :  { %v3964_v41 = vadd.f32 1.0, %v5204_v40 }
0x4822   :  { %5205 = vrcp.f32 %v3964_v41 }
0x482c   :  { %v5206_v42 = vpop.eup %5205 }
0x482d   :  { %v3977_v57 = vsub.f32 1.0, %v5206_v42  ;;  %v3985_v36 = vmul.f32 %v5206_v42, %v3983_v61 }
0x4883   :  { %v3968_v45 = vpop.permute.xlu1 %3967 }
0x4884   :  { %v3970_v2 = vmul.f32 %v5206_v42, %v3968_v45 }
0x4886   :  { %3972 = vrot.lane.b32.xlu0 %v3970_v2, %s5300_s29 }
0x48f8   :  { %v3973_v59 = vpop.permute.xlu0 %3972 }
0x48f9   :  { %v3975_v46 = vadd.f32 %v3973_v59, %v6105_v37 }
0x48fb   :  { %5207 = vtanh.f32 %v3975_v46 }
0x48fc   :  { %5209 = vpow2.f32 %v4167_v51 }
0x4905   :  { %v5208_v54 = vpop.eup %5207 }
0x4906   :  { %3979 = vrot.lane.b32.xlu1 %v5208_v54, %s5301_s4  ;;  %v5210_v52 = vpop.eup %5209 }
0x4907   :  { %v3196_v55 = vadd.f32 1.0, %v5210_v52 }
0x4909   :  { %5211 = vrcp.f32 %v3196_v55 }
0x490a   :  { %3199 = vrot.lane.b32.xlu1 %v3190_v49, %s5300_s29 }
0x4913   :  { %v5212_v56 = vpop.eup %5211 }
0x4914   :  { %v3209_v10 = vsub.f32 1.0, %v5212_v56 }
0x4978   :  { %v3980_v58 = vpop.permute.xlu1 %3979 }
0x4979   :  { %v3982_v33 = vmul.f32 %v3980_v58, %v3977_v57 }
0x497b   :  { %v6226_v4 = vadd.f32 %v3985_v36, %v3982_v33 }
0x497c   :  { %v3200_v7 = vpop.permute.xlu1 %3199 }
0x497d   :  { %v3989_v22 = vrot.slane %v6226_v4, 1  ;;  %v3202_v60 = vmul.f32 %v5212_v56, %v3200_v7 }
0x497f   :  { %3990 = vrot.lane.b32.xlu0 %v3989_v22, %s5301_s4  ;;  %3204 = vrot.lane.b32.xlu1 %v3202_v60, %s5300_s29 }
0x49f1   :  { %v3991_v63 = vpop.permute.xlu0 %3990  ;;  %v3205_v3 = vpop.permute.xlu1 %3204 }
0x49f2   :  { %v3207_v5 = vadd.f32 %v3205_v3, %v5973_v17  ;;  %4789 = vmatmul.mubr.msk.f32.vlgmr.msra.gmra.mrb[36].mxu1 %vm117_vm1, %v3991_v63  ;;  %v3217_v17 = vmul.f32 %v5212_v56, %v3215_v44 }
0x49f4   :  { %5213 = vtanh.f32 %v3207_v5 }
0x49fe   :  { %v5214_v9 = vpop.eup %5213 }
0x49ff   :  { %3211 = vrot.lane.b32.xlu1 %v5214_v9, %s5301_s4 }
0x4a03   :  { %2560 = vrot.lane.b32.xlu1 %v5997_v38, %s5301_s4 }
0x4a07   :  { %2780 = vrot.lane.b32.xlu1 %v6033_v16, %s5301_s4 }
0x4a0b   :  { %3000 = vrot.lane.b32.xlu1 %v6069_v8, %s5301_s4 }
0x4a71   :  { %v3212_v12 = vpop.permute.xlu1 %3211 }
0x4a72   :  { %v3214_v1 = vmul.f32 %v3212_v12, %v3209_v10 }
0x4a74   :  { %v3218_v13 = vadd.f32 %v3217_v17, %v3214_v1 }
0x4a75   :  { %v2561_v0 = vpop.permute.xlu1 %2560 }
0x4a76   :  { %2563 = vst.msk [vmem:[%s6368_s19] sm:$0x2] %vm488_vm9, %v2561_v0  ;;  %3220 = vrot.lane.b32.xlu1 %v3218_v13, %s5301_s4 }
0x4a79   :  { %v2781_v38 = vpop.permute.xlu1 %2780 }
0x4a7a   :  { %2783 = vst.msk [vmem:[%s6368_s19] sm:$0x8] %vm710_vm8, %v2781_v38 }
0x4a7d   :  { %v3987_v16 = vld [vmem:[%s6368_s19 + $0x1] sm:$0x1]  ;;  %v3001_v8 = vpop.permute.xlu1 %3000 }
0x4a7e   :  { %v3993_v19 = vadd.f32 %v3991_v63, %v3987_v16  ;;  %3003 = vst.msk [vmem:[%s6368_s19] sm:$0x20] %vm932_vm7, %v3001_v8 }
0x4a80   :  { %3994 = vst.msk [vmem:[%s6368_s19 + $0x1] sm:$0x1] %vm380_vm2, %v3993_v19 }
0x4a81   :  { %v3767_v15 = vld [vmem:[%s6368_s19 + $0x3] sm:$0x1] }
0x4a82   :  { %v3773_v18 = vadd.f32 %v6196_v39, %v3767_v15 }
0x4a84   :  { %3774 = vst.msk [vmem:[%s6368_s19 + $0x3] sm:$0x1] %vm380_vm2, %v3773_v18 }
0x4a85   :  { %v3547_v20 = vld [vmem:[%s6368_s19 + $0x5] sm:$0x1] }
0x4a86   :  { %v3553_v30 = vadd.f32 %v6163_v62, %v3547_v20 }
0x4a88   :  { %3554 = vst.msk [vmem:[%s6368_s19 + $0x5] sm:$0x1] %vm380_vm2, %v3553_v30 }
0x4ac5   :  { %v4063_v21 = vpop.f32.mrb[36].mxu1 }
0x4ac6   :  { %v4064_v23 = vadd.f32 %v4063_v21, %v6096_v27  ;;  %v4790_v39 = vpop.f32.mrb[37].mxu1 }
0x4ac8   :  { %4075 = vrot.lane.b32.xlu0 %v4064_v23, %s5300_s29  ;;  %v4067_v27 = vadd.f32 %v4064_v23, %v6105_v37 }
0x4aca   :  { %v4182_v28 = vmul.f32 -1.442695, %v4067_v27 }
0x4acc   :  { %5215 = vpow2.f32 %v4182_v28 }
0x4ad6   :  { %v5216_v31 = vpop.eup %5215 }
0x4ad7   :  { %v4071_v14 = vadd.f32 1.0, %v5216_v31 }
0x4ad9   :  { %5217 = vrcp.f32 %v4071_v14 }
0x4ae3   :  { %v5218_v32 = vpop.eup %5217 }
0x4ae4   :  { %v4085_v42 = vsub.f32 1.0, %v5218_v32  ;;  %v4092_v2 = vmul.f32 %v5218_v32, %v3989_v22 }
0x4ae8   :  { %v3221_v24 = vpop.permute.xlu1 %3220 }
0x4ae9   :  { %3223 = vst.msk [vmem:[%s6368_s19] sm:$0x80] %vm1154_vm6, %v3221_v24 }
0x4af0   :  { %v3327_v62 = vld [vmem:[%s6368_s19 + $0x7] sm:$0x1] }
0x4af1   :  { %v3333_v26 = vadd.f32 %v6127_v6, %v3327_v62 }
0x4af3   :  { %3334 = vst.msk [vmem:[%s6368_s19 + $0x7] sm:$0x1] %vm380_vm2, %v3333_v26 }
0x4b3a   :  { %v4076_v34 = vpop.permute.xlu0 %4075 }
0x4b3b   :  { %v4078_v43 = vmul.f32 %v5218_v32, %v4076_v34 }
0x4b3d   :  { %4080 = vrot.lane.b32.xlu0 %v4078_v43, %s5300_s29 }
0x4baf   :  { %v4081_v40 = vpop.permute.xlu0 %4080 }
0x4bb0   :  { %v4083_v6 = vadd.f32 %v4081_v40, %v6105_v37 }
0x4bb2   :  { %5219 = vtanh.f32 %v4083_v6 }
0x4bbc   :  { %v5220_v41 = vpop.eup %5219 }
0x4bbd   :  { %4087 = vrot.lane.b32.xlu0 %v5220_v41, %s5301_s4 }
0x4bc1   :  { %2670 = vrot.lane.b32.xlu0 %v6015_v53, %s5301_s4 }
0x4bc5   :  { %2890 = vrot.lane.b32.xlu0 %v6051_v47, %s5301_s4 }
0x4bc9   :  { %3110 = vrot.lane.b32.xlu0 %v6115_v25, %s5301_s4 }
0x4c2f   :  { %v4088_v45 = vpop.permute.xlu0 %4087 }
0x4c30   :  { %v4090_v59 = vmul.f32 %v4088_v45, %v4085_v42 }
0x4c32   :  { %v4093_v37 = vadd.f32 %v4092_v2, %v4090_v59 }
0x4c33   :  { %v2671_v46 = vpop.permute.xlu0 %2670 }
0x4c34   :  { %2673 = vst.msk [vmem:[%s6368_s19] sm:$0x4] %vm599_vm5, %v2671_v46  ;;  %4096 = vrot.lane.b32.xlu0 %v4093_v37, %s5301_s4 }
0x4c37   :  { %v2891_v53 = vpop.permute.xlu0 %2890 }
0x4c38   :  { %2893 = vst.msk [vmem:[%s6368_s19] sm:$0x10] %vm821_vm4, %v2891_v53 }
0x4c3b   :  { %v3877_v47 = vld [vmem:[%s6368_s19 + $0x2] sm:$0x1]  ;;  %v3111_v25 = vpop.permute.xlu0 %3110 }
0x4c3c   :  { %v3883_v29 = vadd.f32 %v6212_v11, %v3877_v47  ;;  %3113 = vst.msk [vmem:[%s6368_s19] sm:$0x40] %vm1043_vm3, %v3111_v25 }
0x4c3e   :  { %3884 = vst.msk [vmem:[%s6368_s19 + $0x2] sm:$0x1] %vm380_vm2, %v3883_v29 }
0x4c3f   :  { %v3657_v54 = vld [vmem:[%s6368_s19 + $0x4] sm:$0x1] }
0x4c40   :  { %v3663_v49 = vadd.f32 %v6180_v35, %v3657_v54  ;;  %v4094_v35 = vld [vmem:[%s6368_s19] sm:$0x1] }
0x4c42   :  { %3664 = vst.msk [vmem:[%s6368_s19 + $0x4] sm:$0x1] %vm380_vm2, %v3663_v49 }
0x4c43   :  { %v3437_v11 = vld [vmem:[%s6368_s19 + $0x6] sm:$0x1] }
0x4c44   :  { %v3443_v50 = vadd.f32 %v6146_v48, %v3437_v11 }
0x4c46   :  { %3444 = vst.msk [vmem:[%s6368_s19 + $0x6] sm:$0x1] %vm380_vm2, %v3443_v50 }
0x4ca6   :  { %v4097_v51 = vpop.permute.xlu0 %4096 }
0x4ca7   :  { %v4099_v52 = vadd.f32 %v4097_v51, %v4094_v35 }
0x4ca9   :  { %4100 = vst.msk [vmem:[%s6368_s19] sm:$0x1] %vm380_vm2, %v4099_v52 }
0x4caa   :  { %4111 = vsyncpa [#allocation5], 1 }
0x4cab   :  { %4112 = vsyncpa [#allocation7], 1 }

</bundles_post_ra>
